<compile_context>
chip_gen: v6e
topology: v6e:2x2x1
jax: 0.10.0
libtpu: 0.0.40
codegen_flags: <defaults>
</compile_context>

<pallas_src>
import functools

import jax
import jax.numpy as jnp
from jax.experimental import pallas as pl
from jax.experimental.pallas import tpu as pltpu


_VMEM_LIMIT = 48 * 1024 * 1024          # > v5e/v6e scoped defaults, < v7x physical 64 MiB

_M_PREFS = (512, 256, 128, 64, 32, 16, 8)     # sublane-friendly (multiples of 8)
_N_PREFS = (512, 384, 256, 128)               # lane-friendly (multiples of 128)
_K_PREFS = (2048, 1024, 512, 256, 128)        # lane-friendly (multiples of 128)


def _pick(dim, prefs):
    """Largest preferred tile that divides `dim`, else the full dim (always legal)."""
    for p in prefs:
        if dim % p == 0:
            return p
    return dim


def _cparams(dims):
    return pltpu.CompilerParams(dimension_semantics=dims,
                                vmem_limit_bytes=_VMEM_LIMIT)


# ----------------------------- Pallas kernels ------------------------------ #

def _matmul_bias_kernel(x_ref, w_ref, b_ref, o_ref, acc_ref, *, relu):
    """Tiled matmul + bias (+ReLU).  grid = (M/tm, N/tn, K/tk), K innermost."""
    k = pl.program_id(2)

    @pl.when(k == 0)
    def _():
        acc_ref[...] = jnp.zeros_like(acc_ref)

    acc_ref[...] += jnp.dot(x_ref[...], w_ref[...],
                            preferred_element_type=jnp.float32)

    @pl.when(k == pl.num_programs(2) - 1)
    def _():
        y = acc_ref[...] + b_ref[...]
        if relu:
            y = jnp.maximum(y, 0.0)
        o_ref[...] = y.astype(o_ref.dtype)


def matmul_bias(x_bf16, w_bf16, b_f32, *, relu):
    """x: [M, K] bf16, w: [K, N] bf16, b: [N] f32 -> [M, N] f32 (tiled/pipelined)."""
    M, K = x_bf16.shape
    N = w_bf16.shape[1]
    tm = _pick(M, _M_PREFS)
    tn = _pick(N, _N_PREFS)
    tk = _pick(K, _K_PREFS)
    return pl.pallas_call(
        functools.partial(_matmul_bias_kernel, relu=relu),
        grid=(M // tm, N // tn, K // tk),
        in_specs=[pl.BlockSpec((tm, tk), lambda i, j, k: (i, k)),
                  pl.BlockSpec((tk, tn), lambda i, j, k: (k, j)),
                  pl.BlockSpec((1, tn), lambda i, j, k: (0, j))],
        out_specs=pl.BlockSpec((tm, tn), lambda i, j, k: (i, j)),
        out_shape=jax.ShapeDtypeStruct((M, N), jnp.float32),
        scratch_shapes=[pltpu.VMEM((tm, tn), jnp.float32)],
        compiler_params=_cparams(("parallel", "parallel", "arbitrary")),
    )(x_bf16, w_bf16, b_f32.reshape(1, N))


def _conv_stats_kernel(x_ref, w_ref, o_ref, sum_ref, ssq_ref, acc_ref):
    """Conv-as-matmul (no bias) fused with per-channel sum / sum-of-squares.

    grid = (M/tm, K/tk); M is 'arbitrary' because stats accumulate across it.
    """
    i = pl.program_id(0)
    k = pl.program_id(1)

    @pl.when((i == 0) & (k == 0))
    def _():
        sum_ref[...] = jnp.zeros_like(sum_ref)
        ssq_ref[...] = jnp.zeros_like(ssq_ref)

    @pl.when(k == 0)
    def _():
        acc_ref[...] = jnp.zeros_like(acc_ref)

    acc_ref[...] += jnp.dot(x_ref[...], w_ref[...],
                            preferred_element_type=jnp.float32)

    @pl.when(k == pl.num_programs(1) - 1)
    def _():
        y = acc_ref[...]
        o_ref[...] = y
        sum_ref[...] += jnp.sum(y, axis=0, keepdims=True)
        ssq_ref[...] += jnp.sum(y * y, axis=0, keepdims=True)


def _bn_norm_relu_kernel(x_ref, sum_ref, ssq_ref, g_ref, b_ref, o_ref, *, inv_m):
    """Apply BatchNorm (training-mode batch stats, biased var) + ReLU per M-tile."""
    x = x_ref[...]
    mean = sum_ref[...] * inv_m
    var = ssq_ref[...] * inv_m - mean * mean
    inv_std = jax.lax.rsqrt(var + 1e-5)
    y = (x - mean) * inv_std * g_ref[...] + b_ref[...]
    o_ref[...] = jnp.maximum(y, 0.0)


def _head_kernel(flat_ref, w1_ref, b1_ref, wmu_ref, bmu_ref, wls_ref, bls_ref,
                 eps_ref, z_ref, mu_ref, sig_ref, acc_ref):
    """Fused fc1 (K-tiled) -> ReLU -> fc2 (split mu / log_sigma columns) -> sample."""
    k = pl.program_id(0)

    @pl.when(k == 0)
    def _():
        acc_ref[...] = jnp.zeros_like(acc_ref)

    acc_ref[...] += jnp.dot(flat_ref[...], w1_ref[...],
                            preferred_element_type=jnp.float32)

    @pl.when(k == pl.num_programs(0) - 1)
    def _():
        h1 = jnp.maximum(acc_ref[...] + b1_ref[...], 0.0)
        h1b = h1.astype(jnp.bfloat16)
        mu = jnp.dot(h1b, wmu_ref[...], preferred_element_type=jnp.float32) + bmu_ref[...]
        ls = jnp.dot(h1b, wls_ref[...], preferred_element_type=jnp.float32) + bls_ref[...]
        sigma = jnp.exp(ls)
        mu_ref[...] = mu
        sig_ref[...] = sigma
        z_ref[...] = mu + sigma * eps_ref[...]


# ------------------------------- wrappers ----------------------------------- #

def im2col_3x3_s2(x_nhwc):
    """3x3, stride 2, padding 1 patches. Returns [N*OH*OW, 9*C] and (N, OH, OW)."""
    N, H, W, C = x_nhwc.shape
    OH, OW = H // 2, W // 2
    xp = jnp.pad(x_nhwc, ((0, 0), (1, 1), (1, 1), (0, 0)))
    cols = []
    for kh in range(3):
        for kw in range(3):
            cols.append(xp[:, kh:kh + 2 * OH:2, kw:kw + 2 * OW:2, :])
    patches = jnp.concatenate(cols, axis=-1)                 # [N, OH, OW, 9*C]
    return patches.reshape(N * OH * OW, 9 * C), (N, OH, OW)


def conv_bn_relu_down(h_nhwc, w_mat_bf16, gamma, beta):
    """Conv2d(3x3, s=2, p=1, bias folded into BN) -> BatchNorm2d (train) -> ReLU."""
    patches, (n, oh, ow) = im2col_3x3_s2(h_nhwc)
    M, K = patches.shape
    C = w_mat_bf16.shape[1]
    tm = _pick(M, _M_PREFS)
    tk = _pick(K, _K_PREFS)

    conv, csum, cssq = pl.pallas_call(
        _conv_stats_kernel,
        grid=(M // tm, K // tk),
        in_specs=[pl.BlockSpec((tm, tk), lambda i, k: (i, k)),
                  pl.BlockSpec((tk, C), lambda i, k: (k, 0))],
        out_specs=(pl.BlockSpec((tm, C), lambda i, k: (i, 0)),
                   pl.BlockSpec((1, C), lambda i, k: (0, 0)),
                   pl.BlockSpec((1, C), lambda i, k: (0, 0))),
        out_shape=(jax.ShapeDtypeStruct((M, C), jnp.float32),
                   jax.ShapeDtypeStruct((1, C), jnp.float32),
                   jax.ShapeDtypeStruct((1, C), jnp.float32)),
        scratch_shapes=[pltpu.VMEM((tm, C), jnp.float32)],
        compiler_params=_cparams(("arbitrary", "arbitrary")),
    )(patches.astype(jnp.bfloat16), w_mat_bf16)

    y = pl.pallas_call(
        functools.partial(_bn_norm_relu_kernel, inv_m=1.0 / M),
        grid=(M // tm,),
        in_specs=[pl.BlockSpec((tm, C), lambda i: (i, 0)),
                  pl.BlockSpec((1, C), lambda i: (0, 0)),
                  pl.BlockSpec((1, C), lambda i: (0, 0)),
                  pl.BlockSpec((1, C), lambda i: (0, 0)),
                  pl.BlockSpec((1, C), lambda i: (0, 0))],
        out_specs=pl.BlockSpec((tm, C), lambda i: (i, 0)),
        out_shape=jax.ShapeDtypeStruct((M, C), jnp.float32),
        compiler_params=_cparams(("parallel",)),
    )(conv, csum, cssq, gamma.reshape(1, C), beta.reshape(1, C))

    return y.reshape(n, oh, ow, C)


def head_forward(flat_bf16, w1, b1, wmu, bmu, wls, bls, eps):
    """Fused fc1 -> ReLU -> fc2 -> reparameterization sample (single pallas_call)."""
    B, K = flat_bf16.shape
    twoL = w1.shape[1]
    L = wmu.shape[1]
    tk = _pick(K, _K_PREFS)
    shp = jax.ShapeDtypeStruct((B, L), jnp.float32)
    return pl.pallas_call(
        _head_kernel,
        grid=(K // tk,),
        in_specs=[pl.BlockSpec((B, tk), lambda k: (0, k)),
                  pl.BlockSpec((tk, twoL), lambda k: (k, 0)),
                  pl.BlockSpec((1, twoL), lambda k: (0, 0)),
                  pl.BlockSpec((twoL, L), lambda k: (0, 0)),
                  pl.BlockSpec((1, L), lambda k: (0, 0)),
                  pl.BlockSpec((twoL, L), lambda k: (0, 0)),
                  pl.BlockSpec((1, L), lambda k: (0, 0)),
                  pl.BlockSpec((B, L), lambda k: (0, 0))],
        out_specs=(pl.BlockSpec((B, L), lambda k: (0, 0)),
                   pl.BlockSpec((B, L), lambda k: (0, 0)),
                   pl.BlockSpec((B, L), lambda k: (0, 0))),
        out_shape=(shp, shp, shp),
        scratch_shapes=[pltpu.VMEM((B, twoL), jnp.float32)],
        compiler_params=_cparams(("arbitrary",)),
    )(flat_bf16, w1, b1, wmu, bmu, wls, bls, eps)


# --------------------------- parameter handling ------------------------------ #

def init_params(key, img_size, latent_size, start_channels, downsamplings):
    """Deterministic synthetic parameters in PyTorch weight layouts."""
    n_keys = 2 + downsamplings + 2
    keys = list(jax.random.split(key, n_keys))
    p = {}
    k = keys.pop(0)
    p["conv0"] = (0.1 * jax.random.normal(k, (start_channels, 3, 1, 1), jnp.float32),
                  jnp.zeros((start_channels,), jnp.float32))
    down = []
    for i in range(downsamplings):
        cin = (2 ** i) * start_channels
        cout = (2 ** (i + 1)) * start_channels
        kw_ = keys.pop(0)
        w = 0.1 * jax.random.normal(kw_, (cout, cin, 3, 3), jnp.float32)
        b = jnp.zeros((cout,), jnp.float32)
        gamma = jnp.ones((cout,), jnp.float32)
        beta = jnp.zeros((cout,), jnp.float32)
        down.append((w, b, gamma, beta))
    p["down"] = down
    flat_dim = start_channels * img_size ** 2 // (2 ** downsamplings)
    k1 = keys.pop(0)
    p["fc1"] = (0.05 * jax.random.normal(k1, (2 * latent_size, flat_dim), jnp.float32),
                jnp.zeros((2 * latent_size,), jnp.float32))
    k2 = keys.pop(0)
    p["fc2"] = (0.05 * jax.random.normal(k2, (2 * latent_size, 2 * latent_size), jnp.float32),
                jnp.zeros((2 * latent_size,), jnp.float32))
    return p


def prepare_params(raw, img_size, downsamplings):
    """One-time re-layout: im2col weight matrices, bf16 casts, pre-transposed fc
    weights, fc1 K-axis permuted to NHWC-flatten order, fc2 columns split."""
    prepped = {}
    w0, b0 = raw["conv0"]                                    # [sc, 3, 1, 1]
    prepped["conv0_w"] = w0.reshape(w0.shape[0], 3).T.astype(jnp.bfloat16)   # [3, sc]
    prepped["conv0_b"] = b0

    down = []
    for (w, b, gamma, beta) in raw["down"]:
        cout = w.shape[0]
        # torch [Cout, Cin, KH, KW] -> im2col matrix [(KH,KW,Cin), Cout]
        w_mat = jnp.transpose(w, (2, 3, 1, 0)).reshape(-1, cout).astype(jnp.bfloat16)
        # conv bias is exactly cancelled by training-mode BatchNorm mean -> dropped.
        down.append((w_mat, gamma, beta))
    prepped["down"] = down

    w1, b1 = raw["fc1"]                                      # [2L, flat_dim]
    twoL = w1.shape[0]
    cf = raw["down"][-1][0].shape[0] if downsamplings > 0 else raw["conv0"][0].shape[0]
    hf = img_size // (2 ** downsamplings)
    # permute K rows from NCHW-flatten order (torch nn.Flatten) to NHWC-flatten
    # order so the activation flatten is a plain reshape (no transpose).
    w1t = w1.T.reshape(cf, hf, hf, twoL).transpose(1, 2, 0, 3).reshape(-1, twoL)
    prepped["fc1_w"] = w1t.astype(jnp.bfloat16)
    prepped["fc1_b"] = b1

    w2, b2 = raw["fc2"]                                      # [2L, 2L]
    L = twoL // 2
    w2t = w2.T
    prepped["fc2_wmu"] = w2t[:, :L].astype(jnp.bfloat16)
    prepped["fc2_bmu"] = b2[:L]
    prepped["fc2_wls"] = w2t[:, L:].astype(jnp.bfloat16)
    prepped["fc2_bls"] = b2[L:]
    return prepped


# ------------------------------ forward pass -------------------------------- #

def encoder_forward(prepped, x_nchw, noise_key):
    x = jnp.transpose(x_nchw, (0, 2, 3, 1))                  # NCHW -> NHWC (input only)
    N, H, W, C = x.shape

    # Conv2d(3, sc, 1) + ReLU == per-pixel matmul
    h = matmul_bias(x.reshape(N * H * W, C).astype(jnp.bfloat16),
                    prepped["conv0_w"], prepped["conv0_b"], relu=True)
    h = h.reshape(N, H, W, -1)

    # Downsampling: Conv2d(3x3, s=2, p=1) -> BatchNorm2d -> ReLU (bias folded out)
    for (w_mat, gamma, beta) in prepped["down"]:
        h = conv_bn_relu_down(h, w_mat, gamma, beta)

    # Flatten: fc1's K axis was pre-permuted to NHWC order, so this is a reshape.
    flat = h.reshape(N, -1)

    L = prepped["fc2_wmu"].shape[1]
    eps = jax.random.normal(noise_key, (N, L), jnp.float32)

    z, mu, sigma = head_forward(
        flat.astype(jnp.bfloat16),
        prepped["fc1_w"], prepped["fc1_b"].reshape(1, -1),
        prepped["fc2_wmu"], prepped["fc2_bmu"].reshape(1, -1),
        prepped["fc2_wls"], prepped["fc2_bls"].reshape(1, -1),
        eps)
    return z, (mu, sigma)


if __name__ == "__main__":
    # Small, shape-consistent config: img_size=16, latent=32, start_channels=4, downsamplings=2
    IMG, LAT, SC, DS, BATCH = 16, 32, 4, 2, 2

    root = jax.random.PRNGKey(0)
    k_param, k_data, k_noise = jax.random.split(root, 3)

    raw_params = init_params(k_param, IMG, LAT, SC, DS)
    params = prepare_params(raw_params, IMG, DS)
    x = jax.random.normal(k_data, (BATCH, 3, IMG, IMG), jnp.float32)   # NCHW input

    fwd = jax.jit(encoder_forward)
    z, (mu, sigma) = fwd(params, x, k_noise)
    jax.block_until_ready((z, mu, sigma))

    assert z.shape == (BATCH, LAT) and mu.shape == (BATCH, LAT) and sigma.shape == (BATCH, LAT)
    assert bool(jnp.all(sigma > 0))
    assert bool(jnp.all(jnp.isfinite(z)))
    print("KERNEL_OK")
</pallas_src>

<mosaic_0001>
module attributes {stable_mosaic.version = 11 : i64} {
  func.func @_matmul_bias_kernel(%arg0: i32, %arg1: i32, %arg2: i32, %arg3: memref<512x3xbf16, #tpu.memory_space<vmem>>, %arg4: memref<3x4xbf16, #tpu.memory_space<vmem>>, %arg5: memref<1x4xf32, #tpu.memory_space<vmem>>, %arg6: memref<512x4xf32, #tpu.memory_space<vmem>>, %arg7: memref<512x4xf32, #tpu.memory_space<vmem>>) attributes {dimension_semantics = [#tpu.dimension_semantics<parallel>, #tpu.dimension_semantics<parallel>, #tpu.dimension_semantics<arbitrary>], iteration_bounds = array<i64: 1, 1, 1>, scalar_prefetch = 0 : i64, scratch_operands = 1 : i64, tpu.core_type = #tpu.core_type<tc>, window_params = [{transform_indices = @transform_0, window_bounds = array<i64: 512, 3>}, {transform_indices = @transform_1, window_bounds = array<i64: 3, 4>}, {transform_indices = @transform_2, window_bounds = array<i64: 1, 4>}, {transform_indices = @transform_3, window_bounds = array<i64: 512, 4>}]} {
    %c0_i32 = arith.constant 0 : i32
    %0 = arith.cmpi eq, %arg2, %c0_i32 : i32
    %1 = arith.extui %0 : i1 to i32
    %c0_i32_0 = arith.constant 0 : i32
    %2 = arith.cmpi ne, %1, %c0_i32_0 : i32
    scf.if %2 {
      %cst_10 = arith.constant 0.000000e+00 : f32
      %12 = vector.broadcast %cst_10 : f32 to vector<512x4xf32>
      %c0_11 = arith.constant 0 : index
      %c0_12 = arith.constant 0 : index
      %13 = vector.load %arg7[%c0_11, %c0_12] : memref<512x4xf32, #tpu.memory_space<vmem>>, vector<512x4xf32>
      tpu.vector_store %arg7[%c0_11, %c0_12], %12 {strides = array<i32>} : memref<512x4xf32, #tpu.memory_space<vmem>>, vector<512x4xf32>,
    } else {
    }
    %c0 = arith.constant 0 : index
    %c0_1 = arith.constant 0 : index
    %3 = vector.load %arg7[%c0, %c0_1] : memref<512x4xf32, #tpu.memory_space<vmem>>, vector<512x4xf32>
    %c0_2 = arith.constant 0 : index
    %c0_3 = arith.constant 0 : index
    %4 = vector.load %arg3[%c0_2, %c0_3] : memref<512x3xbf16, #tpu.memory_space<vmem>>, vector<512x3xbf16>
    %c0_4 = arith.constant 0 : index
    %c0_5 = arith.constant 0 : index
    %5 = vector.load %arg4[%c0_4, %c0_5] : memref<3x4xbf16, #tpu.memory_space<vmem>>, vector<3x4xbf16>
    %cst = arith.constant dense<0.000000e+00> : vector<512x4xf32>
    %6 = tpu.matmul %4, %5, %cst {dimension_numbers = #tpu.dot_dimension_numbers<[1], [0], [0], [1], [0, 0, 1, 1], [], []>} : vector<512x3xbf16>, vector<3x4xbf16>, vector<512x4xf32> -> vector<512x4xf32>
    %7 = arith.addf %3, %6 : vector<512x4xf32>
    %c0_6 = arith.constant 0 : index
    %c0_7 = arith.constant 0 : index
    %8 = vector.load %arg7[%c0_6, %c0_7] : memref<512x4xf32, #tpu.memory_space<vmem>>, vector<512x4xf32>
    tpu.vector_store %arg7[%c0_6, %c0_7], %7 {strides = array<i32>} : memref<512x4xf32, #tpu.memory_space<vmem>>, vector<512x4xf32>,
    %c0_i32_8 = arith.constant 0 : i32
    %9 = arith.cmpi eq, %arg2, %c0_i32_8 : i32
    %10 = arith.extui %9 : i1 to i32
    %c0_i32_9 = arith.constant 0 : i32
    %11 = arith.cmpi ne, %10, %c0_i32_9 : i32
    scf.if %11 {
      %c0_10 = arith.constant 0 : index
      %c0_11 = arith.constant 0 : index
      %12 = vector.load %arg7[%c0_10, %c0_11] : memref<512x4xf32, #tpu.memory_space<vmem>>, vector<512x4xf32>
      %c0_12 = arith.constant 0 : index
      %c0_13 = arith.constant 0 : index
      %13 = vector.load %arg5[%c0_12, %c0_13] : memref<1x4xf32, #tpu.memory_space<vmem>>, vector<1x4xf32>
      %14 = vector.broadcast %13 : vector<1x4xf32> to vector<512x4xf32>
      %15 = arith.addf %12, %14 : vector<512x4xf32>
      %cst_14 = arith.constant 0.000000e+00 : f32
      %16 = vector.broadcast %cst_14 : f32 to vector<512x4xf32>
      %17 = arith.maximumf %15, %16 : vector<512x4xf32>
      %c0_15 = arith.constant 0 : index
      %c0_16 = arith.constant 0 : index
      %18 = vector.load %arg6[%c0_15, %c0_16] : memref<512x4xf32, #tpu.memory_space<vmem>>, vector<512x4xf32>
      tpu.vector_store %arg6[%c0_15, %c0_16], %17 {strides = array<i32>} : memref<512x4xf32, #tpu.memory_space<vmem>>, vector<512x4xf32>,
    } else {
    }
    return
  }
  func.func @transform_0(%arg0: i32, %arg1: i32, %arg2: i32) -> (i32, i32) {
    %c0_i32 = arith.constant 0 : i32
    return %arg0, %arg2 : i32, i32
  }
  func.func @transform_1(%arg0: i32, %arg1: i32, %arg2: i32) -> (i32, i32) {
    %c0_i32 = arith.constant 0 : i32
    return %arg2, %arg1 : i32, i32
  }
  func.func @transform_2(%arg0: i32, %arg1: i32, %arg2: i32) -> (i32, i32) {
    %c0_i32 = arith.constant 0 : i32
    %c0_i32_0 = arith.constant 0 : i32
    return %c0_i32, %arg1 : i32, i32
  }
  func.func @transform_3(%arg0: i32, %arg1: i32, %arg2: i32) -> (i32, i32) {
    %c0_i32 = arith.constant 0 : i32
    return %arg0, %arg1 : i32, i32
  }
}

module attributes {stable_mosaic.version = 11 : i64} {
  func.func @_conv_stats_kernel(%arg0: i32, %arg1: i32, %arg2: memref<128x36xbf16, #tpu.memory_space<vmem>>, %arg3: memref<36x8xbf16, #tpu.memory_space<vmem>>, %arg4: memref<128x8xf32, #tpu.memory_space<vmem>>, %arg5: memref<1x8xf32, #tpu.memory_space<vmem>>, %arg6: memref<1x8xf32, #tpu.memory_space<vmem>>, %arg7: memref<128x8xf32, #tpu.memory_space<vmem>>) attributes {dimension_semantics = [#tpu.dimension_semantics<arbitrary>, #tpu.dimension_semantics<arbitrary>], iteration_bounds = array<i64: 1, 1>, scalar_prefetch = 0 : i64, scratch_operands = 1 : i64, tpu.core_type = #tpu.core_type<tc>, window_params = [{transform_indices = @transform_0, window_bounds = array<i64: 128, 36>}, {transform_indices = @transform_1, window_bounds = array<i64: 36, 8>}, {transform_indices = @transform_2, window_bounds = array<i64: 128, 8>}, {pipeline_mode = #tpu.pipeline_mode<synchronous>, transform_indices = @transform_3, window_bounds = array<i64: 1, 8>}, {pipeline_mode = #tpu.pipeline_mode<synchronous>, transform_indices = @transform_4, window_bounds = array<i64: 1, 8>}]} {
    %c0_i32 = arith.constant 0 : i32
    %0 = arith.cmpi eq, %arg0, %c0_i32 : i32
    %c0_i32_0 = arith.constant 0 : i32
    %1 = arith.cmpi eq, %arg1, %c0_i32_0 : i32
    %2 = arith.andi %0, %1 : i1
    %3 = arith.extui %2 : i1 to i32
    %c0_i32_1 = arith.constant 0 : i32
    %4 = arith.cmpi ne, %3, %c0_i32_1 : i32
    scf.if %4 {
      %cst_13 = arith.constant 0.000000e+00 : f32
      %17 = vector.broadcast %cst_13 : f32 to vector<1x8xf32>
      %c0_14 = arith.constant 0 : index
      %c0_15 = arith.constant 0 : index
      %18 = vector.load %arg5[%c0_14, %c0_15] : memref<1x8xf32, #tpu.memory_space<vmem>>, vector<1x8xf32>
      tpu.vector_store %arg5[%c0_14, %c0_15], %17 {strides = array<i32>} : memref<1x8xf32, #tpu.memory_space<vmem>>, vector<1x8xf32>,
      %cst_16 = arith.constant 0.000000e+00 : f32
      %19 = vector.broadcast %cst_16 : f32 to vector<1x8xf32>
      %c0_17 = arith.constant 0 : index
      %c0_18 = arith.constant 0 : index
      %20 = vector.load %arg6[%c0_17, %c0_18] : memref<1x8xf32, #tpu.memory_space<vmem>>, vector<1x8xf32>
      tpu.vector_store %arg6[%c0_17, %c0_18], %19 {strides = array<i32>} : memref<1x8xf32, #tpu.memory_space<vmem>>, vector<1x8xf32>,
    } else {
    }
    %c0_i32_2 = arith.constant 0 : i32
    %5 = arith.cmpi eq, %arg1, %c0_i32_2 : i32
    %6 = arith.extui %5 : i1 to i32
    %c0_i32_3 = arith.constant 0 : i32
    %7 = arith.cmpi ne, %6, %c0_i32_3 : i32
    scf.if %7 {
      %cst_13 = arith.constant 0.000000e+00 : f32
      %17 = vector.broadcast %cst_13 : f32 to vector<128x8xf32>
      %c0_14 = arith.constant 0 : index
      %c0_15 = arith.constant 0 : index
      %18 = vector.load %arg7[%c0_14, %c0_15] : memref<128x8xf32, #tpu.memory_space<vmem>>, vector<128x8xf32>
      tpu.vector_store %arg7[%c0_14, %c0_15], %17 {strides = array<i32>} : memref<128x8xf32, #tpu.memory_space<vmem>>, vector<128x8xf32>,
    } else {
    }
    %c0 = arith.constant 0 : index
    %c0_4 = arith.constant 0 : index
    %8 = vector.load %arg7[%c0, %c0_4] : memref<128x8xf32, #tpu.memory_space<vmem>>, vector<128x8xf32>
    %c0_5 = arith.constant 0 : index
    %c0_6 = arith.constant 0 : index
    %9 = vector.load %arg2[%c0_5, %c0_6] : memref<128x36xbf16, #tpu.memory_space<vmem>>, vector<128x36xbf16>
    %c0_7 = arith.constant 0 : index
    %c0_8 = arith.constant 0 : index
    %10 = vector.load %arg3[%c0_7, %c0_8] : memref<36x8xbf16, #tpu.memory_space<vmem>>, vector<36x8xbf16>
    %cst = arith.constant dense<0.000000e+00> : vector<128x8xf32>
    %11 = tpu.matmul %9, %10, %cst {dimension_numbers = #tpu.dot_dimension_numbers<[1], [0], [0], [1], [0, 0, 1, 1], [], []>} : vector<128x36xbf16>, vector<36x8xbf16>, vector<128x8xf32> -> vector<128x8xf32>
    %12 = arith.addf %8, %11 : vector<128x8xf32>
    %c0_9 = arith.constant 0 : index
    %c0_10 = arith.constant 0 : index
    %13 = vector.load %arg7[%c0_9, %c0_10] : memref<128x8xf32, #tpu.memory_space<vmem>>, vector<128x8xf32>
    tpu.vector_store %arg7[%c0_9, %c0_10], %12 {strides = array<i32>} : memref<128x8xf32, #tpu.memory_space<vmem>>, vector<128x8xf32>,
    %c0_i32_11 = arith.constant 0 : i32
    %14 = arith.cmpi eq, %arg1, %c0_i32_11 : i32
    %15 = arith.extui %14 : i1 to i32
    %c0_i32_12 = arith.constant 0 : i32
    %16 = arith.cmpi ne, %15, %c0_i32_12 : i32
    scf.if %16 {
      %c0_13 = arith.constant 0 : index
      %c0_14 = arith.constant 0 : index
      %17 = vector.load %arg7[%c0_13, %c0_14] : memref<128x8xf32, #tpu.memory_space<vmem>>, vector<128x8xf32>
      %c0_15 = arith.constant 0 : index
      %c0_16 = arith.constant 0 : index
      %18 = vector.load %arg4[%c0_15, %c0_16] : memref<128x8xf32, #tpu.memory_space<vmem>>, vector<128x8xf32>
      tpu.vector_store %arg4[%c0_15, %c0_16], %17 {strides = array<i32>} : memref<128x8xf32, #tpu.memory_space<vmem>>, vector<128x8xf32>,
      %c0_17 = arith.constant 0 : index
      %c0_18 = arith.constant 0 : index
      %19 = vector.load %arg5[%c0_17, %c0_18] : memref<1x8xf32, #tpu.memory_space<vmem>>, vector<1x8xf32>
      %cst_19 = arith.constant dense<0.000000e+00> : vector<8xf32>
      %20 = vector.multi_reduction <add>, %17, %cst_19 [0] : vector<128x8xf32> to vector<8xf32>
      %21 = vector.shape_cast %20 : vector<8xf32> to vector<1x8xf32>
      %22 = arith.addf %19, %21 : vector<1x8xf32>
      %c0_20 = arith.constant 0 : index
      %c0_21 = arith.constant 0 : index
      %23 = vector.load %arg5[%c0_20, %c0_21] : memref<1x8xf32, #tpu.memory_space<vmem>>, vector<1x8xf32>
      tpu.vector_store %arg5[%c0_20, %c0_21], %22 {strides = array<i32>} : memref<1x8xf32, #tpu.memory_space<vmem>>, vector<1x8xf32>,
      %c0_22 = arith.constant 0 : index
      %c0_23 = arith.constant 0 : index
      %24 = vector.load %arg6[%c0_22, %c0_23] : memref<1x8xf32, #tpu.memory_space<vmem>>, vector<1x8xf32>
      %25 = arith.mulf %17, %17 : vector<128x8xf32>
      %cst_24 = arith.constant dense<0.000000e+00> : vector<8xf32>
      %26 = vector.multi_reduction <add>, %25, %cst_24 [0] : vector<128x8xf32> to vector<8xf32>
      %27 = vector.shape_cast %26 : vector<8xf32> to vector<1x8xf32>
      %28 = arith.addf %24, %27 : vector<1x8xf32>
      %c0_25 = arith.constant 0 : index
      %c0_26 = arith.constant 0 : index
      %29 = vector.load %arg6[%c0_25, %c0_26] : memref<1x8xf32, #tpu.memory_space<vmem>>, vector<1x8xf32>
      tpu.vector_store %arg6[%c0_25, %c0_26], %28 {strides = array<i32>} : memref<1x8xf32, #tpu.memory_space<vmem>>, vector<1x8xf32>,
    } else {
    }
    return
  }
  func.func @transform_0(%arg0: i32, %arg1: i32) -> (i32, i32) {
    %c0_i32 = arith.constant 0 : i32
    return %arg0, %arg1 : i32, i32
  }
  func.func @transform_1(%arg0: i32, %arg1: i32) -> (i32, i32) {
    %c0_i32 = arith.constant 0 : i32
    %c0_i32_0 = arith.constant 0 : i32
    return %arg1, %c0_i32 : i32, i32
  }
  func.func @transform_2(%arg0: i32, %arg1: i32) -> (i32, i32) {
    %c0_i32 = arith.constant 0 : i32
    %c0_i32_0 = arith.constant 0 : i32
    return %arg0, %c0_i32 : i32, i32
  }
  func.func @transform_3(%arg0: i32, %arg1: i32) -> (i32, i32) {
    %c0_i32 = arith.constant 0 : i32
    %c0_i32_0 = arith.constant 0 : i32
    %c0_i32_1 = arith.constant 0 : i32
    return %c0_i32, %c0_i32_0 : i32, i32
  }
  func.func @transform_4(%arg0: i32, %arg1: i32) -> (i32, i32) {
    %c0_i32 = arith.constant 0 : i32
    %c0_i32_0 = arith.constant 0 : i32
    %c0_i32_1 = arith.constant 0 : i32
    return %c0_i32, %c0_i32_0 : i32, i32
  }
}

module attributes {stable_mosaic.version = 11 : i64} {
  func.func @_bn_norm_relu_kernel(%arg0: i32, %arg1: memref<128x8xf32, #tpu.memory_space<vmem>>, %arg2: memref<1x8xf32, #tpu.memory_space<vmem>>, %arg3: memref<1x8xf32, #tpu.memory_space<vmem>>, %arg4: memref<1x8xf32, #tpu.memory_space<vmem>>, %arg5: memref<1x8xf32, #tpu.memory_space<vmem>>, %arg6: memref<128x8xf32, #tpu.memory_space<vmem>>) attributes {dimension_semantics = [#tpu.dimension_semantics<parallel>], iteration_bounds = array<i64: 1>, scalar_prefetch = 0 : i64, scratch_operands = 0 : i64, tpu.core_type = #tpu.core_type<tc>, window_params = [{transform_indices = @transform_0, window_bounds = array<i64: 128, 8>}, {pipeline_mode = #tpu.pipeline_mode<synchronous>, transform_indices = @transform_1, window_bounds = array<i64: 1, 8>}, {pipeline_mode = #tpu.pipeline_mode<synchronous>, transform_indices = @transform_2, window_bounds = array<i64: 1, 8>}, {pipeline_mode = #tpu.pipeline_mode<synchronous>, transform_indices = @transform_3, window_bounds = array<i64: 1, 8>}, {pipeline_mode = #tpu.pipeline_mode<synchronous>, transform_indices = @transform_4, window_bounds = array<i64: 1, 8>}, {transform_indices = @transform_5, window_bounds = array<i64: 128, 8>}]} {
    %c0 = arith.constant 0 : index
    %c0_0 = arith.constant 0 : index
    %0 = vector.load %arg1[%c0, %c0_0] : memref<128x8xf32, #tpu.memory_space<vmem>>, vector<128x8xf32>
    %c0_1 = arith.constant 0 : index
    %c0_2 = arith.constant 0 : index
    %1 = vector.load %arg2[%c0_1, %c0_2] : memref<1x8xf32, #tpu.memory_space<vmem>>, vector<1x8xf32>
    %cst = arith.constant 7.812500e-03 : f32
    %2 = vector.broadcast %cst : f32 to vector<1x8xf32>
    %3 = arith.mulf %1, %2 : vector<1x8xf32>
    %c0_3 = arith.constant 0 : index
    %c0_4 = arith.constant 0 : index
    %4 = vector.load %arg3[%c0_3, %c0_4] : memref<1x8xf32, #tpu.memory_space<vmem>>, vector<1x8xf32>
    %cst_5 = arith.constant 7.812500e-03 : f32
    %5 = vector.broadcast %cst_5 : f32 to vector<1x8xf32>
    %6 = arith.mulf %4, %5 : vector<1x8xf32>
    %7 = arith.mulf %3, %3 : vector<1x8xf32>
    %8 = arith.subf %6, %7 : vector<1x8xf32>
    %cst_6 = arith.constant 9.99999974E-6 : f32
    %9 = vector.broadcast %cst_6 : f32 to vector<1x8xf32>
    %10 = arith.addf %8, %9 : vector<1x8xf32>
    %11 = math.rsqrt %10 : vector<1x8xf32>
    %12 = vector.broadcast %3 : vector<1x8xf32> to vector<128x8xf32>
    %13 = arith.subf %0, %12 : vector<128x8xf32>
    %14 = vector.broadcast %11 : vector<1x8xf32> to vector<128x8xf32>
    %15 = arith.mulf %13, %14 : vector<128x8xf32>
    %c0_7 = arith.constant 0 : index
    %c0_8 = arith.constant 0 : index
    %16 = vector.load %arg4[%c0_7, %c0_8] : memref<1x8xf32, #tpu.memory_space<vmem>>, vector<1x8xf32>
    %17 = vector.broadcast %16 : vector<1x8xf32> to vector<128x8xf32>
    %18 = arith.mulf %15, %17 : vector<128x8xf32>
    %c0_9 = arith.constant 0 : index
    %c0_10 = arith.constant 0 : index
    %19 = vector.load %arg5[%c0_9, %c0_10] : memref<1x8xf32, #tpu.memory_space<vmem>>, vector<1x8xf32>
    %20 = vector.broadcast %19 : vector<1x8xf32> to vector<128x8xf32>
    %21 = arith.addf %18, %20 : vector<128x8xf32>
    %cst_11 = arith.constant 0.000000e+00 : f32
    %22 = vector.broadcast %cst_11 : f32 to vector<128x8xf32>
    %23 = arith.maximumf %21, %22 : vector<128x8xf32>
    %c0_12 = arith.constant 0 : index
    %c0_13 = arith.constant 0 : index
    %24 = vector.load %arg6[%c0_12, %c0_13] : memref<128x8xf32, #tpu.memory_space<vmem>>, vector<128x8xf32>
    tpu.vector_store %arg6[%c0_12, %c0_13], %23 {strides = array<i32>} : memref<128x8xf32, #tpu.memory_space<vmem>>, vector<128x8xf32>,
    return
  }
  func.func @transform_0(%arg0: i32) -> (i32, i32) {
    %c0_i32 = arith.constant 0 : i32
    %c0_i32_0 = arith.constant 0 : i32
    return %arg0, %c0_i32 : i32, i32
  }
  func.func @transform_1(%arg0: i32) -> (i32, i32) {
    %c0_i32 = arith.constant 0 : i32
    %c0_i32_0 = arith.constant 0 : i32
    %c0_i32_1 = arith.constant 0 : i32
    return %c0_i32, %c0_i32_0 : i32, i32
  }
  func.func @transform_2(%arg0: i32) -> (i32, i32) {
    %c0_i32 = arith.constant 0 : i32
    %c0_i32_0 = arith.constant 0 : i32
    %c0_i32_1 = arith.constant 0 : i32
    return %c0_i32, %c0_i32_0 : i32, i32
  }
  func.func @transform_3(%arg0: i32) -> (i32, i32) {
    %c0_i32 = arith.constant 0 : i32
    %c0_i32_0 = arith.constant 0 : i32
    %c0_i32_1 = arith.constant 0 : i32
    return %c0_i32, %c0_i32_0 : i32, i32
  }
  func.func @transform_4(%arg0: i32) -> (i32, i32) {
    %c0_i32 = arith.constant 0 : i32
    %c0_i32_0 = arith.constant 0 : i32
    %c0_i32_1 = arith.constant 0 : i32
    return %c0_i32, %c0_i32_0 : i32, i32
  }
  func.func @transform_5(%arg0: i32) -> (i32, i32) {
    %c0_i32 = arith.constant 0 : i32
    %c0_i32_0 = arith.constant 0 : i32
    return %arg0, %c0_i32 : i32, i32
  }
}

module attributes {stable_mosaic.version = 11 : i64} {
  func.func @_conv_stats_kernel(%arg0: i32, %arg1: i32, %arg2: memref<32x72xbf16, #tpu.memory_space<vmem>>, %arg3: memref<72x16xbf16, #tpu.memory_space<vmem>>, %arg4: memref<32x16xf32, #tpu.memory_space<vmem>>, %arg5: memref<1x16xf32, #tpu.memory_space<vmem>>, %arg6: memref<1x16xf32, #tpu.memory_space<vmem>>, %arg7: memref<32x16xf32, #tpu.memory_space<vmem>>) attributes {dimension_semantics = [#tpu.dimension_semantics<arbitrary>, #tpu.dimension_semantics<arbitrary>], iteration_bounds = array<i64: 1, 1>, scalar_prefetch = 0 : i64, scratch_operands = 1 : i64, tpu.core_type = #tpu.core_type<tc>, window_params = [{transform_indices = @transform_0, window_bounds = array<i64: 32, 72>}, {transform_indices = @transform_1, window_bounds = array<i64: 72, 16>}, {transform_indices = @transform_2, window_bounds = array<i64: 32, 16>}, {pipeline_mode = #tpu.pipeline_mode<synchronous>, transform_indices = @transform_3, window_bounds = array<i64: 1, 16>}, {pipeline_mode = #tpu.pipeline_mode<synchronous>, transform_indices = @transform_4, window_bounds = array<i64: 1, 16>}]} {
    %c0_i32 = arith.constant 0 : i32
    %0 = arith.cmpi eq, %arg0, %c0_i32 : i32
    %c0_i32_0 = arith.constant 0 : i32
    %1 = arith.cmpi eq, %arg1, %c0_i32_0 : i32
    %2 = arith.andi %0, %1 : i1
    %3 = arith.extui %2 : i1 to i32
    %c0_i32_1 = arith.constant 0 : i32
    %4 = arith.cmpi ne, %3, %c0_i32_1 : i32
    scf.if %4 {
      %cst_13 = arith.constant 0.000000e+00 : f32
      %17 = vector.broadcast %cst_13 : f32 to vector<1x16xf32>
      %c0_14 = arith.constant 0 : index
      %c0_15 = arith.constant 0 : index
      %18 = vector.load %arg5[%c0_14, %c0_15] : memref<1x16xf32, #tpu.memory_space<vmem>>, vector<1x16xf32>
      tpu.vector_store %arg5[%c0_14, %c0_15], %17 {strides = array<i32>} : memref<1x16xf32, #tpu.memory_space<vmem>>, vector<1x16xf32>,
      %cst_16 = arith.constant 0.000000e+00 : f32
      %19 = vector.broadcast %cst_16 : f32 to vector<1x16xf32>
      %c0_17 = arith.constant 0 : index
      %c0_18 = arith.constant 0 : index
      %20 = vector.load %arg6[%c0_17, %c0_18] : memref<1x16xf32, #tpu.memory_space<vmem>>, vector<1x16xf32>
      tpu.vector_store %arg6[%c0_17, %c0_18], %19 {strides = array<i32>} : memref<1x16xf32, #tpu.memory_space<vmem>>, vector<1x16xf32>,
    } else {
    }
    %c0_i32_2 = arith.constant 0 : i32
    %5 = arith.cmpi eq, %arg1, %c0_i32_2 : i32
    %6 = arith.extui %5 : i1 to i32
    %c0_i32_3 = arith.constant 0 : i32
    %7 = arith.cmpi ne, %6, %c0_i32_3 : i32
    scf.if %7 {
      %cst_13 = arith.constant 0.000000e+00 : f32
      %17 = vector.broadcast %cst_13 : f32 to vector<32x16xf32>
      %c0_14 = arith.constant 0 : index
      %c0_15 = arith.constant 0 : index
      %18 = vector.load %arg7[%c0_14, %c0_15] : memref<32x16xf32, #tpu.memory_space<vmem>>, vector<32x16xf32>
      tpu.vector_store %arg7[%c0_14, %c0_15], %17 {strides = array<i32>} : memref<32x16xf32, #tpu.memory_space<vmem>>, vector<32x16xf32>,
    } else {
    }
    %c0 = arith.constant 0 : index
    %c0_4 = arith.constant 0 : index
    %8 = vector.load %arg7[%c0, %c0_4] : memref<32x16xf32, #tpu.memory_space<vmem>>, vector<32x16xf32>
    %c0_5 = arith.constant 0 : index
    %c0_6 = arith.constant 0 : index
    %9 = vector.load %arg2[%c0_5, %c0_6] : memref<32x72xbf16, #tpu.memory_space<vmem>>, vector<32x72xbf16>
    %c0_7 = arith.constant 0 : index
    %c0_8 = arith.constant 0 : index
    %10 = vector.load %arg3[%c0_7, %c0_8] : memref<72x16xbf16, #tpu.memory_space<vmem>>, vector<72x16xbf16>
    %cst = arith.constant dense<0.000000e+00> : vector<32x16xf32>
    %11 = tpu.matmul %9, %10, %cst {dimension_numbers = #tpu.dot_dimension_numbers<[1], [0], [0], [1], [0, 0, 1, 1], [], []>} : vector<32x72xbf16>, vector<72x16xbf16>, vector<32x16xf32> -> vector<32x16xf32>
    %12 = arith.addf %8, %11 : vector<32x16xf32>
    %c0_9 = arith.constant 0 : index
    %c0_10 = arith.constant 0 : index
    %13 = vector.load %arg7[%c0_9, %c0_10] : memref<32x16xf32, #tpu.memory_space<vmem>>, vector<32x16xf32>
    tpu.vector_store %arg7[%c0_9, %c0_10], %12 {strides = array<i32>} : memref<32x16xf32, #tpu.memory_space<vmem>>, vector<32x16xf32>,
    %c0_i32_11 = arith.constant 0 : i32
    %14 = arith.cmpi eq, %arg1, %c0_i32_11 : i32
    %15 = arith.extui %14 : i1 to i32
    %c0_i32_12 = arith.constant 0 : i32
    %16 = arith.cmpi ne, %15, %c0_i32_12 : i32
    scf.if %16 {
      %c0_13 = arith.constant 0 : index
      %c0_14 = arith.constant 0 : index
      %17 = vector.load %arg7[%c0_13, %c0_14] : memref<32x16xf32, #tpu.memory_space<vmem>>, vector<32x16xf32>
      %c0_15 = arith.constant 0 : index
      %c0_16 = arith.constant 0 : index
      %18 = vector.load %arg4[%c0_15, %c0_16] : memref<32x16xf32, #tpu.memory_space<vmem>>, vector<32x16xf32>
      tpu.vector_store %arg4[%c0_15, %c0_16], %17 {strides = array<i32>} : memref<32x16xf32, #tpu.memory_space<vmem>>, vector<32x16xf32>,
      %c0_17 = arith.constant 0 : index
      %c0_18 = arith.constant 0 : index
      %19 = vector.load %arg5[%c0_17, %c0_18] : memref<1x16xf32, #tpu.memory_space<vmem>>, vector<1x16xf32>
      %cst_19 = arith.constant dense<0.000000e+00> : vector<16xf32>
      %20 = vector.multi_reduction <add>, %17, %cst_19 [0] : vector<32x16xf32> to vector<16xf32>
      %21 = vector.shape_cast %20 : vector<16xf32> to vector<1x16xf32>
      %22 = arith.addf %19, %21 : vector<1x16xf32>
      %c0_20 = arith.constant 0 : index
      %c0_21 = arith.constant 0 : index
      %23 = vector.load %arg5[%c0_20, %c0_21] : memref<1x16xf32, #tpu.memory_space<vmem>>, vector<1x16xf32>
      tpu.vector_store %arg5[%c0_20, %c0_21], %22 {strides = array<i32>} : memref<1x16xf32, #tpu.memory_space<vmem>>, vector<1x16xf32>,
      %c0_22 = arith.constant 0 : index
      %c0_23 = arith.constant 0 : index
      %24 = vector.load %arg6[%c0_22, %c0_23] : memref<1x16xf32, #tpu.memory_space<vmem>>, vector<1x16xf32>
      %25 = arith.mulf %17, %17 : vector<32x16xf32>
      %cst_24 = arith.constant dense<0.000000e+00> : vector<16xf32>
      %26 = vector.multi_reduction <add>, %25, %cst_24 [0] : vector<32x16xf32> to vector<16xf32>
      %27 = vector.shape_cast %26 : vector<16xf32> to vector<1x16xf32>
      %28 = arith.addf %24, %27 : vector<1x16xf32>
      %c0_25 = arith.constant 0 : index
      %c0_26 = arith.constant 0 : index
      %29 = vector.load %arg6[%c0_25, %c0_26] : memref<1x16xf32, #tpu.memory_space<vmem>>, vector<1x16xf32>
      tpu.vector_store %arg6[%c0_25, %c0_26], %28 {strides = array<i32>} : memref<1x16xf32, #tpu.memory_space<vmem>>, vector<1x16xf32>,
    } else {
    }
    return
  }
  func.func @transform_0(%arg0: i32, %arg1: i32) -> (i32, i32) {
    %c0_i32 = arith.constant 0 : i32
    return %arg0, %arg1 : i32, i32
  }
  func.func @transform_1(%arg0: i32, %arg1: i32) -> (i32, i32) {
    %c0_i32 = arith.constant 0 : i32
    %c0_i32_0 = arith.constant 0 : i32
    return %arg1, %c0_i32 : i32, i32
  }
  func.func @transform_2(%arg0: i32, %arg1: i32) -> (i32, i32) {
    %c0_i32 = arith.constant 0 : i32
    %c0_i32_0 = arith.constant 0 : i32
    return %arg0, %c0_i32 : i32, i32
  }
  func.func @transform_3(%arg0: i32, %arg1: i32) -> (i32, i32) {
    %c0_i32 = arith.constant 0 : i32
    %c0_i32_0 = arith.constant 0 : i32
    %c0_i32_1 = arith.constant 0 : i32
    return %c0_i32, %c0_i32_0 : i32, i32
  }
  func.func @transform_4(%arg0: i32, %arg1: i32) -> (i32, i32) {
    %c0_i32 = arith.constant 0 : i32
    %c0_i32_0 = arith.constant 0 : i32
    %c0_i32_1 = arith.constant 0 : i32
    return %c0_i32, %c0_i32_0 : i32, i32
  }
}

module attributes {stable_mosaic.version = 11 : i64} {
  func.func @_bn_norm_relu_kernel(%arg0: i32, %arg1: memref<32x16xf32, #tpu.memory_space<vmem>>, %arg2: memref<1x16xf32, #tpu.memory_space<vmem>>, %arg3: memref<1x16xf32, #tpu.memory_space<vmem>>, %arg4: memref<1x16xf32, #tpu.memory_space<vmem>>, %arg5: memref<1x16xf32, #tpu.memory_space<vmem>>, %arg6: memref<32x16xf32, #tpu.memory_space<vmem>>) attributes {dimension_semantics = [#tpu.dimension_semantics<parallel>], iteration_bounds = array<i64: 1>, scalar_prefetch = 0 : i64, scratch_operands = 0 : i64, tpu.core_type = #tpu.core_type<tc>, window_params = [{transform_indices = @transform_0, window_bounds = array<i64: 32, 16>}, {pipeline_mode = #tpu.pipeline_mode<synchronous>, transform_indices = @transform_1, window_bounds = array<i64: 1, 16>}, {pipeline_mode = #tpu.pipeline_mode<synchronous>, transform_indices = @transform_2, window_bounds = array<i64: 1, 16>}, {pipeline_mode = #tpu.pipeline_mode<synchronous>, transform_indices = @transform_3, window_bounds = array<i64: 1, 16>}, {pipeline_mode = #tpu.pipeline_mode<synchronous>, transform_indices = @transform_4, window_bounds = array<i64: 1, 16>}, {transform_indices = @transform_5, window_bounds = array<i64: 32, 16>}]} {
    %c0 = arith.constant 0 : index
    %c0_0 = arith.constant 0 : index
    %0 = vector.load %arg1[%c0, %c0_0] : memref<32x16xf32, #tpu.memory_space<vmem>>, vector<32x16xf32>
    %c0_1 = arith.constant 0 : index
    %c0_2 = arith.constant 0 : index
    %1 = vector.load %arg2[%c0_1, %c0_2] : memref<1x16xf32, #tpu.memory_space<vmem>>, vector<1x16xf32>
    %cst = arith.constant 3.125000e-02 : f32
    %2 = vector.broadcast %cst : f32 to vector<1x16xf32>
    %3 = arith.mulf %1, %2 : vector<1x16xf32>
    %c0_3 = arith.constant 0 : index
    %c0_4 = arith.constant 0 : index
    %4 = vector.load %arg3[%c0_3, %c0_4] : memref<1x16xf32, #tpu.memory_space<vmem>>, vector<1x16xf32>
    %cst_5 = arith.constant 3.125000e-02 : f32
    %5 = vector.broadcast %cst_5 : f32 to vector<1x16xf32>
    %6 = arith.mulf %4, %5 : vector<1x16xf32>
    %7 = arith.mulf %3, %3 : vector<1x16xf32>
    %8 = arith.subf %6, %7 : vector<1x16xf32>
    %cst_6 = arith.constant 9.99999974E-6 : f32
    %9 = vector.broadcast %cst_6 : f32 to vector<1x16xf32>
    %10 = arith.addf %8, %9 : vector<1x16xf32>
    %11 = math.rsqrt %10 : vector<1x16xf32>
    %12 = vector.broadcast %3 : vector<1x16xf32> to vector<32x16xf32>
    %13 = arith.subf %0, %12 : vector<32x16xf32>
    %14 = vector.broadcast %11 : vector<1x16xf32> to vector<32x16xf32>
    %15 = arith.mulf %13, %14 : vector<32x16xf32>
    %c0_7 = arith.constant 0 : index
    %c0_8 = arith.constant 0 : index
    %16 = vector.load %arg4[%c0_7, %c0_8] : memref<1x16xf32, #tpu.memory_space<vmem>>, vector<1x16xf32>
    %17 = vector.broadcast %16 : vector<1x16xf32> to vector<32x16xf32>
    %18 = arith.mulf %15, %17 : vector<32x16xf32>
    %c0_9 = arith.constant 0 : index
    %c0_10 = arith.constant 0 : index
    %19 = vector.load %arg5[%c0_9, %c0_10] : memref<1x16xf32, #tpu.memory_space<vmem>>, vector<1x16xf32>
    %20 = vector.broadcast %19 : vector<1x16xf32> to vector<32x16xf32>
    %21 = arith.addf %18, %20 : vector<32x16xf32>
    %cst_11 = arith.constant 0.000000e+00 : f32
    %22 = vector.broadcast %cst_11 : f32 to vector<32x16xf32>
    %23 = arith.maximumf %21, %22 : vector<32x16xf32>
    %c0_12 = arith.constant 0 : index
    %c0_13 = arith.constant 0 : index
    %24 = vector.load %arg6[%c0_12, %c0_13] : memref<32x16xf32, #tpu.memory_space<vmem>>, vector<32x16xf32>
    tpu.vector_store %arg6[%c0_12, %c0_13], %23 {strides = array<i32>} : memref<32x16xf32, #tpu.memory_space<vmem>>, vector<32x16xf32>,
    return
  }
  func.func @transform_0(%arg0: i32) -> (i32, i32) {
    %c0_i32 = arith.constant 0 : i32
    %c0_i32_0 = arith.constant 0 : i32
    return %arg0, %c0_i32 : i32, i32
  }
  func.func @transform_1(%arg0: i32) -> (i32, i32) {
    %c0_i32 = arith.constant 0 : i32
    %c0_i32_0 = arith.constant 0 : i32
    %c0_i32_1 = arith.constant 0 : i32
    return %c0_i32, %c0_i32_0 : i32, i32
  }
  func.func @transform_2(%arg0: i32) -> (i32, i32) {
    %c0_i32 = arith.constant 0 : i32
    %c0_i32_0 = arith.constant 0 : i32
    %c0_i32_1 = arith.constant 0 : i32
    return %c0_i32, %c0_i32_0 : i32, i32
  }
  func.func @transform_3(%arg0: i32) -> (i32, i32) {
    %c0_i32 = arith.constant 0 : i32
    %c0_i32_0 = arith.constant 0 : i32
    %c0_i32_1 = arith.constant 0 : i32
    return %c0_i32, %c0_i32_0 : i32, i32
  }
  func.func @transform_4(%arg0: i32) -> (i32, i32) {
    %c0_i32 = arith.constant 0 : i32
    %c0_i32_0 = arith.constant 0 : i32
    %c0_i32_1 = arith.constant 0 : i32
    return %c0_i32, %c0_i32_0 : i32, i32
  }
  func.func @transform_5(%arg0: i32) -> (i32, i32) {
    %c0_i32 = arith.constant 0 : i32
    %c0_i32_0 = arith.constant 0 : i32
    return %arg0, %c0_i32 : i32, i32
  }
}

module attributes {stable_mosaic.version = 11 : i64} {
  func.func @_head_kernel(%arg0: i32, %arg1: memref<2x256xbf16, #tpu.memory_space<vmem>>, %arg2: memref<256x64xbf16, #tpu.memory_space<vmem>>, %arg3: memref<1x64xf32, #tpu.memory_space<vmem>>, %arg4: memref<64x32xbf16, #tpu.memory_space<vmem>>, %arg5: memref<1x32xf32, #tpu.memory_space<vmem>>, %arg6: memref<64x32xbf16, #tpu.memory_space<vmem>>, %arg7: memref<1x32xf32, #tpu.memory_space<vmem>>, %arg8: memref<2x32xf32, #tpu.memory_space<vmem>>, %arg9: memref<2x32xf32, #tpu.memory_space<vmem>>, %arg10: memref<2x32xf32, #tpu.memory_space<vmem>>, %arg11: memref<2x32xf32, #tpu.memory_space<vmem>>, %arg12: memref<2x64xf32, #tpu.memory_space<vmem>>) attributes {dimension_semantics = [#tpu.dimension_semantics<arbitrary>], iteration_bounds = array<i64: 1>, scalar_prefetch = 0 : i64, scratch_operands = 1 : i64, tpu.core_type = #tpu.core_type<tc>, window_params = [{transform_indices = @transform_0, window_bounds = array<i64: 2, 256>}, {transform_indices = @transform_1, window_bounds = array<i64: 256, 64>}, {pipeline_mode = #tpu.pipeline_mode<synchronous>, transform_indices = @transform_2, window_bounds = array<i64: 1, 64>}, {pipeline_mode = #tpu.pipeline_mode<synchronous>, transform_indices = @transform_3, window_bounds = array<i64: 64, 32>}, {pipeline_mode = #tpu.pipeline_mode<synchronous>, transform_indices = @transform_4, window_bounds = array<i64: 1, 32>}, {pipeline_mode = #tpu.pipeline_mode<synchronous>, transform_indices = @transform_5, window_bounds = array<i64: 64, 32>}, {pipeline_mode = #tpu.pipeline_mode<synchronous>, transform_indices = @transform_6, window_bounds = array<i64: 1, 32>}, {pipeline_mode = #tpu.pipeline_mode<synchronous>, transform_indices = @transform_7, window_bounds = array<i64: 2, 32>}, {pipeline_mode = #tpu.pipeline_mode<synchronous>, transform_indices = @transform_8, window_bounds = array<i64: 2, 32>}, {pipeline_mode = #tpu.pipeline_mode<synchronous>, transform_indices = @transform_9, window_bounds = array<i64: 2, 32>}, {pipeline_mode = #tpu.pipeline_mode<synchronous>, transform_indices = @transform_10, window_bounds = array<i64: 2, 32>}]} {
    %c0_i32 = arith.constant 0 : i32
    %0 = arith.cmpi eq, %arg0, %c0_i32 : i32
    %1 = arith.extui %0 : i1 to i32
    %c0_i32_0 = arith.constant 0 : i32
    %2 = arith.cmpi ne, %1, %c0_i32_0 : i32
    scf.if %2 {
      %cst_10 = arith.constant 0.000000e+00 : f32
      %12 = vector.broadcast %cst_10 : f32 to vector<2x64xf32>
      %c0_11 = arith.constant 0 : index
      %c0_12 = arith.constant 0 : index
      %13 = vector.load %arg12[%c0_11, %c0_12] : memref<2x64xf32, #tpu.memory_space<vmem>>, vector<2x64xf32>
      tpu.vector_store %arg12[%c0_11, %c0_12], %12 {strides = array<i32>} : memref<2x64xf32, #tpu.memory_space<vmem>>, vector<2x64xf32>,
    } else {
    }
    %c0 = arith.constant 0 : index
    %c0_1 = arith.constant 0 : index
    %3 = vector.load %arg12[%c0, %c0_1] : memref<2x64xf32, #tpu.memory_space<vmem>>, vector<2x64xf32>
    %c0_2 = arith.constant 0 : index
    %c0_3 = arith.constant 0 : index
    %4 = vector.load %arg1[%c0_2, %c0_3] : memref<2x256xbf16, #tpu.memory_space<vmem>>, vector<2x256xbf16>
    %c0_4 = arith.constant 0 : index
    %c0_5 = arith.constant 0 : index
    %5 = vector.load %arg2[%c0_4, %c0_5] : memref<256x64xbf16, #tpu.memory_space<vmem>>, vector<256x64xbf16>
    %cst = arith.constant dense<0.000000e+00> : vector<2x64xf32>
    %6 = tpu.matmul %4, %5, %cst {dimension_numbers = #tpu.dot_dimension_numbers<[1], [0], [0], [1], [0, 0, 1, 1], [], []>} : vector<2x256xbf16>, vector<256x64xbf16>, vector<2x64xf32> -> vector<2x64xf32>
    %7 = arith.addf %3, %6 : vector<2x64xf32>
    %c0_6 = arith.constant 0 : index
    %c0_7 = arith.constant 0 : index
    %8 = vector.load %arg12[%c0_6, %c0_7] : memref<2x64xf32, #tpu.memory_space<vmem>>, vector<2x64xf32>
    tpu.vector_store %arg12[%c0_6, %c0_7], %7 {strides = array<i32>} : memref<2x64xf32, #tpu.memory_space<vmem>>, vector<2x64xf32>,
    %c0_i32_8 = arith.constant 0 : i32
    %9 = arith.cmpi eq, %arg0, %c0_i32_8 : i32
    %10 = arith.extui %9 : i1 to i32
    %c0_i32_9 = arith.constant 0 : i32
    %11 = arith.cmpi ne, %10, %c0_i32_9 : i32
    scf.if %11 {
      %c0_10 = arith.constant 0 : index
      %c0_11 = arith.constant 0 : index
      %12 = vector.load %arg12[%c0_10, %c0_11] : memref<2x64xf32, #tpu.memory_space<vmem>>, vector<2x64xf32>
      %c0_12 = arith.constant 0 : index
      %c0_13 = arith.constant 0 : index
      %13 = vector.load %arg3[%c0_12, %c0_13] : memref<1x64xf32, #tpu.memory_space<vmem>>, vector<1x64xf32>
      %14 = vector.broadcast %13 : vector<1x64xf32> to vector<2x64xf32>
      %15 = arith.addf %12, %14 : vector<2x64xf32>
      %cst_14 = arith.constant 0.000000e+00 : f32
      %16 = vector.broadcast %cst_14 : f32 to vector<2x64xf32>
      %17 = arith.maximumf %15, %16 : vector<2x64xf32>
      %18 = arith.truncf %17 : vector<2x64xf32> to vector<2x64xbf16>
      %c0_15 = arith.constant 0 : index
      %c0_16 = arith.constant 0 : index
      %19 = vector.load %arg4[%c0_15, %c0_16] : memref<64x32xbf16, #tpu.memory_space<vmem>>, vector<64x32xbf16>
      %cst_17 = arith.constant dense<0.000000e+00> : vector<2x32xf32>
      %20 = tpu.matmul %18, %19, %cst_17 {dimension_numbers = #tpu.dot_dimension_numbers<[1], [0], [0], [1], [0, 0, 1, 1], [], []>} : vector<2x64xbf16>, vector<64x32xbf16>, vector<2x32xf32> -> vector<2x32xf32>
      %c0_18 = arith.constant 0 : index
      %c0_19 = arith.constant 0 : index
      %21 = vector.load %arg5[%c0_18, %c0_19] : memref<1x32xf32, #tpu.memory_space<vmem>>, vector<1x32xf32>
      %22 = vector.broadcast %21 : vector<1x32xf32> to vector<2x32xf32>
      %23 = arith.addf %20, %22 : vector<2x32xf32>
      %c0_20 = arith.constant 0 : index
      %c0_21 = arith.constant 0 : index
      %24 = vector.load %arg6[%c0_20, %c0_21] : memref<64x32xbf16, #tpu.memory_space<vmem>>, vector<64x32xbf16>
      %cst_22 = arith.constant dense<0.000000e+00> : vector<2x32xf32>
      %25 = tpu.matmul %18, %24, %cst_22 {dimension_numbers = #tpu.dot_dimension_numbers<[1], [0], [0], [1], [0, 0, 1, 1], [], []>} : vector<2x64xbf16>, vector<64x32xbf16>, vector<2x32xf32> -> vector<2x32xf32>
      %c0_23 = arith.constant 0 : index
      %c0_24 = arith.constant 0 : index
      %26 = vector.load %arg7[%c0_23, %c0_24] : memref<1x32xf32, #tpu.memory_space<vmem>>, vector<1x32xf32>
      %27 = vector.broadcast %26 : vector<1x32xf32> to vector<2x32xf32>
      %28 = arith.addf %25, %27 : vector<2x32xf32>
      %29 = math.exp %28 : vector<2x32xf32>
      %c0_25 = arith.constant 0 : index
      %c0_26 = arith.constant 0 : index
      %30 = vector.load %arg10[%c0_25, %c0_26] : memref<2x32xf32, #tpu.memory_space<vmem>>, vector<2x32xf32>
      tpu.vector_store %arg10[%c0_25, %c0_26], %23 {strides = array<i32>} : memref<2x32xf32, #tpu.memory_space<vmem>>, vector<2x32xf32>,
      %c0_27 = arith.constant 0 : index
      %c0_28 = arith.constant 0 : index
      %31 = vector.load %arg11[%c0_27, %c0_28] : memref<2x32xf32, #tpu.memory_space<vmem>>, vector<2x32xf32>
      tpu.vector_store %arg11[%c0_27, %c0_28], %29 {strides = array<i32>} : memref<2x32xf32, #tpu.memory_space<vmem>>, vector<2x32xf32>,
      %c0_29 = arith.constant 0 : index
      %c0_30 = arith.constant 0 : index
      %32 = vector.load %arg8[%c0_29, %c0_30] : memref<2x32xf32, #tpu.memory_space<vmem>>, vector<2x32xf32>
      %33 = arith.mulf %29, %32 : vector<2x32xf32>
      %34 = arith.addf %23, %33 : vector<2x32xf32>
      %c0_31 = arith.constant 0 : index
      %c0_32 = arith.constant 0 : index
      %35 = vector.load %arg9[%c0_31, %c0_32] : memref<2x32xf32, #tpu.memory_space<vmem>>, vector<2x32xf32>
      tpu.vector_store %arg9[%c0_31, %c0_32], %34 {strides = array<i32>} : memref<2x32xf32, #tpu.memory_space<vmem>>, vector<2x32xf32>,
    } else {
    }
    return
  }
  func.func @transform_0(%arg0: i32) -> (i32, i32) {
    %c0_i32 = arith.constant 0 : i32
    %c0_i32_0 = arith.constant 0 : i32
    return %c0_i32, %arg0 : i32, i32
  }
  func.func @transform_1(%arg0: i32) -> (i32, i32) {
    %c0_i32 = arith.constant 0 : i32
    %c0_i32_0 = arith.constant 0 : i32
    return %arg0, %c0_i32 : i32, i32
  }
  func.func @transform_2(%arg0: i32) -> (i32, i32) {
    %c0_i32 = arith.constant 0 : i32
    %c0_i32_0 = arith.constant 0 : i32
    %c0_i32_1 = arith.constant 0 : i32
    return %c0_i32, %c0_i32_0 : i32, i32
  }
  func.func @transform_3(%arg0: i32) -> (i32, i32) {
    %c0_i32 = arith.constant 0 : i32
    %c0_i32_0 = arith.constant 0 : i32
    %c0_i32_1 = arith.constant 0 : i32
    return %c0_i32, %c0_i32_0 : i32, i32
  }
  func.func @transform_4(%arg0: i32) -> (i32, i32) {
    %c0_i32 = arith.constant 0 : i32
    %c0_i32_0 = arith.constant 0 : i32
    %c0_i32_1 = arith.constant 0 : i32
    return %c0_i32, %c0_i32_0 : i32, i32
  }
  func.func @transform_5(%arg0: i32) -> (i32, i32) {
    %c0_i32 = arith.constant 0 : i32
    %c0_i32_0 = arith.constant 0 : i32
    %c0_i32_1 = arith.constant 0 : i32
    return %c0_i32, %c0_i32_0 : i32, i32
  }
  func.func @transform_6(%arg0: i32) -> (i32, i32) {
    %c0_i32 = arith.constant 0 : i32
    %c0_i32_0 = arith.constant 0 : i32
    %c0_i32_1 = arith.constant 0 : i32
    return %c0_i32, %c0_i32_0 : i32, i32
  }
  func.func @transform_7(%arg0: i32) -> (i32, i32) {
    %c0_i32 = arith.constant 0 : i32
    %c0_i32_0 = arith.constant 0 : i32
    %c0_i32_1 = arith.constant 0 : i32
    return %c0_i32, %c0_i32_0 : i32, i32
  }
  func.func @transform_8(%arg0: i32) -> (i32, i32) {
    %c0_i32 = arith.constant 0 : i32
    %c0_i32_0 = arith.constant 0 : i32
    %c0_i32_1 = arith.constant 0 : i32
    return %c0_i32, %c0_i32_0 : i32, i32
  }
  func.func @transform_9(%arg0: i32) -> (i32, i32) {
    %c0_i32 = arith.constant 0 : i32
    %c0_i32_0 = arith.constant 0 : i32
    %c0_i32_1 = arith.constant 0 : i32
    return %c0_i32, %c0_i32_0 : i32, i32
  }
  func.func @transform_10(%arg0: i32) -> (i32, i32) {
    %c0_i32 = arith.constant 0 : i32
    %c0_i32_0 = arith.constant 0 : i32
    %c0_i32_1 = arith.constant 0 : i32
    return %c0_i32, %c0_i32_0 : i32, i32
  }
}

</mosaic_0001>

<bundles_post_ra>
// kernel: encoder_forward.8
= control target key start
LH: loop header
LB: loop body
LE: loop exit
PB: predicated region body
PF: predicated region fallthrough
CT: control target
= control target key end

     0   :  { %v45_v5 = vlaneseq  ;;  %vm150_vm0 = vcmask 64512   ;;  %s371_s1 = inlined_call_operand.vmem [shape: f32[1,8], index: 1, kind: input, shape index: {}]   ;;  %s372_s2 = inlined_call_operand.vmem [shape: f32[1,8], index: 2, kind: input, shape index: {}]   ;;  %s373_s0 = inlined_call_operand.vmem [shape: f32[128,8], index: 0, kind: input, shape index: {}]   ;;  %s374_s3 = inlined_call_operand.vmem [shape: f32[1,8], index: 3, kind: input, shape index: {}]   ;;  %s375_s4 = inlined_call_operand.vmem [shape: f32[1,8], index: 4, kind: input, shape index: {}]   ;;  %s376_s5 = inlined_call_operand.vmem [shape: f32[128,8], index: 5, kind: output, shape index: {}]  }
   0x1   :  { %v36_v0 = vld [vmem:[%s371_s1] sm:$0x1]  ;;  %v21_v12 = vld [vmem:[%s373_s0 + $0x8] sm:$0xff]  ;;  %v22_v13 = vld [vmem:[%s373_s0 + $0x10] sm:$0xff] }
   0x2   :  { %v38_v1 = vld [vmem:[%s372_s2] sm:$0x1]  ;;  %v37_v2 = vmul.f32 0.0078125, %v36_v0  ;;  %v46_v8 = vshrl.u32 %v45_v5, 7  ;;  %v23_v14 = vld [vmem:[%s373_s0 + $0x18] sm:$0xff]  ;;  %v25_v16 = vld [vmem:[%s373_s0 + $0x28] sm:$0xff] }
   0x3   :  { %v39_v3 = vmul.f32 0.0078125, %v38_v1  ;;  %v20_v10 = vld [vmem:[%s373_s0] sm:$0xff]  ;;  %v26_v17 = vld [vmem:[%s373_s0 + $0x30] sm:$0xff]  ;;  %v27_v18 = vld [vmem:[%s373_s0 + $0x38] sm:$0xff] }
   0x4   :  { %v40_v4 = vmul.f32 %v37_v2, %v37_v2  ;;  %v47_v9 = vsub.s32 0, %v46_v8  ;;  %v24_v15 = vld [vmem:[%s373_s0 + $0x20] sm:$0xff]  ;;  %v245_v20 = vld [vmem:[%s373_s0 + $0x48] sm:$0xff]  ;;  %v251_v22 = vld [vmem:[%s373_s0 + $0x50] sm:$0xff] }
   0x5   :  { %v240_v19 = vld [vmem:[%s373_s0 + $0x40] sm:$0xff]  ;;  %v256_v23 = vld [vmem:[%s373_s0 + $0x58] sm:$0xff]  ;;  %v270_v29 = vld [vmem:[%s373_s0 + $0x68] sm:$0xff] }
   0x6   :  { %v41_v6 = vsub.f32 %v39_v3, %v40_v4  ;;  %v214_v11 = vrot.slane %v37_v2, %v47_v9  ;;  %v261_v24 = vld [vmem:[%s373_s0 + $0x60] sm:$0xff]  ;;  %v275_v30 = vld [vmem:[%s373_s0 + $0x70] sm:$0xff]  ;;  %v280_v31 = vld [vmem:[%s373_s0 + $0x78] sm:$0xff] }
   0x7   :  { %v171_v41 = vld [vmem:[%s374_s3] ss:$0 sm:$0xff] }
   0x8   :  { %v42_v7 = vadd.f32 1e-05, %v41_v6  ;;  %v50_v21 = vsub.f32 %v20_v10, %v214_v11  ;;  %v51_v25 = vsub.f32 %v21_v12, %v214_v11  ;;  %v52_v26 = vsub.f32 %v22_v13, %v214_v11  ;;  %v172_v50 = vld [vmem:[%s375_s4] ss:$0 sm:$0xff] }
   0x9   :  { %v53_v27 = vsub.f32 %v23_v14, %v214_v11  ;;  %v54_v28 = vsub.f32 %v24_v15, %v214_v11  ;;  %v55_v33 = vsub.f32 %v25_v16, %v214_v11  ;;  %v56_v34 = vsub.f32 %v26_v17, %v214_v11 }
   0xa   :  { %173 = vrsqrt.f32 %v42_v7  ;;  %v57_v35 = vsub.f32 %v27_v18, %v214_v11  ;;  %v58_v36 = vsub.f32 %v240_v19, %v214_v11  ;;  %v59_v38 = vsub.f32 %v245_v20, %v214_v11 }
   0xb   :  { %v60_v39 = vsub.f32 %v251_v22, %v214_v11  ;;  %v61_v40 = vsub.f32 %v256_v23, %v214_v11  ;;  %v62_v42 = vsub.f32 %v261_v24, %v214_v11  ;;  %v63_v43 = vsub.f32 %v270_v29, %v214_v11 }
   0xc   :  { %v64_v44 = vsub.f32 %v275_v30, %v214_v11  ;;  %v65_v45 = vsub.f32 %v280_v31, %v214_v11 }
  0x17   :  { %v174_v32 = vpop.eup %173 }
  0x18   :  { %v70_v37 = vrot.slane %v174_v32, %v47_v9 }
  0x1a   :  { %v72_v46 = vmul.f32 %v70_v37, %v50_v21  ;;  %v73_v47 = vmul.f32 %v70_v37, %v51_v25  ;;  %v74_v48 = vmul.f32 %v70_v37, %v52_v26  ;;  %v75_v49 = vmul.f32 %v70_v37, %v53_v27 }
  0x1b   :  { %v76_v51 = vmul.f32 %v70_v37, %v54_v28  ;;  %v77_v52 = vmul.f32 %v70_v37, %v55_v33  ;;  %v78_v53 = vmul.f32 %v70_v37, %v56_v34  ;;  %v79_v54 = vmul.f32 %v70_v37, %v57_v35 }
  0x1c   :  { %v95_v55 = vmul.f32 %v171_v41, %v72_v46  ;;  %v96_v56 = vmul.f32 %v171_v41, %v73_v47  ;;  %v97_v57 = vmul.f32 %v171_v41, %v74_v48  ;;  %v98_v58 = vmul.f32 %v171_v41, %v75_v49 }
  0x1d   :  { %v99_v59 = vmul.f32 %v171_v41, %v76_v51  ;;  %v100_v60 = vmul.f32 %v171_v41, %v77_v52  ;;  %v101_v61 = vmul.f32 %v171_v41, %v78_v53  ;;  %v102_v62 = vmul.f32 %v171_v41, %v79_v54 }
  0x1e   :  { %v118_v63 = vadd.f32 %v172_v50, %v95_v55  ;;  %v119_v0 = vadd.f32 %v172_v50, %v96_v56  ;;  %v120_v1 = vadd.f32 %v172_v50, %v97_v57  ;;  %v121_v2 = vadd.f32 %v172_v50, %v98_v58 }
  0x1f   :  { %v122_v3 = vadd.f32 %v172_v50, %v99_v59  ;;  %v123_v4 = vadd.f32 %v172_v50, %v100_v60  ;;  %v124_v5 = vadd.f32 %v172_v50, %v101_v61  ;;  %v125_v6 = vadd.f32 %v172_v50, %v102_v62 }
  0x20   :  { %v134_v7 = vmax.f32 %v118_v63, 0.0  ;;  %v135_v8 = vmax.f32 %v119_v0, 0.0  ;;  %v136_v9 = vmax.f32 %v120_v1, 0.0  ;;  %v137_v10 = vmax.f32 %v121_v2, 0.0 }
  0x21   :  { %v138_v11 = vmax.f32 %v122_v3, 0.0  ;;  %v139_v12 = vmax.f32 %v123_v4, 0.0  ;;  %v140_v13 = vmax.f32 %v124_v5, 0.0  ;;  %v141_v14 = vmax.f32 %v125_v6, 0.0 }
  0x22   :  { %151 = vst.msk [vmem:[%s376_s5] sm:$0xff] %vm150_vm0, %v134_v7  ;;  %152 = vst.msk [vmem:[%s376_s5 + $0x8] sm:$0xff] %vm150_vm0, %v135_v8  ;;  %v80_v15 = vmul.f32 %v70_v37, %v58_v36  ;;  %v81_v16 = vmul.f32 %v70_v37, %v59_v38  ;;  %v82_v17 = vmul.f32 %v70_v37, %v60_v39 }
  0x23   :  { %153 = vst.msk [vmem:[%s376_s5 + $0x10] sm:$0xff] %vm150_vm0, %v136_v9  ;;  %154 = vst.msk [vmem:[%s376_s5 + $0x18] sm:$0xff] %vm150_vm0, %v137_v10  ;;  %v83_v18 = vmul.f32 %v70_v37, %v61_v40  ;;  %v84_v19 = vmul.f32 %v70_v37, %v62_v42  ;;  %v85_v20 = vmul.f32 %v70_v37, %v63_v43 }
  0x24   :  { %155 = vst.msk [vmem:[%s376_s5 + $0x20] sm:$0xff] %vm150_vm0, %v138_v11  ;;  %156 = vst.msk [vmem:[%s376_s5 + $0x28] sm:$0xff] %vm150_vm0, %v139_v12  ;;  %v86_v21 = vmul.f32 %v70_v37, %v64_v44  ;;  %v87_v22 = vmul.f32 %v70_v37, %v65_v45  ;;  %v103_v23 = vmul.f32 %v171_v41, %v80_v15 }
  0x25   :  { %157 = vst.msk [vmem:[%s376_s5 + $0x30] sm:$0xff] %vm150_vm0, %v140_v13  ;;  %158 = vst.msk [vmem:[%s376_s5 + $0x38] sm:$0xff] %vm150_vm0, %v141_v14  ;;  %v104_v24 = vmul.f32 %v171_v41, %v81_v16  ;;  %v105_v25 = vmul.f32 %v171_v41, %v82_v17  ;;  %v106_v26 = vmul.f32 %v171_v41, %v83_v18 }
  0x26   :  { %v107_v27 = vmul.f32 %v171_v41, %v84_v19  ;;  %v108_v28 = vmul.f32 %v171_v41, %v85_v20  ;;  %v109_v29 = vmul.f32 %v171_v41, %v86_v21  ;;  %v110_v30 = vmul.f32 %v171_v41, %v87_v22 }
  0x27   :  { %v126_v31 = vadd.f32 %v172_v50, %v103_v23  ;;  %v127_v32 = vadd.f32 %v172_v50, %v104_v24  ;;  %v128_v33 = vadd.f32 %v172_v50, %v105_v25  ;;  %v129_v34 = vadd.f32 %v172_v50, %v106_v26 }
  0x28   :  { %v130_v35 = vadd.f32 %v172_v50, %v107_v27  ;;  %v131_v36 = vadd.f32 %v172_v50, %v108_v28  ;;  %v132_v38 = vadd.f32 %v172_v50, %v109_v29  ;;  %v133_v39 = vadd.f32 %v172_v50, %v110_v30 }
  0x29   :  { %v142_v40 = vmax.f32 %v126_v31, 0.0  ;;  %v143_v42 = vmax.f32 %v127_v32, 0.0  ;;  %v144_v43 = vmax.f32 %v128_v33, 0.0  ;;  %v145_v37 = vmax.f32 %v129_v34, 0.0 }
  0x2a   :  { %v146_v44 = vmax.f32 %v130_v35, 0.0  ;;  %v147_v45 = vmax.f32 %v131_v36, 0.0  ;;  %v148_v46 = vmax.f32 %v132_v38, 0.0  ;;  %v149_v47 = vmax.f32 %v133_v39, 0.0 }
  0x2b   :  { %159 = vst.msk [vmem:[%s376_s5 + $0x40] sm:$0xff] %vm150_vm0, %v142_v40  ;;  %160 = vst.msk [vmem:[%s376_s5 + $0x48] sm:$0xff] %vm150_vm0, %v143_v42 }
  0x2c   :  { %161 = vst.msk [vmem:[%s376_s5 + $0x50] sm:$0xff] %vm150_vm0, %v144_v43  ;;  %162 = vst.msk [vmem:[%s376_s5 + $0x58] sm:$0xff] %vm150_vm0, %v145_v37 }
  0x2d   :  { %163 = vst.msk [vmem:[%s376_s5 + $0x60] sm:$0xff] %vm150_vm0, %v146_v44  ;;  %164 = vst.msk [vmem:[%s376_s5 + $0x68] sm:$0xff] %vm150_vm0, %v147_v45 }
  0x2e   :  { %165 = vst.msk [vmem:[%s376_s5 + $0x70] sm:$0xff] %vm150_vm0, %v148_v46  ;;  %166 = vst.msk [vmem:[%s376_s5 + $0x78] sm:$0xff] %vm150_vm0, %v149_v47 }

// kernel: encoder_forward.6
= control target key start
LH: loop header
LB: loop body
LE: loop exit
PB: predicated region body
PF: predicated region fallthrough
CT: control target
= control target key end

     0   :  { %vm470_vm0 = vcmask 1040384   ;;  %vm471_vm1 = vcmask 1041408   ;;  %vm373_vm2 = vcmask 23552   ;;  %v1365_v1 = vmov 65535   ;;  %s2044_s1 = inlined_call_operand.vmem [shape: bf16[3,4], index: 1, kind: input, shape index: {}]   ;;  %s2045_s0 = inlined_call_operand.vmem [shape: bf16[512,3], index: 0, kind: input, shape index: {}]   ;;  %s2046_s2 = inlined_call_operand.vmem [shape: f32[1,4], index: 2, kind: input, shape index: {}]   ;;  %s2047_s3 = inlined_call_operand.vmem [shape: f32[512,4], index: 3, kind: output, shape index: {}]  }
   0x1   :  { %v212_v0 = vld [vmem:[%s2044_s1] sm:$0x3]  ;;  %v472_v2 = vsel %vm470_vm0, 4294967295, %v1365_v1  ;;  %v1401_v7 = vld [vmem:[%s2045_s0 + $0x8] sm:$0xff]   ;;  %vm19_vm3 = vcmask 31744   ;;  %v1411_v9 = vld [vmem:[%s2045_s0 + $0x10] sm:$0xff]  }
   0x2   :  { %v1333_v3 = vld [vmem:[%s2045_s0] sm:$0xff]   ;;  %v473_v4 = vsel %vm471_vm1, %v472_v2, 0  ;;  %v1406_v8 = vld [vmem:[%s2045_s0 + $0x88] sm:$0xff]   ;;  %v1366_v10 = vmov 0.0   ;;  %v1338_v11 = vld [vmem:[%s2045_s0 + $0x90] sm:$0xff]  }
   0x3   :  { %v1334_v5 = vld [vmem:[%s2045_s0 + $0x80] sm:$0xff]   ;;  %v475_v6 = vand.u32 %v473_v4, %v212_v0  ;;  %1265 = vmatprep.mubr.msk.bf16.mxu0 %vm373_vm2, %v1333_v3  ;;  %22 = vst.msk [vmem:[#allocation2 + $0x10] sm:$0xff] %vm19_vm3, %v1366_v10  ;;  %20 = vst.msk [vmem:[#allocation2] sm:$0xff] %vm19_vm3, %v1366_v10  ;;  %v1339_v12 = vld [vmem:[%s2045_s0 + $0x18] sm:$0xff]  }
   0x4   :  { %1297 = vmatprep.mubr.msk.bf16.mxu1 %vm373_vm2, %v1334_v5  ;;  %21 = vst.msk [vmem:[#allocation2 + $0x8] sm:$0xff] %vm19_vm3, %v1366_v10  ;;  %23 = vst.msk [vmem:[#allocation2 + $0x18] sm:$0xff] %vm19_vm3, %v1366_v10  ;;  %v1340_v13 = vld [vmem:[%s2045_s0 + $0x98] sm:$0xff]   ;;  %v1341_v14 = vld [vmem:[%s2045_s0 + $0x20] sm:$0xff]  }
   0x5   :  { %1263 = vmatprep.subr.bf16.mxu0 %v475_v6  ;;  %1329 = vmatprep.subr.bf16.mxu1 %v475_v6  ;;  %24 = vst.msk [vmem:[#allocation2 + $0x20] sm:$0xff] %vm19_vm3, %v1366_v10  ;;  %25 = vst.msk [vmem:[#allocation2 + $0x28] sm:$0xff] %vm19_vm3, %v1366_v10  ;;  %v1342_v15 = vld [vmem:[%s2045_s0 + $0xa0] sm:$0xff]   ;;  %v1343_v16 = vld [vmem:[%s2045_s0 + $0x28] sm:$0xff]  }
   0x6   :  { %1264 = vmatpush3.bf16.msra.mxu0 %v475_v6  ;;  %1330 = vmatpush3.bf16.msra.mxu1 %v475_v6  ;;  %26 = vst.msk [vmem:[#allocation2 + $0x30] sm:$0xff] %vm19_vm3, %v1366_v10  ;;  %27 = vst.msk [vmem:[#allocation2 + $0x38] sm:$0xff] %vm19_vm3, %v1366_v10  ;;  %v1344_v17 = vld [vmem:[%s2045_s0 + $0xa8] sm:$0xff]   ;;  %v1345_v18 = vld [vmem:[%s2045_s0 + $0x30] sm:$0xff]  }
   0x7   :  { %28 = vst.msk [vmem:[#allocation2 + $0x40] sm:$0xff] %vm19_vm3, %v1366_v10  ;;  %29 = vst.msk [vmem:[#allocation2 + $0x48] sm:$0xff] %vm19_vm3, %v1366_v10  ;;  %v1346_v19 = vld [vmem:[%s2045_s0 + $0xb0] sm:$0xff]   ;;  %v1347_v20 = vld [vmem:[%s2045_s0 + $0x38] sm:$0xff]  }
   0x8   :  { %30 = vst.msk [vmem:[#allocation2 + $0x50] sm:$0xff] %vm19_vm3, %v1366_v10  ;;  %31 = vst.msk [vmem:[#allocation2 + $0x58] sm:$0xff] %vm19_vm3, %v1366_v10  ;;  %v1348_v21 = vld [vmem:[%s2045_s0 + $0xb8] sm:$0xff]   ;;  %v1349_v22 = vld [vmem:[%s2045_s0 + $0x40] sm:$0xff]  }
   0x9   :  { %32 = vst.msk [vmem:[#allocation2 + $0x60] sm:$0xff] %vm19_vm3, %v1366_v10  ;;  %33 = vst.msk [vmem:[#allocation2 + $0x68] sm:$0xff] %vm19_vm3, %v1366_v10  ;;  %1266 = vmatmul.mubr.msk.bf16.vlgmr.msra.gmra.mxu0 %vm373_vm2, %v1401_v7  ;;  %1298 = vmatmul.mubr.msk.bf16.vlgmr.msra.gmra.mxu1 %vm373_vm2, %v1406_v8  ;;  %v1350_v23 = vld [vmem:[%s2045_s0 + $0xc0] sm:$0xff]   ;;  %v1351_v24 = vld [vmem:[%s2045_s0 + $0x48] sm:$0xff]  }
   0xa   :  { %34 = vst.msk [vmem:[#allocation2 + $0x70] sm:$0xff] %vm19_vm3, %v1366_v10  ;;  %35 = vst.msk [vmem:[#allocation2 + $0x78] sm:$0xff] %vm19_vm3, %v1366_v10  ;;  %1269 = vmatprep.mubr.msk.bf16.mxu0 %vm373_vm2, %v1411_v9  ;;  %1301 = vmatprep.mubr.msk.bf16.mxu1 %vm373_vm2, %v1338_v11  ;;  %v1352_v25 = vld [vmem:[%s2045_s0 + $0xc8] sm:$0xff]   ;;  %v1353_v26 = vld [vmem:[%s2045_s0 + $0x50] sm:$0xff]  }
   0xb   :  { %36 = vst.msk [vmem:[#allocation2 + $0x80] sm:$0xff] %vm19_vm3, %v1366_v10  ;;  %37 = vst.msk [vmem:[#allocation2 + $0x88] sm:$0xff] %vm19_vm3, %v1366_v10  ;;  %v1354_v27 = vld [vmem:[%s2045_s0 + $0xd0] sm:$0xff]   ;;  %v1355_v28 = vld [vmem:[%s2045_s0 + $0x58] sm:$0xff]  }
   0xc   :  { %38 = vst.msk [vmem:[#allocation2 + $0x90] sm:$0xff] %vm19_vm3, %v1366_v10  ;;  %39 = vst.msk [vmem:[#allocation2 + $0x98] sm:$0xff] %vm19_vm3, %v1366_v10  ;;  %v1356_v29 = vld [vmem:[%s2045_s0 + $0xd8] sm:$0xff]   ;;  %v1357_v30 = vld [vmem:[%s2045_s0 + $0x60] sm:$0xff]  }
   0xd   :  { %40 = vst.msk [vmem:[#allocation2 + $0xa0] sm:$0xff] %vm19_vm3, %v1366_v10  ;;  %41 = vst.msk [vmem:[#allocation2 + $0xa8] sm:$0xff] %vm19_vm3, %v1366_v10  ;;  %v1358_v31 = vld [vmem:[%s2045_s0 + $0xe0] sm:$0xff]   ;;  %v1359_v32 = vld [vmem:[%s2045_s0 + $0x68] sm:$0xff]  }
   0xe   :  { %42 = vst.msk [vmem:[#allocation2 + $0xb0] sm:$0xff] %vm19_vm3, %v1366_v10  ;;  %43 = vst.msk [vmem:[#allocation2 + $0xb8] sm:$0xff] %vm19_vm3, %v1366_v10  ;;  %v1360_v33 = vld [vmem:[%s2045_s0 + $0xe8] sm:$0xff]   ;;  %v1361_v34 = vld [vmem:[%s2045_s0 + $0x70] sm:$0xff]  }
   0xf   :  { %44 = vst.msk [vmem:[#allocation2 + $0xc0] sm:$0xff] %vm19_vm3, %v1366_v10  ;;  %45 = vst.msk [vmem:[#allocation2 + $0xc8] sm:$0xff] %vm19_vm3, %v1366_v10  ;;  %v1362_v35 = vld [vmem:[%s2045_s0 + $0xf0] sm:$0xff]   ;;  %v1363_v36 = vld [vmem:[%s2045_s0 + $0x78] sm:$0xff]  }
  0x10   :  { %46 = vst.msk [vmem:[#allocation2 + $0xd0] sm:$0xff] %vm19_vm3, %v1366_v10  ;;  %47 = vst.msk [vmem:[#allocation2 + $0xd8] sm:$0xff] %vm19_vm3, %v1366_v10  ;;  %v1364_v37 = vld [vmem:[%s2045_s0 + $0xf8] sm:$0xff]   ;;  %v86_v38 = vld [vmem:[#allocation2 + $0x10] sm:$0xff] }
  0x11   :  { %48 = vst.msk [vmem:[#allocation2 + $0xe0] sm:$0xff] %vm19_vm3, %v1366_v10  ;;  %49 = vst.msk [vmem:[#allocation2 + $0xe8] sm:$0xff] %vm19_vm3, %v1366_v10  ;;  %1270 = vmatmul.mubr.msk.bf16.gmra.mxu0 %vm373_vm2, %v1339_v12  ;;  %1302 = vmatmul.mubr.msk.bf16.gmra.mxu1 %vm373_vm2, %v1340_v13  ;;  %v84_v42 = vld [vmem:[#allocation2] sm:$0xff]  ;;  %v87_v48 = vld [vmem:[#allocation2 + $0x18] sm:$0xff] }
  0x12   :  { %50 = vst.msk [vmem:[#allocation2 + $0xf0] sm:$0xff] %vm19_vm3, %v1366_v10  ;;  %51 = vst.msk [vmem:[#allocation2 + $0xf8] sm:$0xff] %vm19_vm3, %v1366_v10  ;;  %1273 = vmatprep.mubr.msk.bf16.mxu0 %vm373_vm2, %v1341_v14  ;;  %1305 = vmatprep.mubr.msk.bf16.mxu1 %vm373_vm2, %v1342_v15  ;;  %v85_v54 = vld [vmem:[#allocation2 + $0x8] sm:$0xff]  ;;  %v90_v60 = vld [vmem:[#allocation2 + $0x30] sm:$0xff] }
  0x13   :  { %52 = vst.msk [vmem:[#allocation2 + $0x100] sm:$0xff] %vm19_vm3, %v1366_v10  ;;  %53 = vst.msk [vmem:[#allocation2 + $0x108] sm:$0xff] %vm19_vm3, %v1366_v10  ;;  %v1664_v0 = vld [vmem:[%s2046_s2] ss:$0 sm:$0xff]  ;;  %v91_v15 = vld [vmem:[#allocation2 + $0x38] sm:$0xff] }
  0x14   :  { %54 = vst.msk [vmem:[#allocation2 + $0x110] sm:$0xff] %vm19_vm3, %v1366_v10  ;;  %55 = vst.msk [vmem:[#allocation2 + $0x118] sm:$0xff] %vm19_vm3, %v1366_v10  ;;  %v88_v3 = vld [vmem:[#allocation2 + $0x20] sm:$0xff] }
  0x15   :  { %56 = vst.msk [vmem:[#allocation2 + $0x120] sm:$0xff] %vm19_vm3, %v1366_v10  ;;  %57 = vst.msk [vmem:[#allocation2 + $0x128] sm:$0xff] %vm19_vm3, %v1366_v10 }
  0x16   :  { %58 = vst.msk [vmem:[#allocation2 + $0x130] sm:$0xff] %vm19_vm3, %v1366_v10  ;;  %59 = vst.msk [vmem:[#allocation2 + $0x138] sm:$0xff] %vm19_vm3, %v1366_v10 }
  0x17   :  { %60 = vst.msk [vmem:[#allocation2 + $0x140] sm:$0xff] %vm19_vm3, %v1366_v10  ;;  %61 = vst.msk [vmem:[#allocation2 + $0x148] sm:$0xff] %vm19_vm3, %v1366_v10 }
  0x18   :  { %62 = vst.msk [vmem:[#allocation2 + $0x150] sm:$0xff] %vm19_vm3, %v1366_v10  ;;  %63 = vst.msk [vmem:[#allocation2 + $0x158] sm:$0xff] %vm19_vm3, %v1366_v10 }
  0x19   :  { %64 = vst.msk [vmem:[#allocation2 + $0x160] sm:$0xff] %vm19_vm3, %v1366_v10  ;;  %65 = vst.msk [vmem:[#allocation2 + $0x168] sm:$0xff] %vm19_vm3, %v1366_v10  ;;  %1274 = vmatmul.mubr.msk.bf16.gmra.mxu0 %vm373_vm2, %v1343_v16  ;;  %1306 = vmatmul.mubr.msk.bf16.gmra.mxu1 %vm373_vm2, %v1344_v17 }
  0x1a   :  { %66 = vst.msk [vmem:[#allocation2 + $0x170] sm:$0xff] %vm19_vm3, %v1366_v10  ;;  %67 = vst.msk [vmem:[#allocation2 + $0x178] sm:$0xff] %vm19_vm3, %v1366_v10  ;;  %1277 = vmatprep.mubr.msk.bf16.mxu0 %vm373_vm2, %v1345_v18  ;;  %1309 = vmatprep.mubr.msk.bf16.mxu1 %vm373_vm2, %v1346_v19  ;;  %v116_v43 = vld [vmem:[#allocation2 + $0x100] sm:$0xff]  ;;  %v117_v55 = vld [vmem:[#allocation2 + $0x108] sm:$0xff] }
  0x1b   :  { %68 = vst.msk [vmem:[#allocation2 + $0x180] sm:$0xff] %vm19_vm3, %v1366_v10  ;;  %69 = vst.msk [vmem:[#allocation2 + $0x188] sm:$0xff] %vm19_vm3, %v1366_v10  ;;  %v118_v39 = vld [vmem:[#allocation2 + $0x110] sm:$0xff]  ;;  %v119_v49 = vld [vmem:[#allocation2 + $0x118] sm:$0xff] }
  0x1c   :  { %70 = vst.msk [vmem:[#allocation2 + $0x190] sm:$0xff] %vm19_vm3, %v1366_v10  ;;  %71 = vst.msk [vmem:[#allocation2 + $0x198] sm:$0xff] %vm19_vm3, %v1366_v10  ;;  %v120_v4 = vld [vmem:[#allocation2 + $0x120] sm:$0xff] }
  0x1d   :  { %72 = vst.msk [vmem:[#allocation2 + $0x1a0] sm:$0xff] %vm19_vm3, %v1366_v10  ;;  %73 = vst.msk [vmem:[#allocation2 + $0x1a8] sm:$0xff] %vm19_vm3, %v1366_v10  ;;  %v122_v61 = vld [vmem:[#allocation2 + $0x130] sm:$0xff]  ;;  %v123_v16 = vld [vmem:[#allocation2 + $0x138] sm:$0xff] }
  0x1e   :  { %74 = vst.msk [vmem:[#allocation2 + $0x1b0] sm:$0xff] %vm19_vm3, %v1366_v10  ;;  %75 = vst.msk [vmem:[#allocation2 + $0x1b8] sm:$0xff] %vm19_vm3, %v1366_v10 }
  0x1f   :  { %76 = vst.msk [vmem:[#allocation2 + $0x1c0] sm:$0xff] %vm19_vm3, %v1366_v10  ;;  %77 = vst.msk [vmem:[#allocation2 + $0x1c8] sm:$0xff] %vm19_vm3, %v1366_v10 }
  0x20   :  { %78 = vst.msk [vmem:[#allocation2 + $0x1d0] sm:$0xff] %vm19_vm3, %v1366_v10  ;;  %79 = vst.msk [vmem:[#allocation2 + $0x1d8] sm:$0xff] %vm19_vm3, %v1366_v10 }
  0x21   :  { %80 = vst.msk [vmem:[#allocation2 + $0x1e0] sm:$0xff] %vm19_vm3, %v1366_v10  ;;  %81 = vst.msk [vmem:[#allocation2 + $0x1e8] sm:$0xff] %vm19_vm3, %v1366_v10  ;;  %1278 = vmatmul.mubr.msk.bf16.gmra.mxu0 %vm373_vm2, %v1347_v20  ;;  %1310 = vmatmul.mubr.msk.bf16.gmra.mxu1 %vm373_vm2, %v1348_v21 }
  0x22   :  { %82 = vst.msk [vmem:[#allocation2 + $0x1f0] sm:$0xff] %vm19_vm3, %v1366_v10  ;;  %83 = vst.msk [vmem:[#allocation2 + $0x1f8] sm:$0xff] %vm19_vm3, %v1366_v10  ;;  %1281 = vmatprep.mubr.msk.bf16.mxu0 %vm373_vm2, %v1349_v22  ;;  %1313 = vmatprep.mubr.msk.bf16.mxu1 %vm373_vm2, %v1350_v23 }
  0x29   :  { %1282 = vmatmul.mubr.msk.bf16.gmra.mxu0 %vm373_vm2, %v1351_v24  ;;  %1314 = vmatmul.mubr.msk.bf16.gmra.mxu1 %vm373_vm2, %v1352_v25  ;;  %v89_v25 = vld [vmem:[#allocation2 + $0x28] sm:$0xff] }
  0x2a   :  { %1285 = vmatprep.mubr.msk.bf16.mxu0 %vm373_vm2, %v1353_v26  ;;  %1317 = vmatprep.mubr.msk.bf16.mxu1 %vm373_vm2, %v1354_v27  ;;  %v121_v26 = vld [vmem:[#allocation2 + $0x128] sm:$0xff] }
  0x31   :  { %1286 = vmatmul.mubr.msk.bf16.gmra.mxu0 %vm373_vm2, %v1355_v28  ;;  %1318 = vmatmul.mubr.msk.bf16.gmra.mxu1 %vm373_vm2, %v1356_v29 }
  0x32   :  { %1289 = vmatprep.mubr.msk.bf16.mxu0 %vm373_vm2, %v1357_v30  ;;  %1321 = vmatprep.mubr.msk.bf16.mxu1 %vm373_vm2, %v1358_v31 }
  0x39   :  { %1290 = vmatmul.mubr.msk.bf16.gmra.mxu0 %vm373_vm2, %v1359_v32  ;;  %1322 = vmatmul.mubr.msk.bf16.gmra.mxu1 %vm373_vm2, %v1360_v33 }
  0x3a   :  { %1293 = vmatprep.mubr.msk.bf16.mxu0 %vm373_vm2, %v1361_v34  ;;  %1325 = vmatprep.mubr.msk.bf16.mxu1 %vm373_vm2, %v1362_v35 }
  0x41   :  { %1294 = vmatmul.mubr.msk.bf16.gmra.mxu0 %vm373_vm2, %v1363_v36  ;;  %1326 = vmatmul.mubr.msk.bf16.gmra.mxu1 %vm373_vm2, %v1364_v37  ;;  %v94_v37 = vld [vmem:[#allocation2 + $0x50] sm:$0xff] }
  0xc9   :  { %v1267_v40 = vpop.f32.mrf.mxu0  ;;  %v1299_v41 = vpop.f32.mrf.mxu1 }
  0xca   :  { %v768_v44 = vadd.f32 %v1267_v40, %v86_v38  ;;  %v800_v45 = vadd.f32 %v1299_v41, %v118_v39  ;;  %v126_v38 = vld [vmem:[#allocation2 + $0x150] sm:$0xff] }
  0xcb   :  { %v511_v46 = vpop.f32.mrf.mxu0  ;;  %v639_v47 = vpop.f32.mrf.mxu1 }
  0xcc   :  { %833 = vst.msk [vmem:[#allocation2 + $0x10] sm:$0xff] %vm19_vm3, %v768_v44  ;;  %865 = vst.msk [vmem:[#allocation2 + $0x110] sm:$0xff] %vm19_vm3, %v800_v45  ;;  %v766_v50 = vadd.f32 %v511_v46, %v84_v42  ;;  %v798_v51 = vadd.f32 %v639_v47, %v116_v43 }
  0xcd   :  { %v1268_v52 = vpop.f32.mrf.mxu0  ;;  %v1300_v53 = vpop.f32.mrf.mxu1 }
  0xce   :  { %831 = vst.msk [vmem:[#allocation2] sm:$0xff] %vm19_vm3, %v766_v50  ;;  %863 = vst.msk [vmem:[#allocation2 + $0x100] sm:$0xff] %vm19_vm3, %v798_v51  ;;  %v769_v56 = vadd.f32 %v1268_v52, %v87_v48  ;;  %v801_v57 = vadd.f32 %v1300_v53, %v119_v49  ;;  %v92_v49 = vld [vmem:[#allocation2 + $0x40] sm:$0xff] }
  0xcf   :  { %v514_v58 = vpop.f32.mrf.mxu0  ;;  %v642_v59 = vpop.f32.mrf.mxu1  ;;  %v124_v50 = vld [vmem:[#allocation2 + $0x140] sm:$0xff] }
  0xd0   :  { %834 = vst.msk [vmem:[#allocation2 + $0x18] sm:$0xff] %vm19_vm3, %v769_v56  ;;  %866 = vst.msk [vmem:[#allocation2 + $0x118] sm:$0xff] %vm19_vm3, %v801_v57  ;;  %v767_v62 = vadd.f32 %v514_v58, %v85_v54  ;;  %v799_v63 = vadd.f32 %v642_v59, %v117_v55 }
  0xd1   :  { %v1271_v1 = vpop.f32.mrf.mxu0  ;;  %v1303_v2 = vpop.f32.mrf.mxu1 }
  0xd2   :  { %832 = vst.msk [vmem:[#allocation2 + $0x8] sm:$0xff] %vm19_vm3, %v767_v62  ;;  %864 = vst.msk [vmem:[#allocation2 + $0x108] sm:$0xff] %vm19_vm3, %v799_v63  ;;  %v772_v5 = vadd.f32 %v1271_v1, %v90_v60  ;;  %v804_v6 = vadd.f32 %v1303_v2, %v122_v61  ;;  %v95_v61 = vld [vmem:[#allocation2 + $0x58] sm:$0xff]  ;;  %v93_v63 = vld [vmem:[#allocation2 + $0x48] sm:$0xff] }
  0xd3   :  { %v900_v7 = vld [vmem:[#allocation2 + $0x10] sm:$0xff]  ;;  %v527_v9 = vpop.f32.mrf.mxu0  ;;  %v655_v10 = vpop.f32.mrf.mxu1  ;;  %v127_v62 = vld [vmem:[#allocation2 + $0x158] sm:$0xff] }
  0xd4   :  { %v932_v8 = vld [vmem:[#allocation2 + $0x110] sm:$0xff]  ;;  %v971_v11 = vadd.f32 %v1664_v0, %v900_v7  ;;  %837 = vst.msk [vmem:[#allocation2 + $0x30] sm:$0xff] %vm19_vm3, %v772_v5  ;;  %869 = vst.msk [vmem:[#allocation2 + $0x130] sm:$0xff] %vm19_vm3, %v804_v6  ;;  %v770_v13 = vadd.f32 %v527_v9, %v88_v3  ;;  %v802_v14 = vadd.f32 %v655_v10, %v120_v4  ;;  %v125_v7 = vld [vmem:[#allocation2 + $0x148] sm:$0xff] }
  0xd5   :  { %v1003_v12 = vadd.f32 %v1664_v0, %v932_v8  ;;  %v898_v17 = vld [vmem:[#allocation2] sm:$0xff]  ;;  %v1272_v19 = vpop.f32.mrf.mxu0  ;;  %v1304_v20 = vpop.f32.mrf.mxu1 }
  0xd6   :  { %v930_v18 = vld [vmem:[#allocation2 + $0x100] sm:$0xff]  ;;  %v1035_v21 = vmax.f32 %v971_v11, 0.0  ;;  %v969_v23 = vadd.f32 %v1664_v0, %v898_v17  ;;  %835 = vst.msk [vmem:[#allocation2 + $0x20] sm:$0xff] %vm19_vm3, %v770_v13  ;;  %867 = vst.msk [vmem:[#allocation2 + $0x120] sm:$0xff] %vm19_vm3, %v802_v14  ;;  %v773_v29 = vadd.f32 %v1272_v19, %v91_v15  ;;  %v805_v30 = vadd.f32 %v1304_v20, %v123_v16  ;;  %v98_v16 = vld [vmem:[#allocation2 + $0x70] sm:$0xff] }
  0xd7   :  { %v1067_v22 = vmax.f32 %v1003_v12, 0.0  ;;  %v1001_v24 = vadd.f32 %v1664_v0, %v930_v18  ;;  %v901_v27 = vld [vmem:[#allocation2 + $0x18] sm:$0xff]  ;;  %v530_v31 = vpop.f32.mrf.mxu0  ;;  %v658_v32 = vpop.f32.mrf.mxu1  ;;  %v130_v17 = vld [vmem:[#allocation2 + $0x170] sm:$0xff] }
  0xd8   :  { %v933_v28 = vld [vmem:[#allocation2 + $0x118] sm:$0xff]  ;;  %1099 = vst.msk [vmem:[%s2047_s3 + $0x10] sm:$0xff] %vm19_vm3, %v1035_v21  ;;  %v1033_v33 = vmax.f32 %v969_v23, 0.0  ;;  %v972_v35 = vadd.f32 %v1664_v0, %v901_v27  ;;  %838 = vst.msk [vmem:[#allocation2 + $0x38] sm:$0xff] %vm19_vm3, %v773_v29  ;;  %v771_v41 = vadd.f32 %v530_v31, %v89_v25  ;;  %v803_v42 = vadd.f32 %v658_v32, %v121_v26  ;;  %v128_v29 = vld [vmem:[#allocation2 + $0x160] sm:$0xff] }
  0xd9   :  { %1131 = vst.msk [vmem:[%s2047_s3 + $0x110] sm:$0xff] %vm19_vm3, %v1067_v22  ;;  %v1065_v34 = vmax.f32 %v1001_v24, 0.0  ;;  %v1004_v36 = vadd.f32 %v1664_v0, %v933_v28  ;;  %v899_v39 = vld [vmem:[#allocation2 + $0x8] sm:$0xff]  ;;  %870 = vst.msk [vmem:[#allocation2 + $0x138] sm:$0xff] %vm19_vm3, %v805_v30  ;;  %v1275_v43 = vpop.f32.mrf.mxu0  ;;  %v1307_v44 = vpop.f32.mrf.mxu1  ;;  %v96_v28 = vld [vmem:[#allocation2 + $0x60] sm:$0xff] }
  0xda   :  { %v931_v40 = vld [vmem:[#allocation2 + $0x108] sm:$0xff]  ;;  %1097 = vst.msk [vmem:[%s2047_s3] sm:$0xff] %vm19_vm3, %v1033_v33  ;;  %v1036_v45 = vmax.f32 %v972_v35, 0.0  ;;  %v970_v47 = vadd.f32 %v1664_v0, %v899_v39  ;;  %836 = vst.msk [vmem:[#allocation2 + $0x28] sm:$0xff] %vm19_vm3, %v771_v41  ;;  %v776_v53 = vadd.f32 %v1275_v43, %v94_v37  ;;  %v808_v54 = vadd.f32 %v1307_v44, %v126_v38  ;;  %v131_v41 = vld [vmem:[#allocation2 + $0x178] sm:$0xff] }
  0xdb   :  { %1129 = vst.msk [vmem:[%s2047_s3 + $0x100] sm:$0xff] %vm19_vm3, %v1065_v34  ;;  %v1068_v46 = vmax.f32 %v1004_v36, 0.0  ;;  %v1002_v48 = vadd.f32 %v1664_v0, %v931_v40  ;;  %v904_v51 = vld [vmem:[#allocation2 + $0x30] sm:$0xff]  ;;  %868 = vst.msk [vmem:[#allocation2 + $0x128] sm:$0xff] %vm19_vm3, %v803_v42  ;;  %v543_v55 = vpop.f32.mrf.mxu0  ;;  %v671_v56 = vpop.f32.mrf.mxu1  ;;  %v99_v40 = vld [vmem:[#allocation2 + $0x78] sm:$0xff] }
  0xdc   :  { %v936_v52 = vld [vmem:[#allocation2 + $0x130] sm:$0xff]  ;;  %1100 = vst.msk [vmem:[%s2047_s3 + $0x18] sm:$0xff] %vm19_vm3, %v1036_v45  ;;  %v1034_v57 = vmax.f32 %v970_v47, 0.0  ;;  %v975_v59 = vadd.f32 %v1664_v0, %v904_v51  ;;  %841 = vst.msk [vmem:[#allocation2 + $0x50] sm:$0xff] %vm19_vm3, %v776_v53  ;;  %v774_v3 = vadd.f32 %v543_v55, %v92_v49  ;;  %v806_v4 = vadd.f32 %v671_v56, %v124_v50  ;;  %v129_v53 = vld [vmem:[#allocation2 + $0x168] sm:$0xff] }
  0xdd   :  { %1132 = vst.msk [vmem:[%s2047_s3 + $0x118] sm:$0xff] %vm19_vm3, %v1068_v46  ;;  %v1066_v58 = vmax.f32 %v1002_v48, 0.0  ;;  %v1007_v60 = vadd.f32 %v1664_v0, %v936_v52  ;;  %v902_v1 = vld [vmem:[#allocation2 + $0x20] sm:$0xff]  ;;  %873 = vst.msk [vmem:[#allocation2 + $0x150] sm:$0xff] %vm19_vm3, %v808_v54  ;;  %v1276_v5 = vpop.f32.mrf.mxu0  ;;  %v1308_v6 = vpop.f32.mrf.mxu1  ;;  %v97_v52 = vld [vmem:[#allocation2 + $0x68] sm:$0xff] }
  0xde   :  { %v934_v2 = vld [vmem:[#allocation2 + $0x120] sm:$0xff]  ;;  %1098 = vst.msk [vmem:[%s2047_s3 + $0x8] sm:$0xff] %vm19_vm3, %v1034_v57  ;;  %v1039_v8 = vmax.f32 %v975_v59, 0.0  ;;  %v973_v10 = vadd.f32 %v1664_v0, %v902_v1  ;;  %839 = vst.msk [vmem:[#allocation2 + $0x40] sm:$0xff] %vm19_vm3, %v774_v3  ;;  %v777_v12 = vadd.f32 %v1276_v5, %v95_v61  ;;  %v809_v13 = vadd.f32 %v1308_v6, %v127_v62  ;;  %v102_v1 = vld [vmem:[#allocation2 + $0x90] sm:$0xff] }
  0xdf   :  { %1130 = vst.msk [vmem:[%s2047_s3 + $0x108] sm:$0xff] %vm19_vm3, %v1066_v58  ;;  %v1071_v9 = vmax.f32 %v1007_v60, 0.0  ;;  %v1005_v11 = vadd.f32 %v1664_v0, %v934_v2  ;;  %871 = vst.msk [vmem:[#allocation2 + $0x140] sm:$0xff] %vm19_vm3, %v806_v4  ;;  %v546_v14 = vpop.f32.mrf.mxu0  ;;  %v674_v15 = vpop.f32.mrf.mxu1  ;;  %v905_v20 = vld [vmem:[#allocation2 + $0x38] sm:$0xff]  ;;  %v134_v2 = vld [vmem:[#allocation2 + $0x190] sm:$0xff] }
  0xe0   :  { %1103 = vst.msk [vmem:[%s2047_s3 + $0x30] sm:$0xff] %vm19_vm3, %v1039_v8  ;;  %v1037_v18 = vmax.f32 %v973_v10, 0.0  ;;  %v937_v21 = vld [vmem:[#allocation2 + $0x138] sm:$0xff]  ;;  %v775_v22 = vadd.f32 %v546_v14, %v93_v63  ;;  %v807_v23 = vadd.f32 %v674_v15, %v125_v7  ;;  %v976_v24 = vadd.f32 %v1664_v0, %v905_v20  ;;  %842 = vst.msk [vmem:[#allocation2 + $0x58] sm:$0xff] %vm19_vm3, %v777_v12  ;;  %v132_v20 = vld [vmem:[#allocation2 + $0x180] sm:$0xff] }
  0xe1   :  { %1135 = vst.msk [vmem:[%s2047_s3 + $0x130] sm:$0xff] %vm19_vm3, %v1071_v9  ;;  %v1069_v19 = vmax.f32 %v1005_v11, 0.0  ;;  %v1008_v25 = vadd.f32 %v1664_v0, %v937_v21  ;;  %874 = vst.msk [vmem:[#allocation2 + $0x158] sm:$0xff] %vm19_vm3, %v809_v13  ;;  %v1279_v26 = vpop.f32.mrf.mxu0  ;;  %v1311_v27 = vpop.f32.mrf.mxu1  ;;  %v903_v30 = vld [vmem:[#allocation2 + $0x28] sm:$0xff] }
  0xe2   :  { %1101 = vst.msk [vmem:[%s2047_s3 + $0x20] sm:$0xff] %vm19_vm3, %v1037_v18  ;;  %v935_v31 = vld [vmem:[#allocation2 + $0x128] sm:$0xff]  ;;  %840 = vst.msk [vmem:[#allocation2 + $0x48] sm:$0xff] %vm19_vm3, %v775_v22  ;;  %v780_v32 = vadd.f32 %v1279_v26, %v98_v16  ;;  %v812_v33 = vadd.f32 %v1311_v27, %v130_v17  ;;  %v1040_v34 = vmax.f32 %v976_v24, 0.0  ;;  %v974_v36 = vadd.f32 %v1664_v0, %v903_v30 }
  0xe3   :  { %1133 = vst.msk [vmem:[%s2047_s3 + $0x120] sm:$0xff] %vm19_vm3, %v1069_v19  ;;  %872 = vst.msk [vmem:[#allocation2 + $0x148] sm:$0xff] %vm19_vm3, %v807_v23  ;;  %v1072_v35 = vmax.f32 %v1008_v25, 0.0  ;;  %v1006_v37 = vadd.f32 %v1664_v0, %v935_v31  ;;  %v559_v38 = vpop.f32.mrf.mxu0  ;;  %v687_v39 = vpop.f32.mrf.mxu1  ;;  %v908_v42 = vld [vmem:[#allocation2 + $0x50] sm:$0xff]  ;;  %v100_v19 = vld [vmem:[#allocation2 + $0x80] sm:$0xff] }
  0xe4   :  { %v940_v43 = vld [vmem:[#allocation2 + $0x150] sm:$0xff]  ;;  %845 = vst.msk [vmem:[#allocation2 + $0x70] sm:$0xff] %vm19_vm3, %v780_v32  ;;  %877 = vst.msk [vmem:[#allocation2 + $0x170] sm:$0xff] %vm19_vm3, %v812_v33  ;;  %v778_v44 = vadd.f32 %v559_v38, %v96_v28  ;;  %v810_v45 = vadd.f32 %v687_v39, %v128_v29  ;;  %v1038_v46 = vmax.f32 %v974_v36, 0.0  ;;  %v979_v48 = vadd.f32 %v1664_v0, %v908_v42  ;;  %v103_v31 = vld [vmem:[#allocation2 + $0x98] sm:$0xff] }
  0xe5   :  { %1104 = vst.msk [vmem:[%s2047_s3 + $0x38] sm:$0xff] %vm19_vm3, %v1040_v34  ;;  %1136 = vst.msk [vmem:[%s2047_s3 + $0x138] sm:$0xff] %vm19_vm3, %v1072_v35  ;;  %v1070_v47 = vmax.f32 %v1006_v37, 0.0  ;;  %v1011_v49 = vadd.f32 %v1664_v0, %v940_v43  ;;  %v1280_v50 = vpop.f32.mrf.mxu0  ;;  %v1312_v51 = vpop.f32.mrf.mxu1  ;;  %v906_v54 = vld [vmem:[#allocation2 + $0x40] sm:$0xff]  ;;  %v135_v32 = vld [vmem:[#allocation2 + $0x198] sm:$0xff] }
  0xe6   :  { %v938_v55 = vld [vmem:[#allocation2 + $0x140] sm:$0xff]  ;;  %843 = vst.msk [vmem:[#allocation2 + $0x60] sm:$0xff] %vm19_vm3, %v778_v44  ;;  %875 = vst.msk [vmem:[#allocation2 + $0x160] sm:$0xff] %vm19_vm3, %v810_v45  ;;  %v781_v56 = vadd.f32 %v1280_v50, %v99_v40  ;;  %v813_v57 = vadd.f32 %v1312_v51, %v131_v41  ;;  %v1043_v58 = vmax.f32 %v979_v48, 0.0  ;;  %v977_v60 = vadd.f32 %v1664_v0, %v906_v54  ;;  %v101_v43 = vld [vmem:[#allocation2 + $0x88] sm:$0xff] }
  0xe7   :  { %1102 = vst.msk [vmem:[%s2047_s3 + $0x28] sm:$0xff] %vm19_vm3, %v1038_v46  ;;  %1134 = vst.msk [vmem:[%s2047_s3 + $0x128] sm:$0xff] %vm19_vm3, %v1070_v47  ;;  %v1075_v59 = vmax.f32 %v1011_v49, 0.0  ;;  %v1009_v61 = vadd.f32 %v1664_v0, %v938_v55  ;;  %v562_v62 = vpop.f32.mrf.mxu0  ;;  %v690_v63 = vpop.f32.mrf.mxu1  ;;  %v909_v3 = vld [vmem:[#allocation2 + $0x58] sm:$0xff]  ;;  %v133_v44 = vld [vmem:[#allocation2 + $0x188] sm:$0xff] }
  0xe8   :  { %v941_v4 = vld [vmem:[#allocation2 + $0x158] sm:$0xff]  ;;  %846 = vst.msk [vmem:[#allocation2 + $0x78] sm:$0xff] %vm19_vm3, %v781_v56  ;;  %878 = vst.msk [vmem:[#allocation2 + $0x178] sm:$0xff] %vm19_vm3, %v813_v57  ;;  %v779_v5 = vadd.f32 %v562_v62, %v97_v52  ;;  %v811_v6 = vadd.f32 %v690_v63, %v129_v53  ;;  %v1041_v7 = vmax.f32 %v977_v60, 0.0  ;;  %v980_v9 = vadd.f32 %v1664_v0, %v909_v3  ;;  %v106_v55 = vld [vmem:[#allocation2 + $0xb0] sm:$0xff] }
  0xe9   :  { %1107 = vst.msk [vmem:[%s2047_s3 + $0x50] sm:$0xff] %vm19_vm3, %v1043_v58  ;;  %1139 = vst.msk [vmem:[%s2047_s3 + $0x150] sm:$0xff] %vm19_vm3, %v1075_v59  ;;  %v1073_v8 = vmax.f32 %v1009_v61, 0.0  ;;  %v1012_v10 = vadd.f32 %v1664_v0, %v941_v4  ;;  %v907_v11 = vld [vmem:[#allocation2 + $0x48] sm:$0xff]  ;;  %v1283_v13 = vpop.f32.mrf.mxu0  ;;  %v1315_v14 = vpop.f32.mrf.mxu1  ;;  %v138_v56 = vld [vmem:[#allocation2 + $0x1b0] sm:$0xff] }
  0xea   :  { %v939_v12 = vld [vmem:[#allocation2 + $0x148] sm:$0xff]  ;;  %v978_v15 = vadd.f32 %v1664_v0, %v907_v11  ;;  %844 = vst.msk [vmem:[#allocation2 + $0x68] sm:$0xff] %vm19_vm3, %v779_v5  ;;  %876 = vst.msk [vmem:[#allocation2 + $0x168] sm:$0xff] %vm19_vm3, %v811_v6  ;;  %v784_v17 = vadd.f32 %v1283_v13, %v102_v1  ;;  %v816_v18 = vadd.f32 %v1315_v14, %v134_v2  ;;  %v1044_v21 = vmax.f32 %v980_v9, 0.0  ;;  %v104_v4 = vld [vmem:[#allocation2 + $0xa0] sm:$0xff] }
  0xeb   :  { %v1010_v16 = vadd.f32 %v1664_v0, %v939_v12  ;;  %1105 = vst.msk [vmem:[%s2047_s3 + $0x40] sm:$0xff] %vm19_vm3, %v1041_v7  ;;  %1137 = vst.msk [vmem:[%s2047_s3 + $0x140] sm:$0xff] %vm19_vm3, %v1073_v8  ;;  %v1076_v22 = vmax.f32 %v1012_v10, 0.0  ;;  %v912_v23 = vld [vmem:[#allocation2 + $0x70] sm:$0xff]  ;;  %v575_v25 = vpop.f32.mrf.mxu0  ;;  %v703_v26 = vpop.f32.mrf.mxu1  ;;  %v136_v5 = vld [vmem:[#allocation2 + $0x1a0] sm:$0xff] }
  0xec   :  { %v944_v24 = vld [vmem:[#allocation2 + $0x170] sm:$0xff]  ;;  %v1042_v27 = vmax.f32 %v978_v15, 0.0  ;;  %v983_v29 = vadd.f32 %v1664_v0, %v912_v23  ;;  %849 = vst.msk [vmem:[#allocation2 + $0x90] sm:$0xff] %vm19_vm3, %v784_v17  ;;  %881 = vst.msk [vmem:[#allocation2 + $0x190] sm:$0xff] %vm19_vm3, %v816_v18  ;;  %v782_v35 = vadd.f32 %v575_v25, %v100_v19  ;;  %v814_v36 = vadd.f32 %v703_v26, %v132_v20  ;;  %v107_v6 = vld [vmem:[#allocation2 + $0xb8] sm:$0xff] }
  0xed   :  { %v1074_v28 = vmax.f32 %v1010_v16, 0.0  ;;  %v1015_v30 = vadd.f32 %v1664_v0, %v944_v24  ;;  %1108 = vst.msk [vmem:[%s2047_s3 + $0x58] sm:$0xff] %vm19_vm3, %v1044_v21  ;;  %1140 = vst.msk [vmem:[%s2047_s3 + $0x158] sm:$0xff] %vm19_vm3, %v1076_v22  ;;  %v910_v33 = vld [vmem:[#allocation2 + $0x60] sm:$0xff]  ;;  %v1284_v37 = vpop.f32.mrf.mxu0  ;;  %v1316_v38 = vpop.f32.mrf.mxu1  ;;  %v139_v13 = vld [vmem:[#allocation2 + $0x1b8] sm:$0xff] }
  0xee   :  { %v942_v34 = vld [vmem:[#allocation2 + $0x160] sm:$0xff]  ;;  %1106 = vst.msk [vmem:[%s2047_s3 + $0x48] sm:$0xff] %vm19_vm3, %v1042_v27  ;;  %v1047_v39 = vmax.f32 %v983_v29, 0.0  ;;  %v981_v41 = vadd.f32 %v1664_v0, %v910_v33  ;;  %847 = vst.msk [vmem:[#allocation2 + $0x80] sm:$0xff] %vm19_vm3, %v782_v35  ;;  %v785_v47 = vadd.f32 %v1284_v37, %v103_v31  ;;  %v817_v48 = vadd.f32 %v1316_v38, %v135_v32  ;;  %v105_v22 = vld [vmem:[#allocation2 + $0xa8] sm:$0xff] }
  0xef   :  { %1138 = vst.msk [vmem:[%s2047_s3 + $0x148] sm:$0xff] %vm19_vm3, %v1074_v28  ;;  %v1079_v40 = vmax.f32 %v1015_v30, 0.0  ;;  %v1013_v42 = vadd.f32 %v1664_v0, %v942_v34  ;;  %v913_v45 = vld [vmem:[#allocation2 + $0x78] sm:$0xff]  ;;  %879 = vst.msk [vmem:[#allocation2 + $0x180] sm:$0xff] %vm19_vm3, %v814_v36  ;;  %v578_v49 = vpop.f32.mrf.mxu0  ;;  %v706_v50 = vpop.f32.mrf.mxu1  ;;  %v137_v23 = vld [vmem:[#allocation2 + $0x1a8] sm:$0xff] }
  0xf0   :  { %v945_v46 = vld [vmem:[#allocation2 + $0x178] sm:$0xff]  ;;  %1111 = vst.msk [vmem:[%s2047_s3 + $0x70] sm:$0xff] %vm19_vm3, %v1047_v39  ;;  %v1045_v51 = vmax.f32 %v981_v41, 0.0  ;;  %v984_v53 = vadd.f32 %v1664_v0, %v913_v45  ;;  %850 = vst.msk [vmem:[#allocation2 + $0x98] sm:$0xff] %vm19_vm3, %v785_v47  ;;  %v783_v59 = vadd.f32 %v578_v49, %v101_v43  ;;  %v815_v60 = vadd.f32 %v706_v50, %v133_v44  ;;  %v110_v34 = vld [vmem:[#allocation2 + $0xd0] sm:$0xff] }
  0xf1   :  { %1143 = vst.msk [vmem:[%s2047_s3 + $0x170] sm:$0xff] %vm19_vm3, %v1079_v40  ;;  %v1077_v52 = vmax.f32 %v1013_v42, 0.0  ;;  %v1016_v54 = vadd.f32 %v1664_v0, %v945_v46  ;;  %v911_v57 = vld [vmem:[#allocation2 + $0x68] sm:$0xff]  ;;  %882 = vst.msk [vmem:[#allocation2 + $0x198] sm:$0xff] %vm19_vm3, %v817_v48  ;;  %v1287_v61 = vpop.f32.mrf.mxu0  ;;  %v1319_v62 = vpop.f32.mrf.mxu1  ;;  %v142_v35 = vld [vmem:[#allocation2 + $0x1d0] sm:$0xff] }
  0xf2   :  { %v943_v58 = vld [vmem:[#allocation2 + $0x168] sm:$0xff]  ;;  %1109 = vst.msk [vmem:[%s2047_s3 + $0x60] sm:$0xff] %vm19_vm3, %v1045_v51  ;;  %v1048_v63 = vmax.f32 %v984_v53, 0.0  ;;  %v982_v2 = vadd.f32 %v1664_v0, %v911_v57  ;;  %848 = vst.msk [vmem:[#allocation2 + $0x88] sm:$0xff] %vm19_vm3, %v783_v59  ;;  %v788_v9 = vadd.f32 %v1287_v61, %v106_v55  ;;  %v820_v10 = vadd.f32 %v1319_v62, %v138_v56  ;;  %v108_v46 = vld [vmem:[#allocation2 + $0xc0] sm:$0xff] }
  0xf3   :  { %1141 = vst.msk [vmem:[%s2047_s3 + $0x160] sm:$0xff] %vm19_vm3, %v1077_v52  ;;  %v1080_v1 = vmax.f32 %v1016_v54, 0.0  ;;  %v1014_v3 = vadd.f32 %v1664_v0, %v943_v58  ;;  %v916_v7 = vld [vmem:[#allocation2 + $0x90] sm:$0xff]  ;;  %880 = vst.msk [vmem:[#allocation2 + $0x188] sm:$0xff] %vm19_vm3, %v815_v60  ;;  %v591_v11 = vpop.f32.mrf.mxu0  ;;  %v719_v12 = vpop.f32.mrf.mxu1  ;;  %v140_v47 = vld [vmem:[#allocation2 + $0x1c0] sm:$0xff] }
  0xf4   :  { %v948_v8 = vld [vmem:[#allocation2 + $0x190] sm:$0xff]  ;;  %1112 = vst.msk [vmem:[%s2047_s3 + $0x78] sm:$0xff] %vm19_vm3, %v1048_v63  ;;  %v1046_v14 = vmax.f32 %v982_v2, 0.0  ;;  %v987_v16 = vadd.f32 %v1664_v0, %v916_v7  ;;  %853 = vst.msk [vmem:[#allocation2 + $0xb0] sm:$0xff] %vm19_vm3, %v788_v9  ;;  %v786_v18 = vadd.f32 %v591_v11, %v104_v4  ;;  %v818_v19 = vadd.f32 %v719_v12, %v136_v5  ;;  %v111_v58 = vld [vmem:[#allocation2 + $0xd8] sm:$0xff] }
  0xf5   :  { %1144 = vst.msk [vmem:[%s2047_s3 + $0x178] sm:$0xff] %vm19_vm3, %v1080_v1  ;;  %v1078_v15 = vmax.f32 %v1014_v3, 0.0  ;;  %v1019_v17 = vadd.f32 %v1664_v0, %v948_v8  ;;  %885 = vst.msk [vmem:[#allocation2 + $0x1b0] sm:$0xff] %vm19_vm3, %v820_v10  ;;  %v1288_v20 = vpop.f32.mrf.mxu0  ;;  %v1320_v21 = vpop.f32.mrf.mxu1  ;;  %v914_v26 = vld [vmem:[#allocation2 + $0x80] sm:$0xff]  ;;  %v143_v59 = vld [vmem:[#allocation2 + $0x1d8] sm:$0xff] }
  0xf6   :  { %1110 = vst.msk [vmem:[%s2047_s3 + $0x68] sm:$0xff] %vm19_vm3, %v1046_v14  ;;  %v1051_v24 = vmax.f32 %v987_v16, 0.0  ;;  %v946_v27 = vld [vmem:[#allocation2 + $0x180] sm:$0xff]  ;;  %v789_v28 = vadd.f32 %v1288_v20, %v107_v6  ;;  %v821_v29 = vadd.f32 %v1320_v21, %v139_v13  ;;  %v985_v30 = vadd.f32 %v1664_v0, %v914_v26  ;;  %851 = vst.msk [vmem:[#allocation2 + $0xa0] sm:$0xff] %vm19_vm3, %v786_v18  ;;  %v109_v7 = vld [vmem:[#allocation2 + $0xc8] sm:$0xff] }
  0xf7   :  { %1142 = vst.msk [vmem:[%s2047_s3 + $0x168] sm:$0xff] %vm19_vm3, %v1078_v15  ;;  %v1083_v25 = vmax.f32 %v1019_v17, 0.0  ;;  %v1017_v31 = vadd.f32 %v1664_v0, %v946_v27  ;;  %883 = vst.msk [vmem:[#allocation2 + $0x1a0] sm:$0xff] %vm19_vm3, %v818_v19  ;;  %v594_v32 = vpop.f32.mrf.mxu0  ;;  %v722_v33 = vpop.f32.mrf.mxu1  ;;  %v917_v36 = vld [vmem:[#allocation2 + $0x98] sm:$0xff]  ;;  %v141_v8 = vld [vmem:[#allocation2 + $0x1c8] sm:$0xff] }
  0xf8   :  { %1115 = vst.msk [vmem:[%s2047_s3 + $0x90] sm:$0xff] %vm19_vm3, %v1051_v24  ;;  %v949_v37 = vld [vmem:[#allocation2 + $0x198] sm:$0xff]  ;;  %854 = vst.msk [vmem:[#allocation2 + $0xb8] sm:$0xff] %vm19_vm3, %v789_v28  ;;  %v787_v38 = vadd.f32 %v594_v32, %v105_v22  ;;  %v819_v39 = vadd.f32 %v722_v33, %v137_v23  ;;  %v1049_v40 = vmax.f32 %v985_v30, 0.0  ;;  %v988_v42 = vadd.f32 %v1664_v0, %v917_v36  ;;  %v146_v26 = vld [vmem:[#allocation2 + $0x1f0] sm:$0xff] }
  0xf9   :  { %1147 = vst.msk [vmem:[%s2047_s3 + $0x190] sm:$0xff] %vm19_vm3, %v1083_v25  ;;  %886 = vst.msk [vmem:[#allocation2 + $0x1b8] sm:$0xff] %vm19_vm3, %v821_v29  ;;  %v1081_v41 = vmax.f32 %v1017_v31, 0.0  ;;  %v1020_v43 = vadd.f32 %v1664_v0, %v949_v37  ;;  %v1291_v44 = vpop.f32.mrf.mxu0  ;;  %v1323_v45 = vpop.f32.mrf.mxu1  ;;  %v915_v48 = vld [vmem:[#allocation2 + $0x88] sm:$0xff]  ;;  %v114_v25 = vld [vmem:[#allocation2 + $0xf0] sm:$0xff] }
  0xfa   :  { %v947_v49 = vld [vmem:[#allocation2 + $0x188] sm:$0xff]  ;;  %852 = vst.msk [vmem:[#allocation2 + $0xa8] sm:$0xff] %vm19_vm3, %v787_v38  ;;  %884 = vst.msk [vmem:[#allocation2 + $0x1a8] sm:$0xff] %vm19_vm3, %v819_v39  ;;  %v792_v50 = vadd.f32 %v1291_v44, %v110_v34  ;;  %v824_v51 = vadd.f32 %v1323_v45, %v142_v35  ;;  %v1052_v52 = vmax.f32 %v988_v42, 0.0  ;;  %v986_v54 = vadd.f32 %v1664_v0, %v915_v48  ;;  %v112_v37 = vld [vmem:[#allocation2 + $0xe0] sm:$0xff] }
  0xfb   :  { %1113 = vst.msk [vmem:[%s2047_s3 + $0x80] sm:$0xff] %vm19_vm3, %v1049_v40  ;;  %1145 = vst.msk [vmem:[%s2047_s3 + $0x180] sm:$0xff] %vm19_vm3, %v1081_v41  ;;  %v1084_v53 = vmax.f32 %v1020_v43, 0.0  ;;  %v1018_v55 = vadd.f32 %v1664_v0, %v947_v49  ;;  %v607_v56 = vpop.f32.mrf.mxu0  ;;  %v735_v57 = vpop.f32.mrf.mxu1  ;;  %v920_v60 = vld [vmem:[#allocation2 + $0xb0] sm:$0xff]  ;;  %v144_v38 = vld [vmem:[#allocation2 + $0x1e0] sm:$0xff] }
  0xfc   :  { %v952_v61 = vld [vmem:[#allocation2 + $0x1b0] sm:$0xff]  ;;  %857 = vst.msk [vmem:[#allocation2 + $0xd0] sm:$0xff] %vm19_vm3, %v792_v50  ;;  %889 = vst.msk [vmem:[#allocation2 + $0x1d0] sm:$0xff] %vm19_vm3, %v824_v51  ;;  %v790_v62 = vadd.f32 %v607_v56, %v108_v46  ;;  %v822_v63 = vadd.f32 %v735_v57, %v140_v47  ;;  %v1050_v1 = vmax.f32 %v986_v54, 0.0  ;;  %v991_v3 = vadd.f32 %v1664_v0, %v920_v60  ;;  %v115_v49 = vld [vmem:[#allocation2 + $0xf8] sm:$0xff] }
  0xfd   :  { %1116 = vst.msk [vmem:[%s2047_s3 + $0x98] sm:$0xff] %vm19_vm3, %v1052_v52  ;;  %1148 = vst.msk [vmem:[%s2047_s3 + $0x198] sm:$0xff] %vm19_vm3, %v1084_v53  ;;  %v1082_v2 = vmax.f32 %v1018_v55, 0.0  ;;  %v1023_v4 = vadd.f32 %v1664_v0, %v952_v61  ;;  %v1292_v5 = vpop.f32.mrf.mxu0  ;;  %v1324_v6 = vpop.f32.mrf.mxu1  ;;  %v918_v9 = vld [vmem:[#allocation2 + $0xa0] sm:$0xff]  ;;  %v147_v50 = vld [vmem:[#allocation2 + $0x1f8] sm:$0xff] }
  0xfe   :  { %v950_v10 = vld [vmem:[#allocation2 + $0x1a0] sm:$0xff]  ;;  %855 = vst.msk [vmem:[#allocation2 + $0xc0] sm:$0xff] %vm19_vm3, %v790_v62  ;;  %887 = vst.msk [vmem:[#allocation2 + $0x1c0] sm:$0xff] %vm19_vm3, %v822_v63  ;;  %v793_v11 = vadd.f32 %v1292_v5, %v111_v58  ;;  %v825_v12 = vadd.f32 %v1324_v6, %v143_v59  ;;  %v1055_v13 = vmax.f32 %v991_v3, 0.0  ;;  %v989_v15 = vadd.f32 %v1664_v0, %v918_v9  ;;  %v113_v61 = vld [vmem:[#allocation2 + $0xe8] sm:$0xff] }
  0xff   :  { %1114 = vst.msk [vmem:[%s2047_s3 + $0x88] sm:$0xff] %vm19_vm3, %v1050_v1  ;;  %1146 = vst.msk [vmem:[%s2047_s3 + $0x188] sm:$0xff] %vm19_vm3, %v1082_v2  ;;  %v1087_v14 = vmax.f32 %v1023_v4, 0.0  ;;  %v1021_v16 = vadd.f32 %v1664_v0, %v950_v10  ;;  %v921_v17 = vld [vmem:[#allocation2 + $0xb8] sm:$0xff]  ;;  %v610_v19 = vpop.f32.mrf.mxu0  ;;  %v738_v20 = vpop.f32.mrf.mxu1  ;;  %v145_v62 = vld [vmem:[#allocation2 + $0x1e8] sm:$0xff] }
 0x100   :  { %v953_v18 = vld [vmem:[#allocation2 + $0x1b8] sm:$0xff]  ;;  %v992_v21 = vadd.f32 %v1664_v0, %v921_v17  ;;  %858 = vst.msk [vmem:[#allocation2 + $0xd8] sm:$0xff] %vm19_vm3, %v793_v11  ;;  %890 = vst.msk [vmem:[#allocation2 + $0x1d8] sm:$0xff] %vm19_vm3, %v825_v12  ;;  %v791_v23 = vadd.f32 %v610_v19, %v109_v7  ;;  %v823_v24 = vadd.f32 %v738_v20, %v141_v8  ;;  %v1053_v27 = vmax.f32 %v989_v15, 0.0 }
 0x101   :  { %v1024_v22 = vadd.f32 %v1664_v0, %v953_v18  ;;  %1119 = vst.msk [vmem:[%s2047_s3 + $0xb0] sm:$0xff] %vm19_vm3, %v1055_v13  ;;  %1151 = vst.msk [vmem:[%s2047_s3 + $0x1b0] sm:$0xff] %vm19_vm3, %v1087_v14  ;;  %v1085_v28 = vmax.f32 %v1021_v16, 0.0  ;;  %v919_v29 = vld [vmem:[#allocation2 + $0xa8] sm:$0xff]  ;;  %v1295_v31 = vpop.f32.mrf.mxu0  ;;  %v1327_v32 = vpop.f32.mrf.mxu1 }
 0x102   :  { %v951_v30 = vld [vmem:[#allocation2 + $0x1a8] sm:$0xff]  ;;  %v1056_v33 = vmax.f32 %v992_v21, 0.0  ;;  %v990_v35 = vadd.f32 %v1664_v0, %v919_v29  ;;  %856 = vst.msk [vmem:[#allocation2 + $0xc8] sm:$0xff] %vm19_vm3, %v791_v23  ;;  %888 = vst.msk [vmem:[#allocation2 + $0x1c8] sm:$0xff] %vm19_vm3, %v823_v24  ;;  %v796_v41 = vadd.f32 %v1295_v31, %v114_v25  ;;  %v828_v42 = vadd.f32 %v1327_v32, %v146_v26 }
 0x103   :  { %v1088_v34 = vmax.f32 %v1024_v22, 0.0  ;;  %v1022_v36 = vadd.f32 %v1664_v0, %v951_v30  ;;  %1117 = vst.msk [vmem:[%s2047_s3 + $0xa0] sm:$0xff] %vm19_vm3, %v1053_v27  ;;  %1149 = vst.msk [vmem:[%s2047_s3 + $0x1a0] sm:$0xff] %vm19_vm3, %v1085_v28  ;;  %v924_v39 = vld [vmem:[#allocation2 + $0xd0] sm:$0xff]  ;;  %v623_v43 = vpop.f32.mrf.mxu0  ;;  %v751_v44 = vpop.f32.mrf.mxu1 }
 0x104   :  { %v956_v40 = vld [vmem:[#allocation2 + $0x1d0] sm:$0xff]  ;;  %1120 = vst.msk [vmem:[%s2047_s3 + $0xb8] sm:$0xff] %vm19_vm3, %v1056_v33  ;;  %v1054_v45 = vmax.f32 %v990_v35, 0.0  ;;  %v995_v47 = vadd.f32 %v1664_v0, %v924_v39  ;;  %861 = vst.msk [vmem:[#allocation2 + $0xf0] sm:$0xff] %vm19_vm3, %v796_v41  ;;  %v794_v53 = vadd.f32 %v623_v43, %v112_v37  ;;  %v826_v54 = vadd.f32 %v751_v44, %v144_v38 }
 0x105   :  { %1152 = vst.msk [vmem:[%s2047_s3 + $0x1b8] sm:$0xff] %vm19_vm3, %v1088_v34  ;;  %v1086_v46 = vmax.f32 %v1022_v36, 0.0  ;;  %v1027_v48 = vadd.f32 %v1664_v0, %v956_v40  ;;  %v922_v51 = vld [vmem:[#allocation2 + $0xc0] sm:$0xff]  ;;  %893 = vst.msk [vmem:[#allocation2 + $0x1f0] sm:$0xff] %vm19_vm3, %v828_v42  ;;  %v1296_v55 = vpop.f32.mrf.mxu0  ;;  %v1328_v56 = vpop.f32.mrf.mxu1 }
 0x106   :  { %v954_v52 = vld [vmem:[#allocation2 + $0x1c0] sm:$0xff]  ;;  %1118 = vst.msk [vmem:[%s2047_s3 + $0xa8] sm:$0xff] %vm19_vm3, %v1054_v45  ;;  %v1059_v57 = vmax.f32 %v995_v47, 0.0  ;;  %v993_v59 = vadd.f32 %v1664_v0, %v922_v51  ;;  %859 = vst.msk [vmem:[#allocation2 + $0xe0] sm:$0xff] %vm19_vm3, %v794_v53  ;;  %v797_v2 = vadd.f32 %v1296_v55, %v115_v49  ;;  %v829_v3 = vadd.f32 %v1328_v56, %v147_v50 }
 0x107   :  { %1150 = vst.msk [vmem:[%s2047_s3 + $0x1a8] sm:$0xff] %vm19_vm3, %v1086_v46  ;;  %v1091_v58 = vmax.f32 %v1027_v48, 0.0  ;;  %v1025_v60 = vadd.f32 %v1664_v0, %v954_v52  ;;  %v925_v63 = vld [vmem:[#allocation2 + $0xd8] sm:$0xff]  ;;  %891 = vst.msk [vmem:[#allocation2 + $0x1e0] sm:$0xff] %vm19_vm3, %v826_v54  ;;  %v626_v4 = vpop.f32.mrf.mxu0  ;;  %v754_v5 = vpop.f32.mrf.mxu1 }
 0x108   :  { %v957_v1 = vld [vmem:[#allocation2 + $0x1d8] sm:$0xff]  ;;  %1123 = vst.msk [vmem:[%s2047_s3 + $0xd0] sm:$0xff] %vm19_vm3, %v1059_v57  ;;  %v1057_v6 = vmax.f32 %v993_v59, 0.0  ;;  %v996_v8 = vadd.f32 %v1664_v0, %v925_v63  ;;  %862 = vst.msk [vmem:[#allocation2 + $0xf8] sm:$0xff] %vm19_vm3, %v797_v2  ;;  %v795_v12 = vadd.f32 %v626_v4, %v113_v61  ;;  %v827_v13 = vadd.f32 %v754_v5, %v145_v62 }
 0x109   :  { %1155 = vst.msk [vmem:[%s2047_s3 + $0x1d0] sm:$0xff] %vm19_vm3, %v1091_v58  ;;  %v1089_v7 = vmax.f32 %v1025_v60, 0.0  ;;  %v1028_v9 = vadd.f32 %v1664_v0, %v957_v1  ;;  %v923_v10 = vld [vmem:[#allocation2 + $0xc8] sm:$0xff]  ;;  %894 = vst.msk [vmem:[#allocation2 + $0x1f8] sm:$0xff] %vm19_vm3, %v829_v3 }
 0x10a   :  { %v955_v11 = vld [vmem:[#allocation2 + $0x1c8] sm:$0xff]  ;;  %1121 = vst.msk [vmem:[%s2047_s3 + $0xc0] sm:$0xff] %vm19_vm3, %v1057_v6  ;;  %v1060_v14 = vmax.f32 %v996_v8, 0.0  ;;  %v994_v16 = vadd.f32 %v1664_v0, %v923_v10  ;;  %860 = vst.msk [vmem:[#allocation2 + $0xe8] sm:$0xff] %vm19_vm3, %v795_v12 }
 0x10b   :  { %1153 = vst.msk [vmem:[%s2047_s3 + $0x1c0] sm:$0xff] %vm19_vm3, %v1089_v7  ;;  %v1092_v15 = vmax.f32 %v1028_v9, 0.0  ;;  %v1026_v17 = vadd.f32 %v1664_v0, %v955_v11  ;;  %892 = vst.msk [vmem:[#allocation2 + $0x1e8] sm:$0xff] %vm19_vm3, %v827_v13  ;;  %v928_v20 = vld [vmem:[#allocation2 + $0xf0] sm:$0xff] }
 0x10c   :  { %1124 = vst.msk [vmem:[%s2047_s3 + $0xd8] sm:$0xff] %vm19_vm3, %v1060_v14  ;;  %v1058_v18 = vmax.f32 %v994_v16, 0.0  ;;  %v960_v21 = vld [vmem:[#allocation2 + $0x1f0] sm:$0xff]  ;;  %v999_v22 = vadd.f32 %v1664_v0, %v928_v20 }
 0x10d   :  { %1156 = vst.msk [vmem:[%s2047_s3 + $0x1d8] sm:$0xff] %vm19_vm3, %v1092_v15  ;;  %v1090_v19 = vmax.f32 %v1026_v17, 0.0  ;;  %v1031_v23 = vadd.f32 %v1664_v0, %v960_v21  ;;  %v926_v24 = vld [vmem:[#allocation2 + $0xe0] sm:$0xff] }
 0x10e   :  { %1122 = vst.msk [vmem:[%s2047_s3 + $0xc8] sm:$0xff] %vm19_vm3, %v1058_v18  ;;  %v958_v25 = vld [vmem:[#allocation2 + $0x1e0] sm:$0xff]  ;;  %v1063_v26 = vmax.f32 %v999_v22, 0.0  ;;  %v997_v28 = vadd.f32 %v1664_v0, %v926_v24 }
 0x10f   :  { %1154 = vst.msk [vmem:[%s2047_s3 + $0x1c8] sm:$0xff] %vm19_vm3, %v1090_v19  ;;  %v1095_v27 = vmax.f32 %v1031_v23, 0.0  ;;  %v1029_v29 = vadd.f32 %v1664_v0, %v958_v25  ;;  %v929_v30 = vld [vmem:[#allocation2 + $0xf8] sm:$0xff] }
 0x110   :  { %v961_v31 = vld [vmem:[#allocation2 + $0x1f8] sm:$0xff]  ;;  %1127 = vst.msk [vmem:[%s2047_s3 + $0xf0] sm:$0xff] %vm19_vm3, %v1063_v26  ;;  %v1061_v32 = vmax.f32 %v997_v28, 0.0  ;;  %v1000_v34 = vadd.f32 %v1664_v0, %v929_v30 }
 0x111   :  { %1159 = vst.msk [vmem:[%s2047_s3 + $0x1f0] sm:$0xff] %vm19_vm3, %v1095_v27  ;;  %v1093_v33 = vmax.f32 %v1029_v29, 0.0  ;;  %v1032_v35 = vadd.f32 %v1664_v0, %v961_v31  ;;  %v927_v36 = vld [vmem:[#allocation2 + $0xe8] sm:$0xff] }
 0x112   :  { %v959_v37 = vld [vmem:[#allocation2 + $0x1e8] sm:$0xff]  ;;  %1125 = vst.msk [vmem:[%s2047_s3 + $0xe0] sm:$0xff] %vm19_vm3, %v1061_v32  ;;  %v1064_v38 = vmax.f32 %v1000_v34, 0.0  ;;  %v998_v40 = vadd.f32 %v1664_v0, %v927_v36 }
 0x113   :  { %1157 = vst.msk [vmem:[%s2047_s3 + $0x1e0] sm:$0xff] %vm19_vm3, %v1093_v33  ;;  %v1096_v39 = vmax.f32 %v1032_v35, 0.0  ;;  %v1030_v41 = vadd.f32 %v1664_v0, %v959_v37 }
 0x114   :  { %1128 = vst.msk [vmem:[%s2047_s3 + $0xf8] sm:$0xff] %vm19_vm3, %v1064_v38  ;;  %v1062_v42 = vmax.f32 %v998_v40, 0.0 }
 0x115   :  { %1160 = vst.msk [vmem:[%s2047_s3 + $0x1f8] sm:$0xff] %vm19_vm3, %v1096_v39  ;;  %v1094_v43 = vmax.f32 %v1030_v41, 0.0 }
 0x116   :  { %1126 = vst.msk [vmem:[%s2047_s3 + $0xe8] sm:$0xff] %vm19_vm3, %v1062_v42 }
 0x117   :  { %1158 = vst.msk [vmem:[%s2047_s3 + $0x1e8] sm:$0xff] %vm19_vm3, %v1094_v43 }

// kernel: encoder_forward.7
= control target key start
LH: loop header
LB: loop body
LE: loop exit
PB: predicated region body
PF: predicated region fallthrough
CT: control target
= control target key end

     0   :  { %vm161_vm0 = vcmask 1041408   ;;  %vm27_vm1 = vcmask 64512   ;;  %v511_v2 = vmov 0.0   ;;  %vm136_vm2 = vcmask 293888   ;;  %s761_s1 = inlined_call_operand.vmem [shape: bf16[36,8], index: 1, kind: input, shape index: {}]   ;;  %s762_s0 = inlined_call_operand.vmem [shape: bf16[128,36], index: 0, kind: input, shape index: {}]   ;;  %s763_s3 = inlined_call_operand.vmem [shape: f32[1,8], index: 3, kind: output, shape index: {1}]   ;;  %s764_s4 = inlined_call_operand.vmem [shape: f32[1,8], index: 4, kind: output, shape index: {2}]   ;;  %s765_s2 = inlined_call_operand.vmem [shape: f32[128,8], index: 2, kind: output, shape index: {0}]  }
   0x1   :  { %v500_v0 = vld [vmem:[%s761_s1 + $0x10] ss:$0 sps:$4 sm:$0x33]   ;;  %v501_v1 = vld [vmem:[%s761_s1 + $0x8] sm:$0xff]   ;;  %30 = vst.msk [vmem:[#allocation2 + $0x10] sm:$0xff] %vm27_vm1, %v511_v2  ;;  %28 = vst.msk [vmem:[#allocation2] sm:$0xff] %vm27_vm1, %v511_v2 }
   0x2   :  { %29 = vst.msk [vmem:[#allocation2 + $0x8] sm:$0xff] %vm27_vm1, %v511_v2  ;;  %31 = vst.msk [vmem:[#allocation2 + $0x18] sm:$0xff] %vm27_vm1, %v511_v2  ;;  %497 = vmatprep.subr.msk.bf16.mxu0 %vm161_vm0, %v500_v0  ;;  %v163_v3 = vsel %vm161_vm0, %v500_v0, 0  ;;  %498 = vmatprep.subr.msk.bf16.mxu1 %vm161_vm0, %v500_v0  ;;  %v503_v4 = vld [vmem:[%s762_s0] sm:$0xff]   ;;  %v504_v7 = vld [vmem:[%s762_s0 + $0x8] sm:$0xff]   ;;  %vm21_vm3 = vcmask 57344  }
   0x3   :  { %32 = vst.msk [vmem:[#allocation2 + $0x20] sm:$0xff] %vm27_vm1, %v511_v2  ;;  %33 = vst.msk [vmem:[#allocation2 + $0x28] sm:$0xff] %vm27_vm1, %v511_v2  ;;  %470 = vmatpush3.bf16.msra.mxu0 %v163_v3  ;;  %494 = vmatpush3.bf16.msra.mxu1 %v163_v3  ;;  %v502_v5 = vld [vmem:[%s761_s1] sm:$0xff]   ;;  %v508_v8 = vld [vmem:[%s762_s0 + $0x28] sm:$0xff]  }
   0x4   :  { %34 = vst.msk [vmem:[#allocation2 + $0x30] sm:$0xff] %vm27_vm1, %v511_v2  ;;  %35 = vst.msk [vmem:[#allocation2 + $0x38] sm:$0xff] %vm27_vm1, %v511_v2  ;;  %471 = vmatprep.subr.bf16.mxu0 %v501_v1  ;;  %492 = vmatprep.subr.bf16.mxu1 %v501_v1  ;;  %v507_v6 = vld [vmem:[%s762_s0 + $0x20] sm:$0xff]   ;;  %v505_v9 = vld [vmem:[%s762_s0 + $0x10] sm:$0xff]  }
   0x5   :  { %36 = vst.msk [vmem:[#allocation2 + $0x40] sm:$0xff] %vm27_vm1, %v511_v2  ;;  %37 = vst.msk [vmem:[#allocation2 + $0x48] sm:$0xff] %vm27_vm1, %v511_v2  ;;  %475 = vmatprep.mubr.msk.bf16.mxu0 %vm136_vm2, %v503_v4  ;;  %483 = vmatprep.mubr.msk.bf16.mxu1 %vm136_vm2, %v507_v6  ;;  %v509_v10 = vld [vmem:[%s762_s0 + $0x30] sm:$0xff]   ;;  %v506_v11 = vld [vmem:[%s762_s0 + $0x18] sm:$0xff]  }
   0x6   :  { %38 = vst.msk [vmem:[#allocation2 + $0x50] sm:$0xff] %vm27_vm1, %v511_v2  ;;  %39 = vst.msk [vmem:[#allocation2 + $0x58] sm:$0xff] %vm27_vm1, %v511_v2  ;;  %v510_v12 = vld [vmem:[%s762_s0 + $0x38] sm:$0xff]  }
   0x7   :  { %40 = vst.msk [vmem:[#allocation2 + $0x60] sm:$0xff] %vm27_vm1, %v511_v2  ;;  %41 = vst.msk [vmem:[#allocation2 + $0x68] sm:$0xff] %vm27_vm1, %v511_v2  ;;  %472 = vmatpush3.bf16.msra.mxu0 %v501_v1  ;;  %495 = vmatpush3.bf16.msra.mxu1 %v501_v1 }
   0x8   :  { %42 = vst.msk [vmem:[#allocation2 + $0x70] sm:$0xff] %vm27_vm1, %v511_v2  ;;  %43 = vst.msk [vmem:[#allocation2 + $0x78] sm:$0xff] %vm27_vm1, %v511_v2  ;;  %473 = vmatprep.subr.bf16.mxu0 %v502_v5  ;;  %493 = vmatprep.subr.bf16.mxu1 %v502_v5  ;;  %v46_v13 = vld [vmem:[#allocation2 + $0x10] sm:$0xff]  ;;  %v44_v16 = vld [vmem:[#allocation2] sm:$0xff] }
   0x9   :  { %22 = vst.msk [vmem:[%s763_s3] sm:$0x1] %vm21_vm3, %v511_v2  ;;  %23 = vst.msk [vmem:[%s764_s4] sm:$0x1] %vm21_vm3, %v511_v2  ;;  %v47_v22 = vld [vmem:[#allocation2 + $0x18] sm:$0xff]  ;;  %v45_v28 = vld [vmem:[#allocation2 + $0x8] sm:$0xff] }
   0xa   :  { %v48_v40 = vld [vmem:[#allocation2 + $0x20] sm:$0xff]  ;;  %v49_v55 = vld [vmem:[#allocation2 + $0x28] sm:$0xff] }
   0xb   :  { %474 = vmatpush3.bf16.msra.mxu0 %v502_v5  ;;  %496 = vmatpush3.bf16.msra.mxu1 %v502_v5  ;;  %v50_v34 = vld [vmem:[#allocation2 + $0x30] sm:$0xff]  ;;  %v51_v48 = vld [vmem:[#allocation2 + $0x38] sm:$0xff] }
   0xc   :  { %v52_v18 = vld [vmem:[#allocation2 + $0x40] sm:$0xff]  ;;  %v53_v30 = vld [vmem:[#allocation2 + $0x48] sm:$0xff] }
   0xd   :  { %v54_v14 = vld [vmem:[#allocation2 + $0x50] sm:$0xff]  ;;  %v55_v24 = vld [vmem:[#allocation2 + $0x58] sm:$0xff] }
   0xe   :  { %476 = vmatmul.mubr.msk.bf16.vlgmr.msra.gmra.mxu0 %vm136_vm2, %v504_v7  ;;  %484 = vmatmul.mubr.msk.bf16.vlgmr.msra.gmra.mxu1 %vm136_vm2, %v508_v8  ;;  %v56_v44 = vld [vmem:[#allocation2 + $0x60] sm:$0xff]  ;;  %v57_v59 = vld [vmem:[#allocation2 + $0x68] sm:$0xff] }
   0xf   :  { %479 = vmatprep.mubr.msk.bf16.mxu0 %vm136_vm2, %v505_v9  ;;  %487 = vmatprep.mubr.msk.bf16.mxu1 %vm136_vm2, %v509_v10  ;;  %v58_v36 = vld [vmem:[#allocation2 + $0x70] sm:$0xff]  ;;  %v59_v51 = vld [vmem:[#allocation2 + $0x78] sm:$0xff] }
  0x16   :  { %480 = vmatmul.mubr.msk.bf16.gmra.mxu0 %vm136_vm2, %v506_v11  ;;  %488 = vmatmul.mubr.msk.bf16.gmra.mxu1 %vm136_vm2, %v510_v12 }
  0xce   :  { %v477_v15 = vpop.f32.mrf.mxu0  ;;  %v485_v17 = vpop.f32.mrf.mxu1 }
  0xcf   :  { %v264_v19 = vadd.f32 %v477_v15, %v46_v13  ;;  %v272_v20 = vadd.f32 %v485_v17, %v54_v14 }
  0xd0   :  { %v199_v21 = vpop.f32.mrf.mxu0  ;;  %v231_v23 = vpop.f32.mrf.mxu1 }
  0xd1   :  { %281 = vst.msk [vmem:[#allocation2 + $0x10] sm:$0xff] %vm27_vm1, %v264_v19  ;;  %v262_v25 = vadd.f32 %v199_v21, %v44_v16  ;;  %289 = vst.msk [vmem:[#allocation2 + $0x50] sm:$0xff] %vm27_vm1, %v272_v20  ;;  %v270_v26 = vadd.f32 %v231_v23, %v52_v18 }
  0xd2   :  { %v478_v27 = vpop.f32.mrf.mxu0  ;;  %v486_v29 = vpop.f32.mrf.mxu1 }
  0xd3   :  { %279 = vst.msk [vmem:[#allocation2] sm:$0xff] %vm27_vm1, %v262_v25  ;;  %v265_v31 = vadd.f32 %v478_v27, %v47_v22  ;;  %287 = vst.msk [vmem:[#allocation2 + $0x40] sm:$0xff] %vm27_vm1, %v270_v26  ;;  %v273_v32 = vadd.f32 %v486_v29, %v55_v24 }
  0xd4   :  { %v202_v33 = vpop.f32.mrf.mxu0  ;;  %v234_v35 = vpop.f32.mrf.mxu1 }
  0xd5   :  { %282 = vst.msk [vmem:[#allocation2 + $0x18] sm:$0xff] %vm27_vm1, %v265_v31  ;;  %v263_v37 = vadd.f32 %v202_v33, %v45_v28  ;;  %290 = vst.msk [vmem:[#allocation2 + $0x58] sm:$0xff] %vm27_vm1, %v273_v32  ;;  %v271_v38 = vadd.f32 %v234_v35, %v53_v30 }
  0xd6   :  { %v481_v39 = vpop.f32.mrf.mxu0  ;;  %v489_v41 = vpop.f32.mrf.mxu1 }
  0xd7   :  { %280 = vst.msk [vmem:[#allocation2 + $0x8] sm:$0xff] %vm27_vm1, %v263_v37  ;;  %v268_v42 = vadd.f32 %v481_v39, %v50_v34  ;;  %288 = vst.msk [vmem:[#allocation2 + $0x48] sm:$0xff] %vm27_vm1, %v271_v38  ;;  %v276_v43 = vadd.f32 %v489_v41, %v58_v36 }
  0xd8   :  { %v300_v45 = vld [vmem:[#allocation2 + $0x10] sm:$0xff]  ;;  %v215_v46 = vpop.f32.mrf.mxu0  ;;  %v247_v49 = vpop.f32.mrf.mxu1 }
  0xd9   :  { %v613_v47 = vld [vmem:[#allocation2 + $0x50] sm:$0xff]  ;;  %316 = vst.msk [vmem:[%s765_s2 + $0x10] sm:$0xff] %vm27_vm1, %v300_v45  ;;  %285 = vst.msk [vmem:[#allocation2 + $0x30] sm:$0xff] %vm27_vm1, %v268_v42  ;;  %v266_v50 = vadd.f32 %v215_v46, %v48_v40  ;;  %v274_v56 = vadd.f32 %v247_v49, %v56_v44  ;;  %v374_v6 = vmul.f32 %v300_v45, %v300_v45  ;;  %v334_v13 = vsel %vm27_vm1, %v300_v45, 0.0 }
  0xda   :  { %324 = vst.msk [vmem:[%s765_s2 + $0x50] sm:$0xff] %vm27_vm1, %v613_v47  ;;  %293 = vst.msk [vmem:[#allocation2 + $0x70] sm:$0xff] %vm27_vm1, %v276_v43  ;;  %v298_v52 = vld [vmem:[#allocation2] sm:$0xff]  ;;  %v482_v53 = vpop.f32.mrf.mxu0  ;;  %v490_v57 = vpop.f32.mrf.mxu1 }
  0xdb   :  { %v626_v54 = vld [vmem:[#allocation2 + $0x40] sm:$0xff]  ;;  %314 = vst.msk [vmem:[%s765_s2] sm:$0xff] %vm27_vm1, %v298_v52  ;;  %283 = vst.msk [vmem:[#allocation2 + $0x20] sm:$0xff] %vm27_vm1, %v266_v50  ;;  %v269_v58 = vadd.f32 %v482_v53, %v51_v48  ;;  %v277_v63 = vadd.f32 %v490_v57, %v59_v51  ;;  %v372_v1 = vmul.f32 %v298_v52, %v298_v52  ;;  %v331_v7 = vsel %vm27_vm1, %v298_v52, 0.0 }
  0xdc   :  { %322 = vst.msk [vmem:[%s765_s2 + $0x40] sm:$0xff] %vm27_vm1, %v626_v54  ;;  %v301_v60 = vld [vmem:[#allocation2 + $0x18] sm:$0xff]  ;;  %v218_v61 = vpop.f32.mrf.mxu0  ;;  %291 = vst.msk [vmem:[#allocation2 + $0x60] sm:$0xff] %vm27_vm1, %v274_v56  ;;  %v250_v0 = vpop.f32.mrf.mxu1  ;;  %v391_v20 = vsel %vm27_vm1, %v374_v6, 0.0  ;;  %v380_v48 = vmul.f32 %v626_v54, %v626_v54  ;;  %v346_v52 = vsel %vm27_vm1, %v626_v54, 0.0  ;;  %v382_v57 = vmul.f32 %v613_v47, %v613_v47 }
  0xdd   :  { %v638_v62 = vld [vmem:[#allocation2 + $0x58] sm:$0xff]  ;;  %317 = vst.msk [vmem:[%s765_s2 + $0x18] sm:$0xff] %vm27_vm1, %v301_v60  ;;  %286 = vst.msk [vmem:[#allocation2 + $0x38] sm:$0xff] %vm27_vm1, %v269_v58  ;;  %v267_v2 = vadd.f32 %v218_v61, %v49_v55  ;;  %v275_v5 = vadd.f32 %v250_v0, %v57_v59  ;;  %v388_v14 = vsel %vm27_vm1, %v372_v1, 0.0  ;;  %v375_v15 = vmul.f32 %v301_v60, %v301_v60 }
  0xde   :  { %325 = vst.msk [vmem:[%s765_s2 + $0x58] sm:$0xff] %vm27_vm1, %v638_v62  ;;  %v299_v3 = vld [vmem:[#allocation2 + $0x8] sm:$0xff]  ;;  %294 = vst.msk [vmem:[#allocation2 + $0x78] sm:$0xff] %vm27_vm1, %v277_v63  ;;  %v336_v21 = vsel %vm27_vm1, %v301_v60, 0.0  ;;  %v403_v58 = vsel %vm27_vm1, %v380_v48, 0.0  ;;  %v350_v63 = vsel %vm27_vm1, %v613_v47, 0.0  ;;  %v383_v54 = vmul.f32 %v638_v62, %v638_v62 }
  0xdf   :  { %v651_v4 = vld [vmem:[#allocation2 + $0x48] sm:$0xff]  ;;  %315 = vst.msk [vmem:[%s765_s2 + $0x8] sm:$0xff] %vm27_vm1, %v299_v3  ;;  %v332_v8 = vsel %vm27_vm1, %v299_v3, 0.0  ;;  %v373_v9 = vmul.f32 %v299_v3, %v299_v3  ;;  %284 = vst.msk [vmem:[#allocation2 + $0x28] sm:$0xff] %vm27_vm1, %v267_v2  ;;  %v393_v27 = vsel %vm27_vm1, %v375_v15, 0.0  ;;  %v407_v3 = vsel %vm27_vm1, %v382_v57, 0.0 }
  0xe0   :  { %323 = vst.msk [vmem:[%s765_s2 + $0x48] sm:$0xff] %vm27_vm1, %v651_v4  ;;  %v333_v10 = vadd.f32 %v332_v8, %v331_v7  ;;  %v304_v11 = vld [vmem:[#allocation2 + $0x30] sm:$0xff]  ;;  %292 = vst.msk [vmem:[#allocation2 + $0x68] sm:$0xff] %vm27_vm1, %v275_v5  ;;  %v381_v53 = vmul.f32 %v651_v4, %v651_v4  ;;  %v348_v59 = vsel %vm27_vm1, %v651_v4, 0.0  ;;  %v352_v5 = vsel %vm27_vm1, %v638_v62, 0.0 }
  0xe1   :  { %v666_v12 = vld [vmem:[#allocation2 + $0x70] sm:$0xff]  ;;  %v389_v16 = vsel %vm27_vm1, %v373_v9, 0.0  ;;  %320 = vst.msk [vmem:[%s765_s2 + $0x30] sm:$0xff] %vm27_vm1, %v304_v11  ;;  %v378_v33 = vmul.f32 %v304_v11, %v304_v11  ;;  %v342_v40 = vsel %vm27_vm1, %v304_v11, 0.0  ;;  %v409_v8 = vsel %vm27_vm1, %v383_v54, 0.0 }
  0xe2   :  { %328 = vst.msk [vmem:[%s765_s2 + $0x70] sm:$0xff] %vm27_vm1, %v666_v12  ;;  %v335_v17 = vadd.f32 %v334_v13, %v333_v10  ;;  %v390_v18 = vadd.f32 %v389_v16, %v388_v14  ;;  %v302_v19 = vld [vmem:[#allocation2 + $0x20] sm:$0xff]  ;;  %v405_v0 = vsel %vm27_vm1, %v381_v53, 0.0  ;;  %v386_v13 = vmul.f32 %v666_v12, %v666_v12 }
  0xe3   :  { %318 = vst.msk [vmem:[%s765_s2 + $0x20] sm:$0xff] %vm27_vm1, %v302_v19  ;;  %v376_v22 = vmul.f32 %v302_v19, %v302_v19  ;;  %v310_v23 = vld [vmem:[#allocation2 + $0x60] sm:$0xff]  ;;  %v338_v28 = vsel %vm27_vm1, %v302_v19, 0.0  ;;  %v399_v45 = vsel %vm27_vm1, %v378_v33, 0.0  ;;  %v358_v62 = vsel %vm27_vm1, %v666_v12, 0.0 }
  0xe4   :  { %v392_v24 = vadd.f32 %v391_v20, %v390_v18  ;;  %v337_v25 = vadd.f32 %v336_v21, %v335_v17  ;;  %v305_v26 = vld [vmem:[#allocation2 + $0x38] sm:$0xff]  ;;  %326 = vst.msk [vmem:[%s765_s2 + $0x60] sm:$0xff] %vm27_vm1, %v310_v23  ;;  %v384_v6 = vmul.f32 %v310_v23, %v310_v23  ;;  %v354_v9 = vsel %vm27_vm1, %v310_v23, 0.0 }
  0xe5   :  { %321 = vst.msk [vmem:[%s765_s2 + $0x38] sm:$0xff] %vm27_vm1, %v305_v26  ;;  %v313_v29 = vld [vmem:[#allocation2 + $0x78] sm:$0xff]  ;;  %v395_v34 = vsel %vm27_vm1, %v376_v22, 0.0  ;;  %v379_v41 = vmul.f32 %v305_v26, %v305_v26  ;;  %v344_v46 = vsel %vm27_vm1, %v305_v26, 0.0  ;;  %v415_v22 = vsel %vm27_vm1, %v386_v13, 0.0 }
  0xe6   :  { %v339_v30 = vadd.f32 %v338_v28, %v337_v25  ;;  %v394_v31 = vadd.f32 %v393_v27, %v392_v24  ;;  %v303_v32 = vld [vmem:[#allocation2 + $0x28] sm:$0xff]  ;;  %329 = vst.msk [vmem:[%s765_s2 + $0x78] sm:$0xff] %vm27_vm1, %v313_v29  ;;  %v411_v14 = vsel %vm27_vm1, %v384_v6, 0.0  ;;  %v387_v18 = vmul.f32 %v313_v29, %v313_v29 }
  0xe7   :  { %319 = vst.msk [vmem:[%s765_s2 + $0x28] sm:$0xff] %vm27_vm1, %v303_v32  ;;  %v340_v35 = vsel %vm27_vm1, %v303_v32, 0.0  ;;  %v377_v36 = vmul.f32 %v303_v32, %v303_v32  ;;  %v311_v37 = vld [vmem:[#allocation2 + $0x68] sm:$0xff]  ;;  %v401_v51 = vsel %vm27_vm1, %v379_v41, 0.0  ;;  %v360_v23 = vsel %vm27_vm1, %v313_v29, 0.0 }
  0xe8   :  { %v396_v38 = vadd.f32 %v395_v34, %v394_v31  ;;  %v341_v39 = vadd.f32 %v340_v35, %v339_v30  ;;  %327 = vst.msk [vmem:[%s765_s2 + $0x68] sm:$0xff] %vm27_vm1, %v311_v37  ;;  %v385_v47 = vmul.f32 %v311_v37, %v311_v37  ;;  %v356_v15 = vsel %vm27_vm1, %v311_v37, 0.0  ;;  %v330_v37 = vld [vmem:[%s763_s3] sm:$0x1] }
  0xe9   :  { %v397_v42 = vsel %vm27_vm1, %v377_v36, 0.0  ;;  %v417_v26 = vsel %vm27_vm1, %v387_v18, 0.0 }
  0xea   :  { %v343_v43 = vadd.f32 %v342_v40, %v341_v39  ;;  %v398_v44 = vadd.f32 %v397_v42, %v396_v38  ;;  %v413_v19 = vsel %vm27_vm1, %v385_v47, 0.0  ;;  %v371_v39 = vld [vmem:[%s764_s4] sm:$0x1] }
  0xec   :  { %v400_v49 = vadd.f32 %v399_v45, %v398_v44  ;;  %v345_v50 = vadd.f32 %v344_v46, %v343_v43 }
  0xee   :  { %v347_v55 = vadd.f32 %v346_v52, %v345_v50  ;;  %v402_v56 = vadd.f32 %v401_v51, %v400_v49 }
  0xf0   :  { %v349_v60 = vadd.f32 %v348_v59, %v347_v55  ;;  %v404_v61 = vadd.f32 %v403_v58, %v402_v56 }
  0xf2   :  { %v351_v1 = vadd.f32 %v350_v63, %v349_v60  ;;  %v406_v2 = vadd.f32 %v405_v0, %v404_v61 }
  0xf4   :  { %v408_v7 = vadd.f32 %v407_v3, %v406_v2  ;;  %v353_v4 = vadd.f32 %v352_v5, %v351_v1 }
  0xf6   :  { %v355_v10 = vadd.f32 %v354_v9, %v353_v4  ;;  %v410_v11 = vadd.f32 %v409_v8, %v408_v7 }
  0xf8   :  { %v412_v16 = vadd.f32 %v411_v14, %v410_v11  ;;  %v357_v17 = vadd.f32 %v356_v15, %v355_v10 }
  0xfa   :  { %v359_v20 = vadd.f32 %v358_v62, %v357_v17  ;;  %v414_v21 = vadd.f32 %v413_v19, %v412_v16 }
  0xfc   :  { %v361_v24 = vadd.f32 %v360_v23, %v359_v20  ;;  %v416_v25 = vadd.f32 %v415_v22, %v414_v21 }
  0xfe   :  { %v362_v27 = vrot.slane %v361_v24, 4  ;;  %v418_v28 = vadd.f32 %v417_v26, %v416_v25 }
 0x100   :  { %v363_v30 = vadd.f32 %v362_v27, %v361_v24  ;;  %v419_v31 = vrot.slane %v418_v28, 4 }
 0x102   :  { %v364_v32 = vrot.slane %v363_v30, 2  ;;  %v420_v33 = vadd.f32 %v419_v31, %v418_v28 }
 0x104   :  { %v365_v12 = vadd.f32 %v364_v32, %v363_v30  ;;  %v421_v34 = vrot.slane %v420_v33, 2 }
 0x106   :  { %v366_v35 = vrot.slane %v365_v12, 1  ;;  %v422_v36 = vadd.f32 %v421_v34, %v420_v33 }
 0x108   :  { %v367_v38 = vadd.f32 %v366_v35, %v365_v12  ;;  %v423_v29 = vrot.slane %v422_v36, 1 }
 0x10a   :  { %v368_v40 = vadd.f32 %v367_v38, %v330_v37  ;;  %v424_v41 = vadd.f32 %v423_v29, %v422_v36 }
 0x10c   :  { %370 = vst.msk [vmem:[%s763_s3] sm:$0x1] %vm21_vm3, %v368_v40  ;;  %v425_v42 = vadd.f32 %v424_v41, %v371_v39 }
 0x10e   :  { %426 = vst.msk [vmem:[%s764_s4] sm:$0x1] %vm21_vm3, %v425_v42 }

// kernel: encoder_forward.9
= control target key start
LH: loop header
LB: loop body
LE: loop exit
PB: predicated region body
PF: predicated region fallthrough
CT: control target
= control target key end

     0   :  { %vm93_vm0 = vcmask 1043456   ;;  %vm21_vm1 = vcmask 122880   ;;  %v254_v1 = vmov 0.0   ;;  %vm27_vm2 = vcmask 130048   ;;  %s355_s1 = inlined_call_operand.vmem [shape: bf16[72,16], index: 1, kind: input, shape index: {}]   ;;  %s356_s3 = inlined_call_operand.vmem [shape: f32[1,16], index: 3, kind: output, shape index: {1}]   ;;  %s357_s4 = inlined_call_operand.vmem [shape: f32[1,16], index: 4, kind: output, shape index: {2}]   ;;  %s358_s0 = inlined_call_operand.vmem [shape: bf16[32,72], index: 0, kind: input, shape index: {}]   ;;  %s359_s2 = inlined_call_operand.vmem [shape: f32[32,16], index: 2, kind: output, shape index: {0}]  }
   0x1   :  { %v247_v0 = vld [vmem:[%s355_s1 + $0x20] ss:$0 sps:$4 sm:$0xff]   ;;  %22 = vst.msk [vmem:[%s356_s3] sm:$0x1] %vm21_vm1, %v254_v1  ;;  %23 = vst.msk [vmem:[%s357_s4] sm:$0x1] %vm21_vm1, %v254_v1 }
   0x2   :  { %v248_v2 = vld [vmem:[%s355_s1 + $0x18] sm:$0xff]   ;;  %245 = vmatprep.subr.msk.bf16.mxu0 %vm93_vm0, %v247_v0  ;;  %v95_v3 = vsel %vm93_vm0, %v247_v0, 0  ;;  %30 = vst.msk [vmem:[#allocation2 + $0x10] sm:$0xff] %vm27_vm2, %v254_v1  ;;  %28 = vst.msk [vmem:[#allocation2] sm:$0xff] %vm27_vm2, %v254_v1  ;;  %v249_v4 = vld [vmem:[%s355_s1 + $0x10] sm:$0xff]   ;;  %vm86_vm3 = vcmask 588800  }
   0x3   :  { %29 = vst.msk [vmem:[#allocation2 + $0x8] sm:$0xff] %vm27_vm2, %v254_v1  ;;  %31 = vst.msk [vmem:[#allocation2 + $0x18] sm:$0xff] %vm27_vm2, %v254_v1  ;;  %232 = vmatpush3.bf16.msra.mxu0 %v95_v3  ;;  %v252_v5 = vld [vmem:[%s358_s0] sm:$0xff]   ;;  %v250_v6 = vld [vmem:[%s355_s1 + $0x8] sm:$0xff]  }
   0x4   :  { %233 = vmatprep.subr.bf16.mxu0 %v248_v2  ;;  %241 = vmatprep.mubr.msk.bf16.mxu0 %vm86_vm3, %v252_v5  ;;  %v251_v7 = vld [vmem:[%s355_s1] sm:$0xff]   ;;  %v253_v8 = vld [vmem:[%s358_s0 + $0x8] sm:$0xff]  }
   0x7   :  { %234 = vmatpush3.bf16.msra.mxu0 %v248_v2 }
   0x8   :  { %235 = vmatprep.subr.bf16.mxu0 %v249_v4  ;;  %v166_v52 = vld [vmem:[%s356_s3] sm:$0x1] }
   0x9   :  { %v34_v9 = vld [vmem:[#allocation2 + $0x10] sm:$0xff]  ;;  %v32_v11 = vld [vmem:[#allocation2] sm:$0xff] }
   0xa   :  { %v35_v14 = vld [vmem:[#allocation2 + $0x18] sm:$0xff]  ;;  %v33_v17 = vld [vmem:[#allocation2 + $0x8] sm:$0xff]  ;;  %v183_v55 = vld [vmem:[%s357_s4] sm:$0x1] }
   0xb   :  { %236 = vmatpush3.bf16.msra.mxu0 %v249_v4 }
   0xc   :  { %237 = vmatprep.subr.bf16.mxu0 %v250_v6 }
   0xf   :  { %238 = vmatpush3.bf16.msra.mxu0 %v250_v6 }
  0x10   :  { %239 = vmatprep.subr.bf16.mxu0 %v251_v7 }
  0x13   :  { %240 = vmatpush3.bf16.msra.mxu0 %v251_v7 }
  0x16   :  { %242 = vmatmul.mubr.msk.bf16.vlgmr.msra.gmra.mxu0 %vm86_vm3, %v253_v8 }
  0xd6   :  { %v243_v10 = vpop.f32.mrf.mxu0 }
  0xd7   :  { %v148_v12 = vadd.f32 %v243_v10, %v34_v9 }
  0xd8   :  { %v131_v13 = vpop.f32.mrf.mxu0 }
  0xd9   :  { %153 = vst.msk [vmem:[#allocation2 + $0x10] sm:$0xff] %vm27_vm2, %v148_v12  ;;  %v146_v15 = vadd.f32 %v131_v13, %v32_v11 }
  0xda   :  { %v244_v16 = vpop.f32.mrf.mxu0 }
  0xdb   :  { %151 = vst.msk [vmem:[#allocation2] sm:$0xff] %vm27_vm2, %v146_v15  ;;  %v149_v18 = vadd.f32 %v244_v16, %v35_v14 }
  0xdc   :  { %v134_v19 = vpop.f32.mrf.mxu0 }
  0xdd   :  { %154 = vst.msk [vmem:[#allocation2 + $0x18] sm:$0xff] %vm27_vm2, %v149_v18  ;;  %v147_v20 = vadd.f32 %v134_v19, %v33_v17 }
  0xdf   :  { %152 = vst.msk [vmem:[#allocation2 + $0x8] sm:$0xff] %vm27_vm2, %v147_v20 }
  0xe0   :  { %v160_v21 = vld [vmem:[#allocation2 + $0x10] sm:$0xff] }
  0xe1   :  { %164 = vst.msk [vmem:[%s359_s2 + $0x10] sm:$0xff] %vm27_vm2, %v160_v21  ;;  %v186_v26 = vmul.f32 %v160_v21, %v160_v21  ;;  %v170_v31 = vsel %vm27_vm2, %v160_v21, 0.0 }
  0xe2   :  { %v158_v22 = vld [vmem:[#allocation2] sm:$0xff] }
  0xe3   :  { %162 = vst.msk [vmem:[%s359_s2] sm:$0xff] %vm27_vm2, %v158_v22  ;;  %v184_v24 = vmul.f32 %v158_v22, %v158_v22  ;;  %v167_v27 = vsel %vm27_vm2, %v158_v22, 0.0  ;;  %v191_v37 = vsel %vm27_vm2, %v186_v26, 0.0 }
  0xe4   :  { %v161_v23 = vld [vmem:[#allocation2 + $0x18] sm:$0xff] }
  0xe5   :  { %165 = vst.msk [vmem:[%s359_s2 + $0x18] sm:$0xff] %vm27_vm2, %v161_v23  ;;  %v188_v32 = vsel %vm27_vm2, %v184_v24, 0.0  ;;  %v187_v33 = vmul.f32 %v161_v23, %v161_v23  ;;  %v172_v38 = vsel %vm27_vm2, %v161_v23, 0.0 }
  0xe6   :  { %v159_v25 = vld [vmem:[#allocation2 + $0x8] sm:$0xff] }
  0xe7   :  { %163 = vst.msk [vmem:[%s359_s2 + $0x8] sm:$0xff] %vm27_vm2, %v159_v25  ;;  %v168_v28 = vsel %vm27_vm2, %v159_v25, 0.0  ;;  %v185_v29 = vmul.f32 %v159_v25, %v159_v25  ;;  %v193_v41 = vsel %vm27_vm2, %v187_v33, 0.0 }
  0xe8   :  { %v169_v30 = vadd.f32 %v168_v28, %v167_v27 }
  0xe9   :  { %v189_v34 = vsel %vm27_vm2, %v185_v29, 0.0 }
  0xea   :  { %v171_v35 = vadd.f32 %v170_v31, %v169_v30  ;;  %v190_v36 = vadd.f32 %v189_v34, %v188_v32 }
  0xec   :  { %v173_v39 = vadd.f32 %v172_v38, %v171_v35  ;;  %v192_v40 = vadd.f32 %v191_v37, %v190_v36 }
  0xee   :  { %v174_v42 = vrot.slane %v173_v39, 4  ;;  %v194_v43 = vadd.f32 %v193_v41, %v192_v40 }
  0xf0   :  { %v175_v44 = vadd.f32 %v174_v42, %v173_v39  ;;  %v195_v45 = vrot.slane %v194_v43, 4 }
  0xf2   :  { %v176_v46 = vrot.slane %v175_v44, 2  ;;  %v196_v47 = vadd.f32 %v195_v45, %v194_v43 }
  0xf4   :  { %v177_v48 = vadd.f32 %v176_v46, %v175_v44  ;;  %v197_v49 = vrot.slane %v196_v47, 2 }
  0xf6   :  { %v178_v50 = vrot.slane %v177_v48, 1  ;;  %v198_v51 = vadd.f32 %v197_v49, %v196_v47 }
  0xf8   :  { %v179_v53 = vadd.f32 %v178_v50, %v177_v48  ;;  %v199_v54 = vrot.slane %v198_v51, 1 }
  0xfa   :  { %v180_v56 = vadd.f32 %v179_v53, %v166_v52  ;;  %v200_v57 = vadd.f32 %v199_v54, %v198_v51 }
  0xfc   :  { %182 = vst.msk [vmem:[%s356_s3] sm:$0x1] %vm21_vm1, %v180_v56  ;;  %v201_v58 = vadd.f32 %v200_v57, %v183_v55 }
  0xfe   :  { %202 = vst.msk [vmem:[%s357_s4] sm:$0x1] %vm21_vm1, %v201_v58 }

// kernel: encoder_forward.10
= control target key start
LH: loop header
LB: loop body
LE: loop exit
PB: predicated region body
PF: predicated region fallthrough
CT: control target
= control target key end

     0   :  { %v33_v6 = vlaneseq  ;;  %vm78_vm0 = vcmask 130048   ;;  %s157_s1 = inlined_call_operand.vmem [shape: f32[1,16], index: 1, kind: input, shape index: {}]   ;;  %s158_s2 = inlined_call_operand.vmem [shape: f32[1,16], index: 2, kind: input, shape index: {}]   ;;  %s159_s0 = inlined_call_operand.vmem [shape: f32[32,16], index: 0, kind: input, shape index: {}]   ;;  %s160_s3 = inlined_call_operand.vmem [shape: f32[1,16], index: 3, kind: input, shape index: {}]   ;;  %s161_s4 = inlined_call_operand.vmem [shape: f32[1,16], index: 4, kind: input, shape index: {}]   ;;  %s162_s5 = inlined_call_operand.vmem [shape: f32[32,16], index: 5, kind: output, shape index: {}]  }
   0x1   :  { %v24_v0 = vld [vmem:[%s157_s1] sm:$0x1]  ;;  %v21_v12 = vld [vmem:[%s159_s0 + $0x8] sm:$0xff]  ;;  %v22_v13 = vld [vmem:[%s159_s0 + $0x10] sm:$0xff] }
   0x2   :  { %v26_v1 = vld [vmem:[%s158_s2] sm:$0x1]  ;;  %v25_v2 = vmul.f32 0.03125, %v24_v0  ;;  %v34_v8 = vshrl.u32 %v33_v6, 7  ;;  %v23_v14 = vld [vmem:[%s159_s0 + $0x18] sm:$0xff] }
   0x3   :  { %v27_v3 = vmul.f32 0.03125, %v26_v1  ;;  %v20_v10 = vld [vmem:[%s159_s0] sm:$0xff] }
   0x4   :  { %v28_v4 = vmul.f32 %v25_v2, %v25_v2  ;;  %v35_v9 = vsub.s32 0, %v34_v8  ;;  %v87_v21 = vld [vmem:[%s160_s3] ss:$0 sm:$0xff] }
   0x5   :  { %v88_v26 = vld [vmem:[%s161_s4] ss:$0 sm:$0xff] }
   0x6   :  { %v29_v5 = vsub.f32 %v27_v3, %v28_v4  ;;  %v36_v11 = vrot.slane %v25_v2, %v35_v9 }
   0x8   :  { %v30_v7 = vadd.f32 1e-05, %v29_v5  ;;  %v38_v15 = vsub.f32 %v20_v10, %v36_v11  ;;  %v39_v16 = vsub.f32 %v21_v12, %v36_v11  ;;  %v40_v17 = vsub.f32 %v22_v13, %v36_v11 }
   0x9   :  { %v41_v18 = vsub.f32 %v23_v14, %v36_v11 }
   0xa   :  { %89 = vrsqrt.f32 %v30_v7 }
  0x17   :  { %v90_v19 = vpop.eup %89 }
  0x18   :  { %v46_v20 = vrot.slane %v90_v19, %v35_v9 }
  0x1a   :  { %v48_v22 = vmul.f32 %v46_v20, %v38_v15  ;;  %v49_v23 = vmul.f32 %v46_v20, %v39_v16  ;;  %v50_v24 = vmul.f32 %v46_v20, %v40_v17  ;;  %v51_v25 = vmul.f32 %v46_v20, %v41_v18 }
  0x1c   :  { %v59_v27 = vmul.f32 %v87_v21, %v48_v22  ;;  %v60_v28 = vmul.f32 %v87_v21, %v49_v23  ;;  %v61_v29 = vmul.f32 %v87_v21, %v50_v24  ;;  %v62_v30 = vmul.f32 %v87_v21, %v51_v25 }
  0x1e   :  { %v70_v31 = vadd.f32 %v88_v26, %v59_v27  ;;  %v71_v32 = vadd.f32 %v88_v26, %v60_v28  ;;  %v72_v33 = vadd.f32 %v88_v26, %v61_v29  ;;  %v73_v34 = vadd.f32 %v88_v26, %v62_v30 }
  0x20   :  { %v74_v35 = vmax.f32 %v70_v31, 0.0  ;;  %v75_v36 = vmax.f32 %v71_v32, 0.0  ;;  %v76_v37 = vmax.f32 %v72_v33, 0.0  ;;  %v77_v38 = vmax.f32 %v73_v34, 0.0 }
  0x22   :  { %79 = vst.msk [vmem:[%s162_s5] sm:$0xff] %vm78_vm0, %v74_v35  ;;  %80 = vst.msk [vmem:[%s162_s5 + $0x8] sm:$0xff] %vm78_vm0, %v75_v36 }
  0x23   :  { %81 = vst.msk [vmem:[%s162_s5 + $0x10] sm:$0xff] %vm78_vm0, %v76_v37  ;;  %82 = vst.msk [vmem:[%s162_s5 + $0x18] sm:$0xff] %vm78_vm0, %v77_v38 }

// kernel: encoder_forward.11
= control target key start
LH: loop header
LB: loop body
LE: loop exit
PB: predicated region body
PF: predicated region fallthrough
CT: control target
= control target key end

     0   :  { %16 = vsyncpa [#allocation4], 0  ;;  %v87_v8 = vlaneseq  ;;  %v647_v15 = vmov 1966171168   ;;  %s811_s0 = inlined_call_operand.vmem [shape: bf16[2,256], index: 0, kind: input, shape index: {}]   ;;  %s812_s1 = inlined_call_operand.vmem [shape: bf16[256,64], index: 1, kind: input, shape index: {}]   ;;  %s813_s2 = inlined_call_operand.vmem [shape: f32[1,64], index: 2, kind: input, shape index: {}]   ;;  %s814_s3 = inlined_call_operand.vmem [shape: bf16[64,32], index: 3, kind: input, shape index: {}]   ;;  %s815_s4 = inlined_call_operand.vmem [shape: f32[1,32], index: 4, kind: input, shape index: {}]   ;;  %s816_s5 = inlined_call_operand.vmem [shape: bf16[64,32], index: 5, kind: input, shape index: {}]   ;;  %s817_s6 = inlined_call_operand.vmem [shape: f32[1,32], index: 6, kind: input, shape index: {}]   ;;  %s818_s7 = inlined_call_operand.vmem [shape: f32[2,32], index: 7, kind: input, shape index: {}]   ;;  %s819_s8 = inlined_call_operand.hbm [shape: f32[2,32], index: 8, kind: output, shape index: {0}]   ;;  %s820_s9 = inlined_call_operand.hbm [shape: f32[2,32], index: 9, kind: output, shape index: {1}]   ;;  %s821_s10 = inlined_call_operand.hbm [shape: f32[2,32], index: 10, kind: output, shape index: {2}]  }
   0x1   :  { %v557_v0 = vld [vmem:[%s812_s1 + $0x78] sm:$0xff]   ;;  %v559_v2 = vld [vmem:[%s812_s1 + $0x70] sm:$0xff]   ;;  %v561_v4 = vld [vmem:[%s812_s1 + $0x68] sm:$0xff]   ;;  %v85_v16 = vunpack.c.l.s4 %v647_v15 }
   0x2   :  { %v558_v1 = vld [vmem:[%s812_s1 + $0x38] sm:$0xff]   ;;  %495 = vmatprep.subr.bf16.mxu0 %v557_v0  ;;  %v560_v3 = vld [vmem:[%s812_s1 + $0x30] sm:$0xff]   ;;  %v562_v5 = vld [vmem:[%s812_s1 + $0x28] sm:$0xff]   ;;  %v88_v12 = vshrl.u32 %v87_v8, 7 }
   0x3   :  { %496 = vmatpush3.bf16.msra.mxu0 %v558_v1  ;;  %v563_v6 = vld [vmem:[%s812_s1 + $0x60] sm:$0xff]   ;;  %v565_v9 = vld [vmem:[%s812_s1 + $0x58] sm:$0xff]   ;;  %v567_v11 = vld [vmem:[%s812_s1 + $0x50] sm:$0xff]   ;;  %v86_v19 = vunpack.c.0.s8 %v85_v16 }
   0x4   :  { %497 = vmatprep.subr.bf16.mxu0 %v559_v2  ;;  %v564_v7 = vld [vmem:[%s812_s1 + $0x20] sm:$0xff]   ;;  %v566_v10 = vld [vmem:[%s812_s1 + $0x18] sm:$0xff]   ;;  %v568_v14 = vld [vmem:[%s812_s1 + $0x10] sm:$0xff]  }
   0x5   :  { %v465_v13 = vld.sshfl [vmem:[%s811_s0] sm:$0x11 pattern:$0x75316420]  ;;  %v569_v17 = vld [vmem:[%s812_s1 + $0x48] sm:$0xff]   ;;  %v89_v20 = vsub.s32 %v86_v19, %v88_v12 }
   0x6   :  { %v83_v18 = vcombine.high %v465_v13, %v465_v13 }
   0x7   :  { %498 = vmatpush3.bf16.msra.mxu0 %v560_v3 }
   0x8   :  { %499 = vmatprep.subr.bf16.mxu0 %v561_v4 }
   0xb   :  { %500 = vmatpush3.bf16.msra.mxu0 %v562_v5 }
   0xc   :  { %501 = vmatprep.subr.bf16.mxu0 %v563_v6 }
   0xf   :  { %502 = vmatpush3.bf16.msra.mxu0 %v564_v7 }
  0x10   :  { %503 = vmatprep.subr.bf16.mxu0 %v565_v9 }
  0x13   :  { %504 = vmatpush3.bf16.msra.mxu0 %v566_v10 }
  0x14   :  { %505 = vmatprep.subr.bf16.mxu0 %v567_v11 }
  0x15   :  { %17 = vsyncpa [#allocation6], 0  ;;  %v570_v21 = vld [vmem:[%s812_s1 + $0x8] sm:$0xff]   ;;  %v97_v22 = vrot.slane %v83_v18, %v89_v20  ;;  %v571_v23 = vld [vmem:[%s812_s1 + $0x40] sm:$0xff]   ;;  %v90_v25 = vrot.slane %v465_v13, %v89_v20  ;;  %vm39_vm0 = vcmask 517120   ;;  %v648_v26 = vmov 0.0  }
  0x16   :  { %v572_v24 = vld [vmem:[%s812_s1] sm:$0xff]   ;;  %40 = vst.msk [vmem:[#allocation2] sm:$0x3] %vm39_vm0, %v648_v26  ;;  %527 = vmatprep.subr.bf16.mxu1 %v648_v26  ;;  %v573_v27 = vld [vmem:[%s814_s3 + $0x18] sm:$0xff]   ;;  %v574_v28 = vld [vmem:[%s814_s3 + $0x10] sm:$0xff]   ;;  %vm649_vm1 = vmmov 0  }
  0x17   :  { %506 = vmatpush3.bf16.msra.mxu0 %v568_v14  ;;  %228 = vmatprep.mubr.bf16.mxu0 %v97_v22  ;;  %v575_v29 = vld [vmem:[%s814_s3 + $0x8] sm:$0xff]   ;;  %v576_v30 = vld [vmem:[%s814_s3] sm:$0xff]   ;;  %vm292_vm2 = vcmask 523264   ;;  %v577_v42 = vld [vmem:[%s816_s5 + $0x18] sm:$0xff]   ;;  %s650_s0 = smov [#allocation5]   ;;  %vm417_vm3 = vcmask 254976  }
  0x18   :  { %507 = vmatprep.subr.bf16.mxu0 %v569_v17  ;;  %528 = vmatpush3.bf16.msra.mxu1 %v573_v27  ;;  %v482_v38 = vld [vmem:[%s813_s2] ss:$0 sm:$0xff]  ;;  %v578_v44 = vld [vmem:[%s816_s5 + $0x10] sm:$0xff]   ;;  %v579_v45 = vld [vmem:[%s816_s5 + $0x8] sm:$0xff]   ;;  %s440_s23 = sshll.u32 %s650_s0, 4  ;;  %s441_s23 = int_to_ptr.vmem [resolvable:$true] %s440_s23 }
  0x19   :  { %529 = vmatprep.subr.bf16.mxu1 %v648_v26  ;;  %535 = vmatprep.mubr.msk.bf16.mxu1 %vm649_vm1, %v648_v26  ;;  %v580_v46 = vld [vmem:[%s816_s5] sm:$0xff]   ;;  %s583_s24 = scalar_lea.vmem %s441_s23, 32  ;;  %p588_p1 = scmp.lt.s32.totalorder %s441_s23, %s441_s23 }
  0x1a   :  { %v483_v47 = vld [vmem:[%s815_s4] ss:$0 sm:$0xff]  ;;  %p584_p0 = scmp.ne.s32.totalorder %s441_s23, %s583_s24  ;;  %p589_p2 = scmp.lt.s32.totalorder %s583_s24, %s583_s24 }
  0x1b   :  { %508 = vmatpush3.bf16.msra.mxu0 %v570_v21 }
  0x1c   :  { %509 = vmatprep.subr.bf16.mxu0 %v571_v23  ;;  %530 = vmatpush3.bf16.msra.mxu1 %v574_v28  ;;  %p590_p3 = por %p589_p2, %p588_p1 }
  0x1d   :  { %531 = vmatprep.subr.bf16.mxu1 %v648_v26  ;;  %v41_v32 = vld [vmem:[#allocation2] sm:$0x3] }
  0x1e   :  { %p591_p4 = pnand %p590_p3, %p584_p0 }
  0x1f   :  { %510 = vmatpush3.bf16.msra.mxu0 %v572_v24 }
  0x20   :  { %532 = vmatpush3.bf16.msra.mxu1 %v575_v29 }
  0x21   :  { %533 = vmatprep.subr.bf16.mxu1 %v648_v26 }
  0x22   :  { %229 = vmatmul.mubr.bf16.vlgmr.msra.gmra.mxu0 %v90_v25 }
  0x24   :  { %534 = vmatpush3.bf16.msra.mxu1 %v576_v30 }
  0x25   :  { %539 = vmatprep.subr.bf16.mxu1 %v648_v26 }
  0xe2   :  { %v511_v31 = vpop.f32.mrf.mxu0 }
  0xe4   :  { %v512_v33 = vpop.f32.mrf.mxu0 }
  0xe5   :  { %v513_v34 = vadd.f32 %v512_v33, %v511_v31 }
  0xe6   :  { %v514_v35 = vpop.f32.mrf.mxu0 }
  0xe7   :  { %v236_v36 = vadd.f32 %v513_v34, %v41_v32 }
  0xe8   :  { %v515_v37 = vpop.f32.mrf.mxu0 }
  0xe9   :  { %238 = vst.msk [vmem:[#allocation2] sm:$0x3] %vm39_vm0, %v236_v36 }
  0xf0   :  { %v242_v39 = vld [vmem:[#allocation2] sm:$0x3] }
  0xf1   :  { %v250_v40 = vadd.f32 %v482_v38, %v242_v39 }
  0xf3   :  { %v251_v41 = vmax.f32 %v250_v40, 0.0 }
  0xf5   :  { %v252_v43 = vpack.c.bf16 %v251_v41, %v251_v41 }
  0xf7   :  { %536 = vmatmul.mubr.msk.bf16.vlgmr.msra.gmra.mxu1 %vm292_vm2, %v252_v43 }
  0xf8   :  { %540 = vmatpush3.bf16.msra.mxu1 %v577_v42  ;;  %547 = vmatprep.mubr.msk.bf16.mxu1 %vm649_vm1, %v648_v26 }
  0xf9   :  { %541 = vmatprep.subr.bf16.mxu1 %v648_v26 }
  0xfc   :  { %542 = vmatpush3.bf16.msra.mxu1 %v578_v44 }
  0xfd   :  { %543 = vmatprep.subr.bf16.mxu1 %v648_v26 }
 0x100   :  { %544 = vmatpush3.bf16.msra.mxu1 %v579_v45 }
 0x101   :  { %545 = vmatprep.subr.bf16.mxu1 %v648_v26 }
 0x104   :  { %546 = vmatpush3.bf16.msra.mxu1 %v580_v46 }
 0x107   :  { %548 = vmatmul.mubr.msk.bf16.vlgmr.msra.gmra.mxu1 %vm292_vm2, %v252_v43 }
 0x1b7   :  { %v330_v48 = vpop.f32.mrf.mxu1 }
 0x1b8   :  { %v331_v49 = vadd.f32 %v483_v47, %v330_v48 }
 0x1b9   :  { %v537_v50 = vpop.f32.mrf.mxu1 }
 0x1ba   :  { %418 = vst.msk [vmem:[#allocation5] sm:$0x3] %vm417_vm3, %v331_v49 }
 0x1bb   :  { %v333_v51 = vpop.f32.mrf.mxu1 }
 0x1bc   :  { %594 = shalt.err (!%p591_p4)
}
 0x1bd   :  { %443 = dma.vmem_to_hbm [thread:$0]  %s441_s23, 32, %s820_s9, [#allocation6]   ;;  %v538_v52 = vpop.f32.mrf.mxu1  ;;  %v489_v53 = vld [vmem:[%s817_s6] ss:$0 sm:$0xff] }
 0x1be   :  { %s651_s27 = smov [#allocation7]   ;;  %v420_v60 = vld [vmem:[%s818_s7] sm:$0x3]  ;;  %s652_s9 = smov [#allocation3]  }
 0x1bf   :  { %s450_s28 = sshll.u32 %s651_s27, 4  ;;  %s430_s30 = sshll.u32 %s652_s9, 4  ;;  %s451_s28 = int_to_ptr.vmem [resolvable:$true] %s450_s28  ;;  %s431_s30 = int_to_ptr.vmem [resolvable:$true] %s430_s30 }
 0x1c0   :  { %s603_s6 = scalar_lea.vmem %s451_s28, 32  ;;  %p608_p6 = scmp.lt.s32.totalorder %s451_s28, %s451_s28 }
 0x1c1   :  { %p604_p5 = scmp.ne.s32.totalorder %s451_s28, %s603_s6  ;;  %p609_p7 = scmp.lt.s32.totalorder %s603_s6, %s603_s6 }
 0x1c3   :  { %p610_p8 = por %p609_p7, %p608_p6 }
 0x1c5   :  { %p611_p9 = pnand %p610_p8, %p604_p5 }
 0x1c7   :  { %v409_v54 = vpop.f32.mrf.mxu1 }
 0x1c8   :  { %v410_v55 = vadd.f32 %v489_v53, %v409_v54 }
 0x1c9   :  { %v549_v56 = vpop.f32.mrf.mxu1 }
 0x1ca   :  { %v415_v57 = vmul.f32 1.442695, %v410_v55 }
 0x1cb   :  { %v412_v58 = vpop.f32.mrf.mxu1 }
 0x1cc   :  { %581 = vpow2.f32 %v415_v57 }
 0x1cd   :  { %v550_v59 = vpop.f32.mrf.mxu1 }
 0x1d9   :  { %v582_v61 = vpop.eup %581 }
 0x1da   :  { %419 = vst.msk [vmem:[#allocation7] sm:$0x3] %vm417_vm3, %v582_v61  ;;  %v421_v62 = vmul.f32 %v582_v61, %v420_v60 }
 0x1db   :  { %614 = shalt.err (!%p611_p9)
}
 0x1dc   :  { %453 = dma.vmem_to_hbm [thread:$0]  %s451_s28, 32, %s821_s10, [#allocation6]   ;;  %v422_v63 = vadd.f32 %v421_v62, %v331_v49 }
 0x1dd   :  { %s623_s7 = scalar_lea.vmem %s431_s30, 32  ;;  %p628_p11 = scmp.lt.s32.totalorder %s431_s30, %s431_s30 }
 0x1de   :  { %423 = vst.msk [vmem:[#allocation3] sm:$0x3] %vm417_vm3, %v422_v63  ;;  %p624_p10 = scmp.ne.s32.totalorder %s431_s30, %s623_s7  ;;  %p629_p12 = scmp.lt.s32.totalorder %s623_s7, %s623_s7 }
 0x1e0   :  { %p630_p13 = por %p629_p12, %p628_p11 }
 0x1e2   :  { %p631_p0 = pnand %p630_p13, %p624_p10 }
 0x1e4   :  { %634 = shalt.err (!%p631_p0)
}
 0x1e5   :  { %433 = dma.vmem_to_hbm [thread:$0]  %s431_s30, 32, %s819_s8, [#allocation4]  }
 0x1e6   :  { %643 = dma.done.wait [#allocation4], 32  }
 0x1e7   :  { %644 = vsyncadd [#allocation4], 4294967264 }
 0x1e8   :  { %645 = dma.done.wait [#allocation6], 64  }
 0x1e9   :  { %646 = vsyncadd [#allocation6], 4294967232 }
 0x1ea   :  { %463 = vsyncpa [#allocation4], 1 }
 0x1eb   :  { %464 = vsyncpa [#allocation6], 1 }

</bundles_post_ra>
